<compile_context>
chip_gen: v6e
topology: v6e:2x2x1
jax: 0.10.0
libtpu: 0.0.40
codegen_flags: <defaults>
</compile_context>

<pallas_src>
import functools

import jax
import jax.numpy as jnp
import numpy as np
from jax.experimental import pallas as pl
from jax.experimental.pallas import tpu as pltpu

NEG_INF = float(np.finfo(np.float32).min)  # matches torch reference's masked value


def _transformer_layer_kernel(hv_ref, he_ref, ma_ref, mv_ref,
                              wq_ref, wk_ref, wv_ref, wo_ref,
                              bmat_ref, cmat_ref, rep_ref,
                              g0_ref, b0_ref, win_ref, bin_ref,
                              wout_ref, bout_ref, g1_ref, b1_ref,
                              out_ref, *, qk_scale):
    f32 = jnp.float32
    bf16 = jnp.bfloat16

    hv = hv_ref[...]                                   # (Mt, W) f32, packed rows
    Mt, W = hv.shape
    K = he_ref.shape[0] // Mt                          # neighbors per node

    # ---- NeighborAttention projections (bf16 operands, f32 accumulation) ----
    he = he_ref[...]                                   # (Mt*K, P*Cin) bf16 packed
    kf = jnp.dot(he, wk_ref[...], preferred_element_type=f32)       # (Mt*K, W)
    vf = jnp.dot(he, wv_ref[...], preferred_element_type=f32)       # (Mt*K, W)
    q = jnp.dot(hv.astype(bf16), wq_ref[...],
                preferred_element_type=f32) * qk_scale               # (Mt, W)

    # ---- all-head logits in one pass ----------------------------------------
    # prod[m,k,c] = q[m,c] * K[m,k,c]; bmat is the (W,W) 0/1 "same d-lane group"
    # matrix, so one MXU matmul does the segmented per-head reduce and
    # replicates each head's logit across its d lanes.
    prod = (q[:, None, :] * kf.reshape(Mt, K, W)).reshape(Mt * K, W)
    logit = jnp.dot(prod.astype(bf16), bmat_ref[...],
                    preferred_element_type=f32)                      # (Mt*K, W)

    # mask_attend replicated across each node's H lanes (0/1 exact in bf16)
    mask_e = jnp.dot(ma_ref[...], rep_ref[...], preferred_element_type=f32)

    logit = jnp.where(mask_e > 0.0, logit, NEG_INF).reshape(Mt, K, W)
    m = jnp.max(logit, axis=1, keepdims=True)          # per-(node,head) max over K
    e = jnp.exp(logit - m)
    denom = jnp.sum(e, axis=1, keepdims=True)
    att = mask_e.reshape(Mt, K, W) * (e * pl.reciprocal(denom, approx=True))
    upd = jnp.sum(att * vf.reshape(Mt, K, W), axis=1)                # (Mt, W)

    dh = jnp.dot(upd.astype(bf16), wo_ref[...], preferred_element_type=f32)

    # ---- residual + LayerNorm (single pass: mu and E[x^2] together) ---------
    cmat = cmat_ref[...]                               # (W,W) segmented 1/H mean

    def layer_norm(x, g, b):
        mu = jnp.dot(x, cmat, preferred_element_type=f32)
        ex2 = jnp.dot(x * x, cmat, preferred_element_type=f32)
        var = ex2 - mu * mu
        return (x - mu) * jax.lax.rsqrt(var + 1e-6) * g + b

    x = layer_norm(hv + dh, g0_ref[...], b0_ref[...])

    # ---- PositionWiseFeedForward ---------------------------------------------
    h1 = jnp.maximum(
        jnp.dot(x.astype(bf16), win_ref[...], preferred_element_type=f32)
        + bin_ref[...], 0.0)
    dh2 = jnp.dot(h1.astype(bf16), wout_ref[...], preferred_element_type=f32) \
        + bout_ref[...]

    y = layer_norm(x + dh2, g1_ref[...], b1_ref[...])

    # ---- node mask (replicated across each node's H lanes) -------------------
    mv_e = jnp.dot(mv_ref[...], rep_ref[...], preferred_element_type=f32)
    out_ref[...] = (mv_e * y).astype(out_ref.dtype)


def _block_diag(w, p):
    if p == 1:
        return w
    return jnp.kron(jnp.eye(p, dtype=w.dtype), w)


def _num_tensorcores():
    """Best-effort TensorCores-per-device (v7x: 2, v5e/v6e: 1).  Falls back to 1."""
    probes = []
    try:
        probes.append(pltpu.get_tpu_info())
    except Exception:
        pass
    try:
        probes.append(jax.devices()[0])
    except Exception:
        pass
    for obj in probes:
        for attr in ("num_cores", "core_count", "tensorcore_count",
                     "num_tensorcores", "cores_per_chip"):
            v = getattr(obj, attr, None)
            if isinstance(v, int) and 1 <= v <= 8:
                return v
    return 1


def transformer_layer(h_V, h_E, mask_V, mask_attend, params, *, n_heads=4,
                      row_tile=None):
    N, L, H = h_V.shape
    K, Cin = h_E.shape[2], h_E.shape[3]
    R = N * L
    assert H % n_heads == 0
    d = H // n_heads
    FF = params["win"].shape[1]

    # ---- lane packing: P rows per 128-lane group (block-diagonal weights) ----
    P = 128 // H if (H <= 128 and 128 % H == 0) else 1
    W = P * H

    f32, bf16 = jnp.float32, jnp.bfloat16

    # ---- VMEM budget (v7x 64 MiB vs v5e/v6e 128 MiB) --------------------------
    try:
        vmem_cap = int(pltpu.get_tpu_info().vmem_capacity_bytes)
    except Exception:
        vmem_cap = 64 << 20
    vmem_limit = max(32 << 20, min(vmem_cap * 3 // 4, 96 << 20))

    # resident weights (conservatively double-buffered) + per-packed-row cost
    weight_bytes = 2 * ((2 * W * W + 2 * P * Cin * W + 2 * W * P * FF) * 2  # bf16
                        + (2 * W * W) * 4)                                   # f32 consts
    bytes_per_row = (2 * K * P * Cin * 2      # h_E tile, double-buffered bf16
                     + 2 * 2 * W * 4          # h_V + out tiles, double-buffered f32
                     + 2 * (K + 1) * P * 2    # mask tiles, double-buffered bf16
                     + 6 * K * W * 4          # kf/vf + prod/logit/e/att/mask_e temps
                     + (8 * W + P * FF) * 4)  # row-wise f32 temps (q, x, h1, ...)
    usable = vmem_limit - weight_bytes - (8 << 20)     # headroom for compiler scratch
    max_rows = max(8, usable // bytes_per_row)

    Rp = pl.cdiv(R, P)                         # packed rows actually needed
    n_cores = _num_tensorcores()

    tile = int(row_tile) if row_tile is not None else 1024
    tile = max(8, (min(tile, int(max_rows)) // 8) * 8)
    if Rp <= tile:
        # only split the (otherwise single) grid step when >1 TensorCore exists
        tile = max(8, ((pl.cdiv(Rp, n_cores) + 7) // 8) * 8)
    Rp_pad = pl.cdiv(Rp, tile) * tile
    grid = Rp_pad // tile
    R_pad = Rp_pad * P

    # ---- host-side layout / dtype prep ----------------------------------------
    hv = h_V.reshape(R, H).astype(f32)
    he = h_E.reshape(R, K, Cin).astype(f32)
    ma = mask_attend.reshape(R, K).astype(f32)
    mv = mask_V.reshape(R).astype(f32)
    pad = R_pad - R
    if pad:
        hv = jnp.pad(hv, ((0, pad), (0, 0)))
        he = jnp.pad(he, ((0, pad), (0, 0), (0, 0)))
        ma = jnp.pad(ma, ((0, pad), (0, 0)))
        mv = jnp.pad(mv, ((0, pad),))

    # pack P consecutive nodes into the lane dimension
    hv_p = hv.reshape(Rp_pad, W)
    he_p = (he.reshape(Rp_pad, P, K, Cin).transpose(0, 2, 1, 3)
              .reshape(Rp_pad * K, P * Cin).astype(bf16))
    ma_p = (ma.reshape(Rp_pad, P, K).transpose(0, 2, 1)
              .reshape(Rp_pad * K, P).astype(bf16))
    mv_p = mv.reshape(Rp_pad, P).astype(bf16)

    # block-diagonal weights (bf16 MXU operands)
    wq = _block_diag(params["wq"].astype(f32), P).astype(bf16)
    wk = _block_diag(params["wk"].astype(f32), P).astype(bf16)
    wv = _block_diag(params["wv"].astype(f32), P).astype(bf16)
    wo = _block_diag(params["wo"].astype(f32), P).astype(bf16)
    win = _block_diag(params["win"].astype(f32), P).astype(bf16)
    wout = _block_diag(params["wout"].astype(f32), P).astype(bf16)

    lane = np.arange(W)
    # "sum over my head's d lanes, replicated" 0/1 block matrix (exact in bf16)
    bmat = jnp.asarray((lane[:, None] // d == lane[None, :] // d)
                       .astype(np.float32)).astype(bf16)
    # segmented per-node mean matrix for LayerNorm (1/H is exact for H=32)
    cmat = jnp.asarray((lane[:, None] // H == lane[None, :] // H)
                       .astype(np.float32) / H)
    # (P, W) mask lane-replication matrix (0/1, exact in bf16)
    rep = jnp.asarray((np.arange(P)[:, None] == lane[None, :] // H)
                      .astype(np.float32)).astype(bf16)

    def tile_lanes(v, reps):
        return jnp.tile(jnp.asarray(v, f32).reshape(1, -1), (1, reps))

    g0 = tile_lanes(params["g0"], P)
    b0 = tile_lanes(params["b0"], P)
    g1 = tile_lanes(params["g1"], P)
    b1 = tile_lanes(params["b1"], P)
    bin_ = tile_lanes(params["bin"], P)
    bout = tile_lanes(params["bout"], P)

    def full_spec(arr):
        nd = arr.ndim
        return pl.BlockSpec(arr.shape, lambda i, _nd=nd: (0,) * _nd)

    in_specs = [
        pl.BlockSpec((tile, W), lambda i: (i, 0)),             # packed h_V (f32)
        pl.BlockSpec((tile * K, P * Cin), lambda i: (i, 0)),   # packed h_E (bf16)
        pl.BlockSpec((tile * K, P), lambda i: (i, 0)),         # mask_attend (bf16)
        pl.BlockSpec((tile, P), lambda i: (i, 0)),             # mask_V (bf16)
        full_spec(wq), full_spec(wk), full_spec(wv), full_spec(wo),
        full_spec(bmat), full_spec(cmat), full_spec(rep),
        full_spec(g0), full_spec(b0),
        full_spec(win), full_spec(bin_), full_spec(wout), full_spec(bout),
        full_spec(g1), full_spec(b1),
    ]

    out = pl.pallas_call(
        functools.partial(_transformer_layer_kernel,
                          qk_scale=float(1.0 / np.sqrt(d))),
        out_shape=jax.ShapeDtypeStruct((Rp_pad, W), jnp.float32),
        grid_spec=pltpu.PrefetchScalarGridSpec(
            num_scalar_prefetch=0,
            grid=(grid,),
            in_specs=in_specs,
            out_specs=pl.BlockSpec((tile, W), lambda i: (i, 0)),
        ),
        compiler_params=pltpu.CompilerParams(
            dimension_semantics=("parallel",),
            vmem_limit_bytes=int(vmem_limit)),
    )(hv_p, he_p, ma_p, mv_p,
      wq, wk, wv, wo, bmat, cmat, rep,
      g0, b0, win, bin_, wout, bout, g1, b1)

    return out.reshape(Rp_pad * P, H)[:R].reshape(N, L, H)


def _reference(h_V, h_E, mask_V, mask_attend, p, n_heads):
    """Pure-JAX reproduction of the PyTorch forward (eval mode)."""
    hi = jax.lax.Precision.HIGHEST
    N, L, H = h_V.shape
    K = h_E.shape[2]
    d = H // n_heads
    Q = jnp.matmul(h_V, p["wq"], precision=hi)
    Kf = jnp.matmul(h_E, p["wk"], precision=hi)
    Vf = jnp.matmul(h_E, p["wv"], precision=hi)
    Qh = Q.reshape(N, L, 1, n_heads, d)
    Kh = Kf.reshape(N, L, K, n_heads, d)
    logits = jnp.sum(Qh * Kh, axis=-1) / np.sqrt(d)                  # (N,L,K,heads)
    mask = mask_attend[..., None]
    logits = jnp.where(mask > 0, logits, NEG_INF)
    attend = jax.nn.softmax(logits, axis=2)
    attend = mask * attend
    Vh = Vf.reshape(N, L, K, n_heads, d)
    upd = jnp.sum(attend[..., None] * Vh, axis=2).reshape(N, L, H)
    dh = jnp.matmul(upd, p["wo"], precision=hi)

    def ln(x, g, b):
        mu = x.mean(-1, keepdims=True)
        var = ((x - mu) ** 2).mean(-1, keepdims=True)
        return (x - mu) / jnp.sqrt(var + 1e-6) * g + b

    x = ln(h_V + dh, p["g0"], p["b0"])
    h1 = jax.nn.relu(jnp.matmul(x, p["win"], precision=hi) + p["bin"])
    dh2 = jnp.matmul(h1, p["wout"], precision=hi) + p["bout"]
    y = ln(x + dh2, p["g1"], p["b1"])
    return mask_V[..., None] * y


if __name__ == "__main__":
    N, L, K = 2, 64, 8
    H, Cin, heads = 32, 64, 4
    FF = 4 * H

    key = jax.random.PRNGKey(0)
    ks = jax.random.split(key, 16)
    h_V = jax.random.normal(ks[0], (N, L, H), jnp.float32)
    h_E = jax.random.normal(ks[1], (N, L, K, Cin), jnp.float32)
    mask_V = (jax.random.uniform(ks[2], (N, L)) > 0.2).astype(jnp.float32)
    mask_attend = (jax.random.uniform(ks[3], (N, L, K)) > 0.3).astype(jnp.float32)
    mask_attend = mask_attend.at[..., 0].set(1.0)  # keep every row non-empty

    s = 0.1
    params = {
        "wq": s * jax.random.normal(ks[4], (H, H), jnp.float32),
        "wk": s * jax.random.normal(ks[5], (Cin, H), jnp.float32),
        "wv": s * jax.random.normal(ks[6], (Cin, H), jnp.float32),
        "wo": s * jax.random.normal(ks[7], (H, H), jnp.float32),
        "g0": 1.0 + s * jax.random.normal(ks[8], (1, H), jnp.float32),
        "b0": s * jax.random.normal(ks[9], (1, H), jnp.float32),
        "win": s * jax.random.normal(ks[10], (H, FF), jnp.float32),
        "bin": s * jax.random.normal(ks[11], (1, FF), jnp.float32),
        "wout": s * jax.random.normal(ks[12], (FF, H), jnp.float32),
        "bout": s * jax.random.normal(ks[13], (1, H), jnp.float32),
        "g1": 1.0 + s * jax.random.normal(ks[14], (1, H), jnp.float32),
        "b1": s * jax.random.normal(ks[15], (1, H), jnp.float32),
    }

    out = transformer_layer(h_V, h_E, mask_V, mask_attend, params, n_heads=heads)
    out = jax.block_until_ready(out)

    ref = _reference(h_V, h_E, mask_V, mask_attend, params, heads)
    # bf16 matmul operands (f32 accumulation) → slightly looser tolerance
    np.testing.assert_allclose(np.asarray(out), np.asarray(ref),
                               rtol=2e-2, atol=2e-2)
    print("KERNEL_OK")
</pallas_src>

<mosaic_0001>
module attributes {stable_mosaic.version = 11 : i64} {
  func.func @_transformer_layer_kernel(%arg0: i32, %arg1: memref<32x128xf32, #tpu.memory_space<vmem>>, %arg2: memref<256x256xbf16, #tpu.memory_space<vmem>>, %arg3: memref<256x4xbf16, #tpu.memory_space<vmem>>, %arg4: memref<32x4xbf16, #tpu.memory_space<vmem>>, %arg5: memref<128x128xbf16, #tpu.memory_space<vmem>>, %arg6: memref<256x128xbf16, #tpu.memory_space<vmem>>, %arg7: memref<256x128xbf16, #tpu.memory_space<vmem>>, %arg8: memref<128x128xbf16, #tpu.memory_space<vmem>>, %arg9: memref<128x128xbf16, #tpu.memory_space<vmem>>, %arg10: memref<128x128xf32, #tpu.memory_space<vmem>>, %arg11: memref<4x128xbf16, #tpu.memory_space<vmem>>, %arg12: memref<1x128xf32, #tpu.memory_space<vmem>>, %arg13: memref<1x128xf32, #tpu.memory_space<vmem>>, %arg14: memref<128x512xbf16, #tpu.memory_space<vmem>>, %arg15: memref<1x512xf32, #tpu.memory_space<vmem>>, %arg16: memref<512x128xbf16, #tpu.memory_space<vmem>>, %arg17: memref<1x128xf32, #tpu.memory_space<vmem>>, %arg18: memref<1x128xf32, #tpu.memory_space<vmem>>, %arg19: memref<1x128xf32, #tpu.memory_space<vmem>>, %arg20: memref<32x128xf32, #tpu.memory_space<vmem>>) attributes {dimension_semantics = [#tpu.dimension_semantics<parallel>], iteration_bounds = array<i64: 1>, scalar_prefetch = 0 : i64, scratch_operands = 0 : i64, tpu.core_type = #tpu.core_type<tc>, window_params = [{transform_indices = @transform_0, window_bounds = array<i64: 32, 128>}, {transform_indices = @transform_1, window_bounds = array<i64: 256, 256>}, {transform_indices = @transform_2, window_bounds = array<i64: 256, 4>}, {transform_indices = @transform_3, window_bounds = array<i64: 32, 4>}, {pipeline_mode = #tpu.pipeline_mode<synchronous>, transform_indices = @transform_4, window_bounds = array<i64: 128, 128>}, {pipeline_mode = #tpu.pipeline_mode<synchronous>, transform_indices = @transform_5, window_bounds = array<i64: 256, 128>}, {pipeline_mode = #tpu.pipeline_mode<synchronous>, transform_indices = @transform_6, window_bounds = array<i64: 256, 128>}, {pipeline_mode = #tpu.pipeline_mode<synchronous>, transform_indices = @transform_7, window_bounds = array<i64: 128, 128>}, {pipeline_mode = #tpu.pipeline_mode<synchronous>, transform_indices = @transform_8, window_bounds = array<i64: 128, 128>}, {pipeline_mode = #tpu.pipeline_mode<synchronous>, transform_indices = @transform_9, window_bounds = array<i64: 128, 128>}, {pipeline_mode = #tpu.pipeline_mode<synchronous>, transform_indices = @transform_10, window_bounds = array<i64: 4, 128>}, {pipeline_mode = #tpu.pipeline_mode<synchronous>, transform_indices = @transform_11, window_bounds = array<i64: 1, 128>}, {pipeline_mode = #tpu.pipeline_mode<synchronous>, transform_indices = @transform_12, window_bounds = array<i64: 1, 128>}, {pipeline_mode = #tpu.pipeline_mode<synchronous>, transform_indices = @transform_13, window_bounds = array<i64: 128, 512>}, {pipeline_mode = #tpu.pipeline_mode<synchronous>, transform_indices = @transform_14, window_bounds = array<i64: 1, 512>}, {pipeline_mode = #tpu.pipeline_mode<synchronous>, transform_indices = @transform_15, window_bounds = array<i64: 512, 128>}, {pipeline_mode = #tpu.pipeline_mode<synchronous>, transform_indices = @transform_16, window_bounds = array<i64: 1, 128>}, {pipeline_mode = #tpu.pipeline_mode<synchronous>, transform_indices = @transform_17, window_bounds = array<i64: 1, 128>}, {pipeline_mode = #tpu.pipeline_mode<synchronous>, transform_indices = @transform_18, window_bounds = array<i64: 1, 128>}, {transform_indices = @transform_19, window_bounds = array<i64: 32, 128>}]} {
    %c0 = arith.constant 0 : index
    %c0_0 = arith.constant 0 : index
    %0 = vector.load %arg1[%c0, %c0_0] : memref<32x128xf32, #tpu.memory_space<vmem>>, vector<32x128xf32>
    %c0_1 = arith.constant 0 : index
    %c0_2 = arith.constant 0 : index
    %1 = vector.load %arg2[%c0_1, %c0_2] : memref<256x256xbf16, #tpu.memory_space<vmem>>, vector<256x256xbf16>
    %c0_3 = arith.constant 0 : index
    %c0_4 = arith.constant 0 : index
    %2 = vector.load %arg6[%c0_3, %c0_4] : memref<256x128xbf16, #tpu.memory_space<vmem>>, vector<256x128xbf16>
    %cst = arith.constant dense<0.000000e+00> : vector<256x128xf32>
    %3 = tpu.matmul %1, %2, %cst {dimension_numbers = #tpu.dot_dimension_numbers<[1], [0], [0], [1], [0, 0, 1, 1], [], []>} : vector<256x256xbf16>, vector<256x128xbf16>, vector<256x128xf32> -> vector<256x128xf32>
    %c0_5 = arith.constant 0 : index
    %c0_6 = arith.constant 0 : index
    %4 = vector.load %arg7[%c0_5, %c0_6] : memref<256x128xbf16, #tpu.memory_space<vmem>>, vector<256x128xbf16>
    %cst_7 = arith.constant dense<0.000000e+00> : vector<256x128xf32>
    %5 = tpu.matmul %1, %4, %cst_7 {dimension_numbers = #tpu.dot_dimension_numbers<[1], [0], [0], [1], [0, 0, 1, 1], [], []>} : vector<256x256xbf16>, vector<256x128xbf16>, vector<256x128xf32> -> vector<256x128xf32>
    %6 = arith.truncf %0 : vector<32x128xf32> to vector<32x128xbf16>
    %c0_8 = arith.constant 0 : index
    %c0_9 = arith.constant 0 : index
    %7 = vector.load %arg5[%c0_8, %c0_9] : memref<128x128xbf16, #tpu.memory_space<vmem>>, vector<128x128xbf16>
    %cst_10 = arith.constant dense<0.000000e+00> : vector<32x128xf32>
    %8 = tpu.matmul %6, %7, %cst_10 {dimension_numbers = #tpu.dot_dimension_numbers<[1], [0], [0], [1], [0, 0, 1, 1], [], []>} : vector<32x128xbf16>, vector<128x128xbf16>, vector<32x128xf32> -> vector<32x128xf32>
    %cst_11 = arith.constant 0.353553385 : f32
    %9 = vector.broadcast %cst_11 : f32 to vector<32x128xf32>
    %10 = arith.mulf %8, %9 : vector<32x128xf32>
    %11 = vector.shape_cast %10 : vector<32x128xf32> to vector<32x1x128xf32>
    %12 = vector.shape_cast %3 : vector<256x128xf32> to vector<32x8x128xf32>
    %13 = vector.broadcast %11 : vector<32x1x128xf32> to vector<32x8x128xf32>
    %14 = arith.mulf %13, %12 : vector<32x8x128xf32>
    %15 = vector.shape_cast %14 : vector<32x8x128xf32> to vector<256x128xf32>
    %16 = arith.truncf %15 : vector<256x128xf32> to vector<256x128xbf16>
    %c0_12 = arith.constant 0 : index
    %c0_13 = arith.constant 0 : index
    %17 = vector.load %arg9[%c0_12, %c0_13] : memref<128x128xbf16, #tpu.memory_space<vmem>>, vector<128x128xbf16>
    %cst_14 = arith.constant dense<0.000000e+00> : vector<256x128xf32>
    %18 = tpu.matmul %16, %17, %cst_14 {dimension_numbers = #tpu.dot_dimension_numbers<[1], [0], [0], [1], [0, 0, 1, 1], [], []>} : vector<256x128xbf16>, vector<128x128xbf16>, vector<256x128xf32> -> vector<256x128xf32>
    %c0_15 = arith.constant 0 : index
    %c0_16 = arith.constant 0 : index
    %19 = vector.load %arg3[%c0_15, %c0_16] : memref<256x4xbf16, #tpu.memory_space<vmem>>, vector<256x4xbf16>
    %c0_17 = arith.constant 0 : index
    %c0_18 = arith.constant 0 : index
    %20 = vector.load %arg11[%c0_17, %c0_18] : memref<4x128xbf16, #tpu.memory_space<vmem>>, vector<4x128xbf16>
    %cst_19 = arith.constant dense<0.000000e+00> : vector<256x128xf32>
    %21 = tpu.matmul %19, %20, %cst_19 {dimension_numbers = #tpu.dot_dimension_numbers<[1], [0], [0], [1], [0, 0, 1, 1], [], []>} : vector<256x4xbf16>, vector<4x128xbf16>, vector<256x128xf32> -> vector<256x128xf32>
    %cst_20 = arith.constant 0.000000e+00 : f32
    %22 = vector.broadcast %cst_20 : f32 to vector<256x128xf32>
    %23 = arith.cmpf ogt, %21, %22 : vector<256x128xf32>
    %cst_21 = arith.constant -3.40282347E+38 : f32
    %24 = vector.broadcast %cst_21 : f32 to vector<256x128xf32>
    %25 = arith.select %23, %18, %24 : vector<256x128xi1>, vector<256x128xf32>
    %26 = vector.shape_cast %25 : vector<256x128xf32> to vector<32x8x128xf32>
    %cst_22 = arith.constant dense<0xFF800000> : vector<32x128xf32>
    %27 = vector.multi_reduction <maximumf>, %26, %cst_22 [1] : vector<32x8x128xf32> to vector<32x128xf32>
    %28 = vector.shape_cast %27 : vector<32x128xf32> to vector<32x1x128xf32>
    %29 = vector.broadcast %28 : vector<32x1x128xf32> to vector<32x8x128xf32>
    %30 = arith.subf %26, %29 : vector<32x8x128xf32>
    %31 = math.exp %30 : vector<32x8x128xf32>
    %cst_23 = arith.constant dense<0.000000e+00> : vector<32x128xf32>
    %32 = vector.multi_reduction <add>, %31, %cst_23 [1] : vector<32x8x128xf32> to vector<32x128xf32>
    %33 = vector.shape_cast %32 : vector<32x128xf32> to vector<32x1x128xf32>
    %34 = vector.shape_cast %21 : vector<256x128xf32> to vector<32x8x128xf32>
    %35 = tpu.reciprocal %33 {approx = true} : vector<32x1x128xf32> -> vector<32x1x128xf32>
    %36 = vector.broadcast %35 : vector<32x1x128xf32> to vector<32x8x128xf32>
    %37 = arith.mulf %31, %36 : vector<32x8x128xf32>
    %38 = arith.mulf %34, %37 : vector<32x8x128xf32>
    %39 = vector.shape_cast %5 : vector<256x128xf32> to vector<32x8x128xf32>
    %40 = arith.mulf %38, %39 : vector<32x8x128xf32>
    %cst_24 = arith.constant dense<0.000000e+00> : vector<32x128xf32>
    %41 = vector.multi_reduction <add>, %40, %cst_24 [1] : vector<32x8x128xf32> to vector<32x128xf32>
    %42 = arith.truncf %41 : vector<32x128xf32> to vector<32x128xbf16>
    %c0_25 = arith.constant 0 : index
    %c0_26 = arith.constant 0 : index
    %43 = vector.load %arg8[%c0_25, %c0_26] : memref<128x128xbf16, #tpu.memory_space<vmem>>, vector<128x128xbf16>
    %cst_27 = arith.constant dense<0.000000e+00> : vector<32x128xf32>
    %44 = tpu.matmul %42, %43, %cst_27 {dimension_numbers = #tpu.dot_dimension_numbers<[1], [0], [0], [1], [0, 0, 1, 1], [], []>} : vector<32x128xbf16>, vector<128x128xbf16>, vector<32x128xf32> -> vector<32x128xf32>
    %c0_28 = arith.constant 0 : index
    %c0_29 = arith.constant 0 : index
    %45 = vector.load %arg10[%c0_28, %c0_29] : memref<128x128xf32, #tpu.memory_space<vmem>>, vector<128x128xf32>
    %46 = arith.addf %0, %44 : vector<32x128xf32>
    %c0_30 = arith.constant 0 : index
    %c0_31 = arith.constant 0 : index
    %47 = vector.load %arg12[%c0_30, %c0_31] : memref<1x128xf32, #tpu.memory_space<vmem>>, vector<1x128xf32>
    %c0_32 = arith.constant 0 : index
    %c0_33 = arith.constant 0 : index
    %48 = vector.load %arg13[%c0_32, %c0_33] : memref<1x128xf32, #tpu.memory_space<vmem>>, vector<1x128xf32>
    %cst_34 = arith.constant dense<0.000000e+00> : vector<32x128xf32>
    %49 = tpu.matmul %46, %45, %cst_34 {dimension_numbers = #tpu.dot_dimension_numbers<[1], [0], [0], [1], [0, 0, 1, 1], [], []>} : vector<32x128xf32>, vector<128x128xf32>, vector<32x128xf32> -> vector<32x128xf32>
    %50 = arith.mulf %46, %46 : vector<32x128xf32>
    %cst_35 = arith.constant dense<0.000000e+00> : vector<32x128xf32>
    %51 = tpu.matmul %50, %45, %cst_35 {dimension_numbers = #tpu.dot_dimension_numbers<[1], [0], [0], [1], [0, 0, 1, 1], [], []>} : vector<32x128xf32>, vector<128x128xf32>, vector<32x128xf32> -> vector<32x128xf32>
    %52 = arith.mulf %49, %49 : vector<32x128xf32>
    %53 = arith.subf %51, %52 : vector<32x128xf32>
    %54 = arith.subf %46, %49 : vector<32x128xf32>
    %cst_36 = arith.constant 9.99999997E-7 : f32
    %55 = vector.broadcast %cst_36 : f32 to vector<32x128xf32>
    %56 = arith.addf %53, %55 : vector<32x128xf32>
    %57 = math.rsqrt %56 : vector<32x128xf32>
    %58 = arith.mulf %54, %57 : vector<32x128xf32>
    %59 = vector.broadcast %47 : vector<1x128xf32> to vector<32x128xf32>
    %60 = arith.mulf %58, %59 : vector<32x128xf32>
    %61 = vector.broadcast %48 : vector<1x128xf32> to vector<32x128xf32>
    %62 = arith.addf %60, %61 : vector<32x128xf32>
    %63 = arith.truncf %62 : vector<32x128xf32> to vector<32x128xbf16>
    %c0_37 = arith.constant 0 : index
    %c0_38 = arith.constant 0 : index
    %64 = vector.load %arg14[%c0_37, %c0_38] : memref<128x512xbf16, #tpu.memory_space<vmem>>, vector<128x512xbf16>
    %cst_39 = arith.constant dense<0.000000e+00> : vector<32x512xf32>
    %65 = tpu.matmul %63, %64, %cst_39 {dimension_numbers = #tpu.dot_dimension_numbers<[1], [0], [0], [1], [0, 0, 1, 1], [], []>} : vector<32x128xbf16>, vector<128x512xbf16>, vector<32x512xf32> -> vector<32x512xf32>
    %c0_40 = arith.constant 0 : index
    %c0_41 = arith.constant 0 : index
    %66 = vector.load %arg15[%c0_40, %c0_41] : memref<1x512xf32, #tpu.memory_space<vmem>>, vector<1x512xf32>
    %67 = vector.broadcast %66 : vector<1x512xf32> to vector<32x512xf32>
    %68 = arith.addf %65, %67 : vector<32x512xf32>
    %cst_42 = arith.constant 0.000000e+00 : f32
    %69 = vector.broadcast %cst_42 : f32 to vector<32x512xf32>
    %70 = arith.maximumf %68, %69 : vector<32x512xf32>
    %71 = arith.truncf %70 : vector<32x512xf32> to vector<32x512xbf16>
    %c0_43 = arith.constant 0 : index
    %c0_44 = arith.constant 0 : index
    %72 = vector.load %arg16[%c0_43, %c0_44] : memref<512x128xbf16, #tpu.memory_space<vmem>>, vector<512x128xbf16>
    %cst_45 = arith.constant dense<0.000000e+00> : vector<32x128xf32>
    %73 = tpu.matmul %71, %72, %cst_45 {dimension_numbers = #tpu.dot_dimension_numbers<[1], [0], [0], [1], [0, 0, 1, 1], [], []>} : vector<32x512xbf16>, vector<512x128xbf16>, vector<32x128xf32> -> vector<32x128xf32>
    %c0_46 = arith.constant 0 : index
    %c0_47 = arith.constant 0 : index
    %74 = vector.load %arg17[%c0_46, %c0_47] : memref<1x128xf32, #tpu.memory_space<vmem>>, vector<1x128xf32>
    %75 = vector.broadcast %74 : vector<1x128xf32> to vector<32x128xf32>
    %76 = arith.addf %73, %75 : vector<32x128xf32>
    %77 = arith.addf %62, %76 : vector<32x128xf32>
    %c0_48 = arith.constant 0 : index
    %c0_49 = arith.constant 0 : index
    %78 = vector.load %arg18[%c0_48, %c0_49] : memref<1x128xf32, #tpu.memory_space<vmem>>, vector<1x128xf32>
    %c0_50 = arith.constant 0 : index
    %c0_51 = arith.constant 0 : index
    %79 = vector.load %arg19[%c0_50, %c0_51] : memref<1x128xf32, #tpu.memory_space<vmem>>, vector<1x128xf32>
    %cst_52 = arith.constant dense<0.000000e+00> : vector<32x128xf32>
    %80 = tpu.matmul %77, %45, %cst_52 {dimension_numbers = #tpu.dot_dimension_numbers<[1], [0], [0], [1], [0, 0, 1, 1], [], []>} : vector<32x128xf32>, vector<128x128xf32>, vector<32x128xf32> -> vector<32x128xf32>
    %81 = arith.mulf %77, %77 : vector<32x128xf32>
    %cst_53 = arith.constant dense<0.000000e+00> : vector<32x128xf32>
    %82 = tpu.matmul %81, %45, %cst_53 {dimension_numbers = #tpu.dot_dimension_numbers<[1], [0], [0], [1], [0, 0, 1, 1], [], []>} : vector<32x128xf32>, vector<128x128xf32>, vector<32x128xf32> -> vector<32x128xf32>
    %83 = arith.mulf %80, %80 : vector<32x128xf32>
    %84 = arith.subf %82, %83 : vector<32x128xf32>
    %85 = arith.subf %77, %80 : vector<32x128xf32>
    %cst_54 = arith.constant 9.99999997E-7 : f32
    %86 = vector.broadcast %cst_54 : f32 to vector<32x128xf32>
    %87 = arith.addf %84, %86 : vector<32x128xf32>
    %88 = math.rsqrt %87 : vector<32x128xf32>
    %89 = arith.mulf %85, %88 : vector<32x128xf32>
    %90 = vector.broadcast %78 : vector<1x128xf32> to vector<32x128xf32>
    %91 = arith.mulf %89, %90 : vector<32x128xf32>
    %92 = vector.broadcast %79 : vector<1x128xf32> to vector<32x128xf32>
    %93 = arith.addf %91, %92 : vector<32x128xf32>
    %c0_55 = arith.constant 0 : index
    %c0_56 = arith.constant 0 : index
    %94 = vector.load %arg4[%c0_55, %c0_56] : memref<32x4xbf16, #tpu.memory_space<vmem>>, vector<32x4xbf16>
    %c0_57 = arith.constant 0 : index
    %c0_58 = arith.constant 0 : index
    %95 = vector.load %arg11[%c0_57, %c0_58] : memref<4x128xbf16, #tpu.memory_space<vmem>>, vector<4x128xbf16>
    %cst_59 = arith.constant dense<0.000000e+00> : vector<32x128xf32>
    %96 = tpu.matmul %94, %95, %cst_59 {dimension_numbers = #tpu.dot_dimension_numbers<[1], [0], [0], [1], [0, 0, 1, 1], [], []>} : vector<32x4xbf16>, vector<4x128xbf16>, vector<32x128xf32> -> vector<32x128xf32>
    %97 = arith.mulf %96, %93 : vector<32x128xf32>
    %c0_60 = arith.constant 0 : index
    %c0_61 = arith.constant 0 : index
    %98 = vector.load %arg20[%c0_60, %c0_61] : memref<32x128xf32, #tpu.memory_space<vmem>>, vector<32x128xf32>
    tpu.vector_store %arg20[%c0_60, %c0_61], %97 {strides = array<i32>} : memref<32x128xf32, #tpu.memory_space<vmem>>, vector<32x128xf32>,
    return
  }
  func.func @transform_0(%arg0: i32) -> (i32, i32) {
    %c0_i32 = arith.constant 0 : i32
    %c0_i32_0 = arith.constant 0 : i32
    return %arg0, %c0_i32 : i32, i32
  }
  func.func @transform_1(%arg0: i32) -> (i32, i32) {
    %c0_i32 = arith.constant 0 : i32
    %c0_i32_0 = arith.constant 0 : i32
    return %arg0, %c0_i32 : i32, i32
  }
  func.func @transform_2(%arg0: i32) -> (i32, i32) {
    %c0_i32 = arith.constant 0 : i32
    %c0_i32_0 = arith.constant 0 : i32
    return %arg0, %c0_i32 : i32, i32
  }
  func.func @transform_3(%arg0: i32) -> (i32, i32) {
    %c0_i32 = arith.constant 0 : i32
    %c0_i32_0 = arith.constant 0 : i32
    return %arg0, %c0_i32 : i32, i32
  }
  func.func @transform_4(%arg0: i32) -> (i32, i32) {
    %c0_i32 = arith.constant 0 : i32
    %c0_i32_0 = arith.constant 0 : i32
    %c0_i32_1 = arith.constant 0 : i32
    return %c0_i32, %c0_i32_0 : i32, i32
  }
  func.func @transform_5(%arg0: i32) -> (i32, i32) {
    %c0_i32 = arith.constant 0 : i32
    %c0_i32_0 = arith.constant 0 : i32
    %c0_i32_1 = arith.constant 0 : i32
    return %c0_i32, %c0_i32_0 : i32, i32
  }
  func.func @transform_6(%arg0: i32) -> (i32, i32) {
    %c0_i32 = arith.constant 0 : i32
    %c0_i32_0 = arith.constant 0 : i32
    %c0_i32_1 = arith.constant 0 : i32
    return %c0_i32, %c0_i32_0 : i32, i32
  }
  func.func @transform_7(%arg0: i32) -> (i32, i32) {
    %c0_i32 = arith.constant 0 : i32
    %c0_i32_0 = arith.constant 0 : i32
    %c0_i32_1 = arith.constant 0 : i32
    return %c0_i32, %c0_i32_0 : i32, i32
  }
  func.func @transform_8(%arg0: i32) -> (i32, i32) {
    %c0_i32 = arith.constant 0 : i32
    %c0_i32_0 = arith.constant 0 : i32
    %c0_i32_1 = arith.constant 0 : i32
    return %c0_i32, %c0_i32_0 : i32, i32
  }
  func.func @transform_9(%arg0: i32) -> (i32, i32) {
    %c0_i32 = arith.constant 0 : i32
    %c0_i32_0 = arith.constant 0 : i32
    %c0_i32_1 = arith.constant 0 : i32
    return %c0_i32, %c0_i32_0 : i32, i32
  }
  func.func @transform_10(%arg0: i32) -> (i32, i32) {
    %c0_i32 = arith.constant 0 : i32
    %c0_i32_0 = arith.constant 0 : i32
    %c0_i32_1 = arith.constant 0 : i32
    return %c0_i32, %c0_i32_0 : i32, i32
  }
  func.func @transform_11(%arg0: i32) -> (i32, i32) {
    %c0_i32 = arith.constant 0 : i32
    %c0_i32_0 = arith.constant 0 : i32
    %c0_i32_1 = arith.constant 0 : i32
    return %c0_i32, %c0_i32_0 : i32, i32
  }
  func.func @transform_12(%arg0: i32) -> (i32, i32) {
    %c0_i32 = arith.constant 0 : i32
    %c0_i32_0 = arith.constant 0 : i32
    %c0_i32_1 = arith.constant 0 : i32
    return %c0_i32, %c0_i32_0 : i32, i32
  }
  func.func @transform_13(%arg0: i32) -> (i32, i32) {
    %c0_i32 = arith.constant 0 : i32
    %c0_i32_0 = arith.constant 0 : i32
    %c0_i32_1 = arith.constant 0 : i32
    return %c0_i32, %c0_i32_0 : i32, i32
  }
  func.func @transform_14(%arg0: i32) -> (i32, i32) {
    %c0_i32 = arith.constant 0 : i32
    %c0_i32_0 = arith.constant 0 : i32
    %c0_i32_1 = arith.constant 0 : i32
    return %c0_i32, %c0_i32_0 : i32, i32
  }
  func.func @transform_15(%arg0: i32) -> (i32, i32) {
    %c0_i32 = arith.constant 0 : i32
    %c0_i32_0 = arith.constant 0 : i32
    %c0_i32_1 = arith.constant 0 : i32
    return %c0_i32, %c0_i32_0 : i32, i32
  }
  func.func @transform_16(%arg0: i32) -> (i32, i32) {
    %c0_i32 = arith.constant 0 : i32
    %c0_i32_0 = arith.constant 0 : i32
    %c0_i32_1 = arith.constant 0 : i32
    return %c0_i32, %c0_i32_0 : i32, i32
  }
  func.func @transform_17(%arg0: i32) -> (i32, i32) {
    %c0_i32 = arith.constant 0 : i32
    %c0_i32_0 = arith.constant 0 : i32
    %c0_i32_1 = arith.constant 0 : i32
    return %c0_i32, %c0_i32_0 : i32, i32
  }
  func.func @transform_18(%arg0: i32) -> (i32, i32) {
    %c0_i32 = arith.constant 0 : i32
    %c0_i32_0 = arith.constant 0 : i32
    %c0_i32_1 = arith.constant 0 : i32
    return %c0_i32, %c0_i32_0 : i32, i32
  }
  func.func @transform_19(%arg0: i32) -> (i32, i32) {
    %c0_i32 = arith.constant 0 : i32
    %c0_i32_0 = arith.constant 0 : i32
    return %arg0, %c0_i32 : i32, i32
  }
}

</mosaic_0001>

<bundles_post_ra>
// kernel: tpu_custom_call.1
= control target key start
LH: loop header
LB: loop body
LE: loop exit
PB: predicated region body
PF: predicated region fallthrough
CT: control target
= control target key end

     0   :  { %s7702_s0 = inlined_call_operand.hbm [shape: f32[32,128], index: 0, kind: input, shape index: {}]   ;;  %s7703_s1 = inlined_call_operand.hbm [shape: bf16[256,256], index: 1, kind: input, shape index: {}]   ;;  %s7704_s2 = inlined_call_operand.vmem [shape: bf16[256,4], index: 2, kind: input, shape index: {}]   ;;  %s7705_s3 = inlined_call_operand.vmem [shape: bf16[32,4], index: 3, kind: input, shape index: {}]   ;;  %s7706_s4 = inlined_call_operand.hbm [shape: bf16[128,128], index: 4, kind: input, shape index: {}]   ;;  %s7707_s5 = inlined_call_operand.vmem [shape: bf16[256,128], index: 5, kind: input, shape index: {}]   ;;  %s7708_s6 = inlined_call_operand.hbm [shape: bf16[256,128], index: 6, kind: input, shape index: {}]   ;;  %s7709_s7 = inlined_call_operand.hbm [shape: bf16[128,128], index: 7, kind: input, shape index: {}]   ;;  %s7710_s8 = inlined_call_operand.hbm [shape: bf16[128,128], index: 8, kind: input, shape index: {}]   ;;  %s7711_s9 = inlined_call_operand.hbm [shape: f32[128,128], index: 9, kind: input, shape index: {}]   ;;  %s7712_s10 = inlined_call_operand.vmem [shape: bf16[4,128], index: 10, kind: input, shape index: {}]   ;;  %s7713_s11 = inlined_call_operand.vmem [shape: f32[1,128], index: 11, kind: input, shape index: {}]   ;;  %s7714_s12 = inlined_call_operand.vmem [shape: f32[1,128], index: 12, kind: input, shape index: {}]   ;;  %s7715_s13 = inlined_call_operand.hbm [shape: bf16[128,512], index: 13, kind: input, shape index: {}]   ;;  %s7716_s14 = inlined_call_operand.vmem [shape: f32[1,512], index: 14, kind: input, shape index: {}]   ;;  %s7717_s15 = inlined_call_operand.hbm [shape: bf16[512,128], index: 15, kind: input, shape index: {}]   ;;  %s7718_s16 = inlined_call_operand.vmem [shape: f32[1,128], index: 16, kind: input, shape index: {}]   ;;  %s7719_s17 = inlined_call_operand.vmem [shape: f32[1,128], index: 17, kind: input, shape index: {}]   ;;  %s7720_s18 = inlined_call_operand.vmem [shape: f32[1,128], index: 18, kind: input, shape index: {}]   ;;  %s7721_s19 = inlined_call_operand.hbm [shape: f32[32,128], index: 19, kind: output, shape index: {}]  }
   0x1   :  { %7774 = sst [smem:[#allocation100_spill]] %s7702_s0 }
   0x2   :  { %7775 = sst [smem:[#allocation101_spill]] %s7703_s1 }
   0x3   :  { %7776 = sst [smem:[#allocation102_spill]] %s7704_s2 }
   0x4   :  { %7777 = sst [smem:[#allocation103_spill]] %s7705_s3 }
   0x5   :  { %24 = vsyncpa [#allocation3], 0 }
   0x6   :  { %25 = vsyncpa [#allocation6], 0 }
   0x7   :  { %26 = vsyncpa [#allocation9], 0 }
   0x8   :  { %27 = vsyncpa [#allocation12], 0 }
   0x9   :  { %28 = vsyncpa [#allocation15], 0 }
   0xa   :  { %29 = vsyncpa [#allocation4], 0  ;;  %s5914_s0 = smov [#allocation5]  }
   0xb   :  { %s47_s30 = sshll.u32 %s5914_s0, 4  ;;  %s48_s30 = int_to_ptr.vmem [resolvable:$true] %s47_s30 }
   0xc   :  { %s5710_s20 = scalar_lea.vmem %s48_s30, 4096  ;;  %p5715_p1 = scmp.lt.s32.totalorder %s48_s30, %s48_s30 }
   0xd   :  { %p5711_p0 = scmp.ne.s32.totalorder %s48_s30, %s5710_s20  ;;  %p5716_p2 = scmp.lt.s32.totalorder %s5710_s20, %s5710_s20 }
   0xf   :  { %p5717_p3 = por %p5716_p2, %p5715_p1 }
  0x11   :  { %p5718_p4 = pnand %p5717_p3, %p5711_p0 }
  0x13   :  { %5721 = shalt.err (!%p5718_p4)
}
  0x14   :  { %s5915_s21 = smov 128   ;;  %s5916_s1 = smov 8  }
  0x15   :  { %s7778_s23 = sld [smem:[#allocation101_spill]]  ;;  %s5917_s24 = smov [#allocation8]  }
  0x16   :  { %s77_s25 = sshll.u32 %s5917_s24, 4  ;;  %s5918_s3 = smov [#allocation11]   ;;  %s78_s25 = int_to_ptr.vmem [resolvable:$true] %s77_s25 }
  0x17   :  { %s101_s26 = sshll.u32 %s5918_s3, 4  ;;  %s5730_s27 = scalar_lea.vmem %s78_s25, 2048  ;;  %s102_s26 = int_to_ptr.vmem [resolvable:$true] %s101_s26 }
  0x18   :  { %p5731_p5 = scmp.ne.s32.totalorder %s78_s25, %s5730_s27  ;;  %p5735_p6 = scmp.lt.s32.totalorder %s78_s25, %s78_s25 }
  0x19   :  { %p5736_p7 = scmp.lt.s32.totalorder %s5730_s27, %s5730_s27 }
  0x1b   :  { %53 = dma.hbm_to_vmem [thread:$0]  %s7778_s23, 4096, %s48_s30, [#allocation6], %s5915_s21, %s5915_s21, %s5916_s1  }
  0x1c   :  { %p5737_p8 = por %p5736_p7, %p5735_p6 }
  0x1e   :  { %p5738_p9 = pnand %p5737_p8, %p5731_p5 }
  0x20   :  { %5741 = shalt.err (!%p5738_p9)
}
  0x21   :  { %s5919_s28 = smov 64   ;;  %s5920_s29 = smov 4  }
  0x22   :  { %83 = dma.hbm_to_vmem [thread:$0]  %s7708_s6, 2048, %s78_s25, [#allocation9], %s5919_s28, %s5919_s28, %s5920_s29  }
  0x23   :  { %s5750_s30 = scalar_lea.vmem %s102_s26, 1024  ;;  %p5755_p11 = scmp.lt.s32.totalorder %s102_s26, %s102_s26 }
  0x24   :  { %p5751_p10 = scmp.ne.s32.totalorder %s102_s26, %s5750_s30  ;;  %p5756_p12 = scmp.lt.s32.totalorder %s5750_s30, %s5750_s30 }
  0x26   :  { %p5757_p13 = por %p5756_p12, %p5755_p11 }
  0x28   :  { %p5758_p0 = pnand %p5757_p13, %p5751_p10 }
  0x2a   :  { %5761 = shalt.err (!%p5758_p0)
}
  0x2b   :  { %107 = dma.hbm_to_vmem [thread:$0]  %s7710_s8, 1024, %s102_s26, [#allocation12], %s5919_s28, %s5919_s28, %s5920_s29  }
  0x2c   :  { %s5921_s23 = smov [#allocation14]  }
  0x2d   :  { %s131_s24 = sshll.u32 %s5921_s23, 4  ;;  %s132_s24 = int_to_ptr.vmem [resolvable:$true] %s131_s24 }
  0x2e   :  { %s5770_s3 = scalar_lea.vmem %s132_s24, 4096  ;;  %p5775_p2 = scmp.lt.s32.totalorder %s132_s24, %s132_s24 }
  0x2f   :  { %p5771_p1 = scmp.ne.s32.totalorder %s132_s24, %s5770_s3  ;;  %p5776_p3 = scmp.lt.s32.totalorder %s5770_s3, %s5770_s3 }
  0x31   :  { %p5777_p4 = por %p5776_p3, %p5775_p2 }
  0x33   :  { %p5778_p5 = pnand %p5777_p4, %p5771_p1 }
  0x35   :  { %5781 = shalt.err (!%p5778_p5)
}
  0x36   :  { %s5922_s6 = smov 256   ;;  %s5923_s25 = smov 16  }
  0x37   :  { %137 = dma.hbm_to_vmem [thread:$0]  %s7715_s13, 4096, %s132_s24, [#allocation15], %s5922_s6, %s5922_s6, %s5923_s25  }
  0x38   :  { %s5924_s20 = smov [#allocation2]   ;;  %s5925_s22 = smov [#allocation7]  }
  0x39   :  { %s35_s30 = sshll.u32 %s5924_s20, 4  ;;  %s63_s8 = sshll.u32 %s5925_s22, 4  ;;  %s36_s30 = int_to_ptr.vmem [resolvable:$true] %s35_s30  ;;  %s64_s8 = int_to_ptr.vmem [resolvable:$true] %s63_s8 }
  0x3a   :  { %s5790_s26 = scalar_lea.vmem %s36_s30, 512  ;;  %p5795_p7 = scmp.lt.s32.totalorder %s36_s30, %s36_s30 }
  0x3b   :  { %p5791_p6 = scmp.ne.s32.totalorder %s36_s30, %s5790_s26  ;;  %p5796_p8 = scmp.lt.s32.totalorder %s5790_s26, %s5790_s26 }
  0x3d   :  { %p5797_p9 = por %p5796_p8, %p5795_p7 }
  0x3f   :  { %p5798_p10 = pnand %p5797_p9, %p5791_p6 }
  0x41   :  { %5801 = shalt.err (!%p5798_p10)
}
  0x42   :  { %s7779_s3 = sld [smem:[#allocation100_spill]]  ;;  %s5810_s13 = scalar_lea.vmem %s64_s8, 1024 }
  0x43   :  { %p5811_p11 = scmp.ne.s32.totalorder %s64_s8, %s5810_s13  ;;  %p5815_p12 = scmp.lt.s32.totalorder %s64_s8, %s64_s8 }
  0x44   :  { %p5816_p13 = scmp.lt.s32.totalorder %s5810_s13, %s5810_s13 }
  0x46   :  { %p5817_p0 = por %p5816_p13, %p5815_p12 }
  0x48   :  { %41 = dma.hbm_to_vmem [thread:$0]  %s7779_s3, 512, %s36_s30, [#allocation3], %s5915_s21, %s5915_s21, %s5916_s1  }
  0x49   :  { %p5818_p1 = pnand %p5817_p0, %p5811_p11 }
  0x4b   :  { %5821 = shalt.err (!%p5818_p1)
}
  0x4c   :  { %69 = dma.hbm_to_vmem [thread:$0]  %s7706_s4, 1024, %s64_s8, [#allocation6], %s5919_s28, %s5919_s28, %s5920_s29  }
  0x4d   :  { %s5926_s25 = smov [#allocation10]   ;;  %s5927_s0 = smov [#allocation13]  }
  0x4e   :  { %s89_s27 = sshll.u32 %s5926_s25, 4  ;;  %s113_s20 = sshll.u32 %s5927_s0, 4  ;;  %s90_s27 = int_to_ptr.vmem [resolvable:$true] %s89_s27  ;;  %s114_s20 = int_to_ptr.vmem [resolvable:$true] %s113_s20 }
  0x4f   :  { %s5830_s30 = scalar_lea.vmem %s90_s27, 1024  ;;  %p5835_p3 = scmp.lt.s32.totalorder %s90_s27, %s90_s27 }
  0x50   :  { %p5831_p2 = scmp.ne.s32.totalorder %s90_s27, %s5830_s30  ;;  %p5836_p4 = scmp.lt.s32.totalorder %s5830_s30, %s5830_s30 }
  0x52   :  { %p5837_p5 = por %p5836_p4, %p5835_p3 }
  0x54   :  { %p5838_p6 = pnand %p5837_p5, %p5831_p2 }
  0x56   :  { %5841 = shalt.err (!%p5838_p6)
}
  0x57   :  { %95 = dma.hbm_to_vmem [thread:$0]  %s7709_s7, 1024, %s90_s27, [#allocation9], %s5919_s28, %s5919_s28, %s5920_s29  }
  0x58   :  { %s5850_s4 = scalar_lea.vmem %s114_s20, 2048  ;;  %p5855_p8 = scmp.lt.s32.totalorder %s114_s20, %s114_s20 }
  0x59   :  { %p5851_p7 = scmp.ne.s32.totalorder %s114_s20, %s5850_s4  ;;  %p5856_p9 = scmp.lt.s32.totalorder %s5850_s4, %s5850_s4 }
  0x5b   :  { %p5857_p10 = por %p5856_p9, %p5855_p8 }
  0x5d   :  { %p5858_p11 = pnand %p5857_p10, %p5851_p7 }
  0x5f   :  { %5861 = shalt.err (!%p5858_p11)
}
  0x60   :  { %119 = dma.hbm_to_vmem [thread:$0]  %s7711_s9, 2048, %s114_s20, [#allocation12], %s5915_s21, %s5915_s21, %s5916_s1  }
  0x61   :  { %s5928_s23 = smov [#allocation16]  }
  0x62   :  { %s145_s3 = sshll.u32 %s5928_s23, 4  ;;  %s146_s3 = int_to_ptr.vmem [resolvable:$true] %s145_s3 }
  0x63   :  { %s5870_s13 = scalar_lea.vmem %s146_s3, 4096  ;;  %p5875_p13 = scmp.lt.s32.totalorder %s146_s3, %s146_s3 }
  0x64   :  { %p5871_p12 = scmp.ne.s32.totalorder %s146_s3, %s5870_s13  ;;  %p5876_p0 = scmp.lt.s32.totalorder %s5870_s13, %s5870_s13 }
  0x66   :  { %p5877_p1 = por %p5876_p0, %p5875_p13 }
  0x68   :  { %p5878_p2 = pnand %p5877_p1, %p5871_p12 }
  0x6a   :  { %5881 = shalt.err (!%p5878_p2)
}
  0x6b   :  { %151 = dma.hbm_to_vmem [thread:$0]  %s7717_s15, 4096, %s146_s3, [#allocation15], %s5919_s28, %s5919_s28, %s5920_s29  }
  0x6c   :  { %5902 = dma.done.wait [#allocation3], 512  }
  0x6d   :  { %5903 = vsyncadd [#allocation3], 4294966784 }
  0x6e   :  { %5904 = dma.done.wait [#allocation6], 5120  }
  0x6f   :  { %5905 = vsyncadd [#allocation6], 4294962176 }
  0x70   :  { %5906 = dma.done.wait [#allocation9], 3072  }
  0x71   :  { %5907 = vsyncadd [#allocation9], 4294964224 }
  0x72   :  { %5908 = dma.done.wait [#allocation12], 3072  }
  0x73   :  { %5909 = vsyncadd [#allocation12], 4294964224 }
  0x74   :  { %5910 = dma.done.wait [#allocation15], 8192  }
  0x75   :  { %5911 = vsyncadd [#allocation15], 4294959104  ;;  %v5337_v0 = vld [vmem:[%s7707_s5 + $0x78] sm:$0xff]   ;;  %v5339_v2 = vld [vmem:[%s7707_s5 + $0x70] sm:$0xff]   ;;  %vm1874_vm0 = vcmask 1041408   ;;  %s7781_s23 = sld [smem:[#allocation102_spill]] }
  0x76   :  { %v5338_v1 = vld [vmem:[%s7707_s5 + $0x38] sm:$0xff]   ;;  %4613 = vmatprep.subr.bf16.mxu0 %v5337_v0  ;;  %v5340_v3 = vld [vmem:[%s7707_s5 + $0x30] sm:$0xff]   ;;  %v5341_v4 = vld [vmem:[%s7707_s5 + $0x68] sm:$0xff]   ;;  %vm1825_vm1 = vcmask 31744  }
  0x77   :  { %4614 = vmatpush3.bf16.msra.mxu0 %v5338_v1  ;;  %v5342_v5 = vld [vmem:[%s7707_s5 + $0x28] sm:$0xff]   ;;  %v5343_v6 = vld [vmem:[%s7707_s5 + $0x60] sm:$0xff]   ;;  %v5345_v8 = vld [vmem:[%s7707_s5 + $0x58] sm:$0xff]  }
  0x78   :  { %4615 = vmatprep.subr.bf16.mxu0 %v5339_v2  ;;  %v5344_v7 = vld [vmem:[%s7707_s5 + $0x20] sm:$0xff]   ;;  %v5346_v9 = vld [vmem:[%s7707_s5 + $0x18] sm:$0xff]   ;;  %v5347_v10 = vld [vmem:[%s7707_s5 + $0x50] sm:$0xff]  }
  0x79   :  { %v5355_v11 = vld [vmem:[#allocation5 + $0x4] ss:$8 sps:$4 sm:$0xff]   ;;  %v5348_v12 = vld [vmem:[%s7707_s5 + $0x10] sm:$0xff]   ;;  %v5356_v17 = vld [vmem:[#allocation7 + $0x38] sm:$0xff]  }
  0x7a   :  { %542 = vmatprep.mubr.bf16.mxu0 %v5355_v11  ;;  %v5349_v13 = vld [vmem:[%s7707_s5 + $0x48] sm:$0xff]   ;;  %831 = vmatprep.mubr.bf16.mxu1 %v5355_v11  ;;  %v5351_v15 = vld [vmem:[%s7707_s5 + $0x40] sm:$0xff]   ;;  %v6133_v19 = vld [vmem:[#allocation5 + $0x14] ss:$8 sps:$4 sm:$0xff]  }
  0x7b   :  { %4616 = vmatpush3.bf16.msra.mxu0 %v5340_v3  ;;  %v5350_v14 = vld [vmem:[%s7707_s5 + $0x8] sm:$0xff]   ;;  %v5352_v16 = vld [vmem:[%s7707_s5] sm:$0xff]   ;;  %v5363_v20 = vld [vmem:[#allocation7 + $0x30] sm:$0xff]   ;;  %s7974_s5 = sld [smem:[#allocation103_spill]] }
  0x7c   :  { %4617 = vmatprep.subr.bf16.mxu0 %v5341_v4  ;;  %v6131_v18 = vld [vmem:[#allocation5] ss:$8 sps:$4 sm:$0xff]   ;;  %v6137_v22 = vld [vmem:[#allocation5 + $0x10] ss:$8 sps:$4 sm:$0xff]   ;;  %v6139_v23 = vld [vmem:[#allocation5 + $0x24] ss:$8 sps:$4 sm:$0xff]  }
  0x7d   :  { %v5370_v21 = vld [vmem:[#allocation7 + $0x28] sm:$0xff]   ;;  %v5377_v24 = vld [vmem:[#allocation7 + $0x20] sm:$0xff]   ;;  %v5384_v25 = vld [vmem:[#allocation7 + $0x18] sm:$0xff]  }
  0x7e   :  { %v6143_v26 = vld [vmem:[#allocation5 + $0x20] ss:$8 sps:$4 sm:$0xff]   ;;  %v6145_v27 = vld [vmem:[#allocation5 + $0x34] ss:$8 sps:$4 sm:$0xff]   ;;  %v6149_v34 = vld [vmem:[#allocation5 + $0x30] ss:$8 sps:$4 sm:$0xff]  }
  0x7f   :  { %4618 = vmatpush3.bf16.msra.mxu0 %v5342_v5  ;;  %v5391_v28 = vld [vmem:[#allocation7 + $0x10] sm:$0xff]   ;;  %v5409_v29 = vld [vmem:[#allocation8 + $0x78] sm:$0xff]   ;;  %v5413_v33 = vld [vmem:[#allocation8 + $0x68] sm:$0xff]  }
  0x80   :  { %4619 = vmatprep.subr.bf16.mxu0 %v5343_v6  ;;  %v5410_v30 = vld [vmem:[#allocation8 + $0x38] sm:$0xff]   ;;  %4725 = vmatprep.subr.bf16.mxu1 %v5409_v29  ;;  %v5411_v31 = vld [vmem:[#allocation8 + $0x70] sm:$0xff]   ;;  %v5398_v35 = vld [vmem:[#allocation7 + $0x8] sm:$0xff]  }
  0x81   :  { %4726 = vmatpush3.bf16.msra.mxu1 %v5410_v30  ;;  %v5412_v32 = vld [vmem:[#allocation8 + $0x30] sm:$0xff]   ;;  %v6151_v36 = vld [vmem:[#allocation5 + $0x44] ss:$8 sps:$4 sm:$0xff]   ;;  %v5417_v41 = vld [vmem:[#allocation8 + $0x58] sm:$0xff]  }
  0x82   :  { %4727 = vmatprep.subr.bf16.mxu1 %v5411_v31  ;;  %v5405_v37 = vld [vmem:[#allocation7] sm:$0xff]   ;;  %v5414_v38 = vld [vmem:[#allocation8 + $0x28] sm:$0xff]   ;;  %v5418_v43 = vld [vmem:[#allocation8 + $0x18] sm:$0xff]  }
  0x83   :  { %4620 = vmatpush3.bf16.msra.mxu0 %v5344_v7  ;;  %v5415_v39 = vld [vmem:[#allocation8 + $0x60] sm:$0xff]   ;;  %v6157_v44 = vld [vmem:[#allocation5 + $0x54] ss:$8 sps:$4 sm:$0xff]   ;;  %v6161_v45 = vld [vmem:[#allocation5 + $0x50] ss:$8 sps:$4 sm:$0xff]  }
  0x84   :  { %4621 = vmatprep.subr.bf16.mxu0 %v5345_v8  ;;  %v5416_v40 = vld [vmem:[#allocation8 + $0x20] sm:$0xff]   ;;  %v6169_v48 = vld [vmem:[#allocation5 + $0x74] ss:$8 sps:$4 sm:$0xff]   ;;  %v6173_v49 = vld [vmem:[#allocation5 + $0x70] ss:$8 sps:$4 sm:$0xff]  }
  0x85   :  { %4728 = vmatpush3.bf16.msra.mxu1 %v5412_v32  ;;  %v6155_v42 = vld [vmem:[#allocation5 + $0x40] ss:$8 sps:$4 sm:$0xff]   ;;  %v6163_v46 = vld [vmem:[#allocation5 + $0x64] ss:$8 sps:$4 sm:$0xff]   ;;  %v6181_v52 = vld [vmem:[#allocation5 + $0x94] ss:$8 sps:$4 sm:$0xff]  }
  0x86   :  { %4729 = vmatprep.subr.bf16.mxu1 %v5413_v33  ;;  %v6167_v47 = vld [vmem:[#allocation5 + $0x60] ss:$8 sps:$4 sm:$0xff]   ;;  %v6175_v50 = vld [vmem:[#allocation5 + $0x84] ss:$8 sps:$4 sm:$0xff]   ;;  %v5419_v53 = vld [vmem:[#allocation8 + $0x50] sm:$0xff]  }
  0x87   :  { %4622 = vmatpush3.bf16.msra.mxu0 %v5346_v9  ;;  %v6179_v51 = vld [vmem:[#allocation5 + $0x80] ss:$8 sps:$4 sm:$0xff]   ;;  %v5420_v54 = vld [vmem:[#allocation8 + $0x10] sm:$0xff]   ;;  %v6187_v56 = vld [vmem:[#allocation5 + $0xa4] ss:$8 sps:$4 sm:$0xff]  }
  0x88   :  { %4623 = vmatprep.subr.bf16.mxu0 %v5347_v10  ;;  %v6185_v55 = vld [vmem:[#allocation5 + $0x90] ss:$8 sps:$4 sm:$0xff]   ;;  %v5421_v57 = vld [vmem:[#allocation8 + $0x48] sm:$0xff]   ;;  %v5423_v59 = vld [vmem:[#allocation8 + $0x40] sm:$0xff]  }
  0x89   :  { %4730 = vmatpush3.bf16.msra.mxu1 %v5414_v38  ;;  %v5422_v58 = vld [vmem:[#allocation8 + $0x8] sm:$0xff]   ;;  %v5424_v60 = vld [vmem:[#allocation8] sm:$0xff]   ;;  %v6193_v62 = vld [vmem:[#allocation5 + $0xb4] ss:$8 sps:$4 sm:$0xff]  }
  0x8a   :  { %4731 = vmatprep.subr.bf16.mxu1 %v5415_v39  ;;  %v6191_v61 = vld [vmem:[#allocation5 + $0xa0] ss:$8 sps:$4 sm:$0xff]   ;;  %v5425_v63 = vld [vmem:[#allocation11 + $0x38] sm:$0xff]   ;;  %v5395_v1 = vld [vmem:[#allocation5 + $0xc4] ss:$8 sps:$4 sm:$0xff]  }
  0x8b   :  { %4624 = vmatpush3.bf16.msra.mxu0 %v5348_v12  ;;  %v5394_v0 = vld [vmem:[#allocation5 + $0xb0] ss:$8 sps:$4 sm:$0xff]   ;;  %v5397_v2 = vld [vmem:[#allocation5 + $0xc0] ss:$8 sps:$4 sm:$0xff]   ;;  %v5399_v3 = vld [vmem:[#allocation5 + $0xd4] ss:$8 sps:$4 sm:$0xff]  }
  0x8c   :  { %4625 = vmatprep.subr.bf16.mxu0 %v5349_v13  ;;  %v5426_v4 = vld [vmem:[#allocation11 + $0x30] sm:$0xff]   ;;  %v5402_v6 = vld [vmem:[#allocation5 + $0xe4] ss:$8 sps:$4 sm:$0xff]   ;;  %v5404_v7 = vld [vmem:[#allocation5 + $0xe0] ss:$8 sps:$4 sm:$0xff]  }
  0x8d   :  { %4732 = vmatpush3.bf16.msra.mxu1 %v5416_v40  ;;  %v5401_v5 = vld [vmem:[#allocation5 + $0xd0] ss:$8 sps:$4 sm:$0xff]   ;;  %v5406_v8 = vld [vmem:[#allocation5 + $0xf4] ss:$8 sps:$4 sm:$0xff]   ;;  %v186_v9 = vld [vmem:[#allocation2] sm:$0xff] }
  0x8e   :  { %4733 = vmatprep.subr.bf16.mxu1 %v5417_v41  ;;  %v187_v10 = vld [vmem:[#allocation2 + $0x8] sm:$0xff]  ;;  %v5408_v12 = vld [vmem:[#allocation5 + $0xf0] ss:$8 sps:$4 sm:$0xff]   ;;  %v1744_v30 = vld [vmem:[%s7712_s10] sm:$0x3] }
  0x8f   :  { %4626 = vmatpush3.bf16.msra.mxu0 %v5350_v14  ;;  %v5427_v11 = vld [vmem:[#allocation11 + $0x28] sm:$0xff]   ;;  %v960_v13 = vpack.c.bf16 %v187_v10, %v186_v9  ;;  %v188_v14 = vld [vmem:[#allocation2 + $0x10] sm:$0xff]  ;;  %v6236_v32 = vsel %vm1874_vm0, %v1744_v30, 0  ;;  %v5432_v33 = vld [vmem:[#allocation11] sm:$0xff]  }
  0x90   :  { %4627 = vmatprep.subr.bf16.mxu0 %v5351_v15  ;;  %v189_v15 = vld [vmem:[#allocation2 + $0x18] sm:$0xff]  ;;  %7780 = vst [vmem:[#allocation24_spill] sm:$0xff] %v6236_v32  ;;  %v5435_v41 = vld [vmem:[%s7781_s23 + $0x10] sm:$0xff]  }
  0x91   :  { %4734 = vmatpush3.bf16.msra.mxu1 %v5418_v43  ;;  %v5436_v43 = vld [vmem:[%s7781_s23 + $0x18] sm:$0xff]  }
  0x92   :  { %4735 = vmatprep.subr.bf16.mxu1 %v5419_v53  ;;  %v5444_v9 = vld [vmem:[%s7781_s23 + $0x58] sm:$0xff]  }
  0x93   :  { %4628 = vmatpush3.bf16.msra.mxu0 %v5352_v16  ;;  %v961_v16 = vpack.c.bf16 %v189_v15, %v188_v14 }
  0x94   :  { %5037 = vmatprep.subr.bf16.mxu0 %v5356_v17 }
  0x95   :  { %4736 = vmatpush3.bf16.msra.mxu1 %v5420_v54 }
  0x96   :  { %543 = vmatmul.mubr.bf16.vlgmr.msra.gmra.mxu0 %v6131_v18  ;;  %4737 = vmatprep.subr.bf16.mxu1 %v5421_v57  ;;  %v5440_v57 = vld [vmem:[%s7781_s23 + $0x38] sm:$0xff]  }
  0x97   :  { %5038 = vmatpush3.bf16.msra.mxu0 %v5356_v17  ;;  %550 = vmatprep.mubr.bf16.mxu0 %v6133_v19  ;;  %v5428_v17 = vld [vmem:[#allocation11 + $0x20] sm:$0xff]  }
  0x98   :  { %5039 = vmatprep.subr.bf16.mxu0 %v5363_v20 }
  0x99   :  { %4738 = vmatpush3.bf16.msra.mxu1 %v5422_v58 }
  0x9a   :  { %4739 = vmatprep.subr.bf16.mxu1 %v5423_v59 }
  0x9b   :  { %5040 = vmatpush3.bf16.msra.mxu0 %v5363_v20  ;;  %v5431_v20 = vld [vmem:[#allocation11 + $0x8] sm:$0xff]  }
  0x9c   :  { %5041 = vmatprep.subr.bf16.mxu0 %v5370_v21 }
  0x9d   :  { %4740 = vmatpush3.bf16.msra.mxu1 %v5424_v60 }
  0x9e   :  { %551 = vmatmul.mubr.bf16.gmra.mxu0 %v6137_v22  ;;  %5057 = vmatprep.subr.bf16.mxu1 %v5425_v63 }
  0x9f   :  { %558 = vmatprep.mubr.bf16.mxu0 %v6139_v23  ;;  %5042 = vmatpush3.bf16.msra.mxu0 %v5370_v21 }
  0xa0   :  { %5043 = vmatprep.subr.bf16.mxu0 %v5377_v24  ;;  %832 = vmatmul.mubr.bf16.vlgmr.msra.gmra.mxu1 %v6131_v18  ;;  %v5429_v18 = vld [vmem:[#allocation11 + $0x18] sm:$0xff]  }
  0xa1   :  { %839 = vmatprep.mubr.bf16.mxu1 %v6133_v19  ;;  %5058 = vmatpush3.bf16.msra.mxu1 %v5425_v63  ;;  %v5430_v19 = vld [vmem:[#allocation11 + $0x10] sm:$0xff]  }
  0xa2   :  { %5059 = vmatprep.subr.bf16.mxu1 %v5426_v4 }
  0xa3   :  { %5044 = vmatpush3.bf16.msra.mxu0 %v5377_v24 }
  0xa4   :  { %5045 = vmatprep.subr.bf16.mxu0 %v5384_v25 }
  0xa5   :  { %5060 = vmatpush3.bf16.msra.mxu1 %v5426_v4 }
  0xa6   :  { %559 = vmatmul.mubr.bf16.gmra.mxu0 %v6143_v26  ;;  %5061 = vmatprep.subr.bf16.mxu1 %v5427_v11 }
  0xa7   :  { %566 = vmatprep.mubr.bf16.mxu0 %v6145_v27  ;;  %5046 = vmatpush3.bf16.msra.mxu0 %v5384_v25 }
  0xa8   :  { %5047 = vmatprep.subr.bf16.mxu0 %v5391_v28  ;;  %840 = vmatmul.mubr.bf16.gmra.mxu1 %v6137_v22 }
  0xa9   :  { %847 = vmatprep.mubr.bf16.mxu1 %v6139_v23  ;;  %5062 = vmatpush3.bf16.msra.mxu1 %v5427_v11 }
  0xaa   :  { %5063 = vmatprep.subr.bf16.mxu1 %v5428_v17 }
  0xab   :  { %5048 = vmatpush3.bf16.msra.mxu0 %v5391_v28 }
  0xac   :  { %5049 = vmatprep.subr.bf16.mxu0 %v5398_v35 }
  0xad   :  { %5064 = vmatpush3.bf16.msra.mxu1 %v5428_v17  ;;  %v5446_v17 = vld [vmem:[%s7781_s23 + $0x68] sm:$0xff]  }
  0xae   :  { %567 = vmatmul.mubr.bf16.gmra.mxu0 %v6149_v34  ;;  %5065 = vmatprep.subr.bf16.mxu1 %v5429_v18 }
  0xaf   :  { %574 = vmatprep.mubr.bf16.mxu0 %v6151_v36  ;;  %5050 = vmatpush3.bf16.msra.mxu0 %v5398_v35 }
  0xb0   :  { %5051 = vmatprep.subr.bf16.mxu0 %v5405_v37  ;;  %848 = vmatmul.mubr.bf16.gmra.mxu1 %v6143_v26 }
  0xb1   :  { %855 = vmatprep.mubr.bf16.mxu1 %v6145_v27  ;;  %5066 = vmatpush3.bf16.msra.mxu1 %v5429_v18 }
  0xb2   :  { %5067 = vmatprep.subr.bf16.mxu1 %v5430_v19 }
  0xb3   :  { %5052 = vmatpush3.bf16.msra.mxu0 %v5405_v37 }
  0xb4   :  { %5317 = vmatprep.subr.msk.bf16.mxu0 %vm1874_vm0, %v1744_v30  ;;  %v5448_v30 = vld [vmem:[%s7781_s23 + $0x78] sm:$0xff]  }
  0xb5   :  { %5068 = vmatpush3.bf16.msra.mxu1 %v5430_v19 }
  0xb6   :  { %575 = vmatmul.mubr.bf16.gmra.mxu0 %v6155_v42  ;;  %5069 = vmatprep.subr.bf16.mxu1 %v5431_v20 }
  0xb7   :  { %582 = vmatprep.mubr.bf16.mxu0 %v6157_v44 }
  0xb8   :  { %856 = vmatmul.mubr.bf16.gmra.mxu1 %v6149_v34  ;;  %v5433_v34 = vld [vmem:[%s7781_s23] sm:$0xff]  }
  0xb9   :  { %863 = vmatprep.mubr.bf16.mxu1 %v6151_v36  ;;  %5070 = vmatpush3.bf16.msra.mxu1 %v5431_v20  ;;  %v5434_v36 = vld [vmem:[%s7781_s23 + $0x8] sm:$0xff]  }
  0xba   :  { %5071 = vmatprep.subr.bf16.mxu1 %v5432_v33 }
  0xbd   :  { %5072 = vmatpush3.bf16.msra.mxu1 %v5432_v33 }
  0xbe   :  { %583 = vmatmul.mubr.bf16.gmra.mxu0 %v6161_v45 }
  0xbf   :  { %590 = vmatprep.mubr.bf16.mxu0 %v6163_v46 }
  0xc0   :  { %864 = vmatmul.mubr.bf16.gmra.mxu1 %v6155_v42 }
  0xc1   :  { %871 = vmatprep.mubr.bf16.mxu1 %v6157_v44 }
  0xc6   :  { %591 = vmatmul.mubr.bf16.gmra.mxu0 %v6167_v47 }
  0xc7   :  { %598 = vmatprep.mubr.bf16.mxu0 %v6169_v48 }
  0xc8   :  { %872 = vmatmul.mubr.bf16.gmra.mxu1 %v6161_v45 }
  0xc9   :  { %879 = vmatprep.mubr.bf16.mxu1 %v6163_v46 }
  0xce   :  { %599 = vmatmul.mubr.bf16.gmra.mxu0 %v6173_v49 }
  0xcf   :  { %606 = vmatprep.mubr.bf16.mxu0 %v6175_v50 }
  0xd0   :  { %880 = vmatmul.mubr.bf16.gmra.mxu1 %v6167_v47 }
  0xd1   :  { %887 = vmatprep.mubr.bf16.mxu1 %v6169_v48  ;;  %v5437_v48 = vld [vmem:[%s7781_s23 + $0x20] sm:$0xff]  }
  0xd6   :  { %607 = vmatmul.mubr.bf16.gmra.mxu0 %v6179_v51 }
  0xd7   :  { %614 = vmatprep.mubr.bf16.mxu0 %v6181_v52 }
  0xd8   :  { %888 = vmatmul.mubr.bf16.gmra.mxu1 %v6173_v49  ;;  %v5438_v49 = vld [vmem:[%s7781_s23 + $0x28] sm:$0xff]  }
  0xd9   :  { %895 = vmatprep.mubr.bf16.mxu1 %v6175_v50 }
  0xde   :  { %615 = vmatmul.mubr.bf16.gmra.mxu0 %v6185_v55 }
  0xdf   :  { %622 = vmatprep.mubr.bf16.mxu0 %v6187_v56 }
  0xe0   :  { %896 = vmatmul.mubr.bf16.gmra.mxu1 %v6179_v51 }
  0xe1   :  { %903 = vmatprep.mubr.bf16.mxu1 %v6181_v52 }
  0xe6   :  { %623 = vmatmul.mubr.bf16.gmra.mxu0 %v6191_v61 }
  0xe7   :  { %630 = vmatprep.mubr.bf16.mxu0 %v6193_v62 }
  0xe8   :  { %904 = vmatmul.mubr.bf16.gmra.mxu1 %v6185_v55 }
  0xe9   :  { %911 = vmatprep.mubr.bf16.mxu1 %v6187_v56  ;;  %v5439_v56 = vld [vmem:[%s7781_s23 + $0x30] sm:$0xff]  }
  0xee   :  { %631 = vmatmul.mubr.bf16.gmra.mxu0 %v5394_v0 }
  0xef   :  { %638 = vmatprep.mubr.bf16.mxu0 %v5395_v1 }
  0xf0   :  { %912 = vmatmul.mubr.bf16.gmra.mxu1 %v6191_v61 }
  0xf1   :  { %919 = vmatprep.mubr.bf16.mxu1 %v6193_v62 }
  0xf6   :  { %639 = vmatmul.mubr.bf16.gmra.mxu0 %v5397_v2 }
  0xf7   :  { %646 = vmatprep.mubr.bf16.mxu0 %v5399_v3 }
  0xf8   :  { %920 = vmatmul.mubr.bf16.gmra.mxu1 %v5394_v0  ;;  %v5441_v0 = vld [vmem:[%s7781_s23 + $0x40] sm:$0xff]  }
  0xf9   :  { %927 = vmatprep.mubr.bf16.mxu1 %v5395_v1  ;;  %v5442_v1 = vld [vmem:[%s7781_s23 + $0x48] sm:$0xff]  }
  0xfe   :  { %647 = vmatmul.mubr.bf16.gmra.mxu0 %v5401_v5 }
  0xff   :  { %654 = vmatprep.mubr.bf16.mxu0 %v5402_v6 }
 0x100   :  { %928 = vmatmul.mubr.bf16.gmra.mxu1 %v5397_v2 }
 0x101   :  { %935 = vmatprep.mubr.bf16.mxu1 %v5399_v3 }
 0x106   :  { %655 = vmatmul.mubr.bf16.gmra.mxu0 %v5404_v7 }
 0x107   :  { %662 = vmatprep.mubr.bf16.mxu0 %v5406_v8 }
 0x108   :  { %936 = vmatmul.mubr.bf16.gmra.mxu1 %v5401_v5 }
 0x109   :  { %943 = vmatprep.mubr.bf16.mxu1 %v5402_v6 }
 0x10e   :  { %663 = vmatmul.mubr.bf16.gmra.mxu0 %v5408_v12 }
 0x10f   :  { %5053 = vmatprep.mubr.bf16.mxu0 %v960_v13 }
 0x110   :  { %944 = vmatmul.mubr.bf16.gmra.mxu1 %v5404_v7 }
 0x111   :  { %951 = vmatprep.mubr.bf16.mxu1 %v5406_v8  ;;  %v5443_v8 = vld [vmem:[%s7781_s23 + $0x50] sm:$0xff]  }
 0x116   :  { %5054 = vmatmul.mubr.bf16.vlgmr.msra.gmra.mxu0 %v961_v16  ;;  %v5445_v16 = vld [vmem:[%s7781_s23 + $0x60] sm:$0xff]  }
 0x117   :  { %5106 = vmatpush3.bf16.msra.mxu0 %v6236_v32  ;;  %5107 = vmatprep.mubr.msk.bf16.mxu0 %vm1825_vm1, %v5433_v34 }
 0x118   :  { %952 = vmatmul.mubr.bf16.gmra.mxu1 %v5408_v12 }
 0x11e   :  { %5108 = vmatmul.mubr.msk.bf16.vlgmr.msra.gmra.mxu0 %vm1825_vm1, %v5434_v36 }
 0x11f   :  { %5111 = vmatprep.mubr.msk.bf16.mxu0 %vm1825_vm1, %v5435_v41 }
 0x126   :  { %5112 = vmatmul.mubr.msk.bf16.gmra.mxu0 %vm1825_vm1, %v5436_v43 }
 0x127   :  { %5115 = vmatprep.mubr.msk.bf16.mxu0 %vm1825_vm1, %v5437_v48 }
 0x12e   :  { %5116 = vmatmul.mubr.msk.bf16.gmra.mxu0 %vm1825_vm1, %v5438_v49 }
 0x12f   :  { %5119 = vmatprep.mubr.msk.bf16.mxu0 %vm1825_vm1, %v5439_v56 }
 0x136   :  { %5120 = vmatmul.mubr.msk.bf16.gmra.mxu0 %vm1825_vm1, %v5440_v57 }
 0x137   :  { %5123 = vmatprep.mubr.msk.bf16.mxu0 %vm1825_vm1, %v5441_v0 }
 0x13e   :  { %5124 = vmatmul.mubr.msk.bf16.gmra.mxu0 %vm1825_vm1, %v5442_v1 }
 0x13f   :  { %5127 = vmatprep.mubr.msk.bf16.mxu0 %vm1825_vm1, %v5443_v8 }
 0x146   :  { %5128 = vmatmul.mubr.msk.bf16.gmra.mxu0 %vm1825_vm1, %v5444_v9 }
 0x147   :  { %5131 = vmatprep.mubr.msk.bf16.mxu0 %vm1825_vm1, %v5445_v16 }
 0x14e   :  { %5132 = vmatmul.mubr.msk.bf16.gmra.mxu0 %vm1825_vm1, %v5446_v17 }
 0x156   :  { %v4629_v21 = vpop.f32.mrf.mxu0 }
 0x158   :  { %v4630_v22 = vpop.f32.mrf.mxu0 }
 0x159   :  { %v6219_v23 = vadd.f32 %v4630_v22, %v4629_v21 }
 0x15a   :  { %v6221_v24 = vpop.f32.mrf.mxu0 }
 0x15c   :  { %v6223_v25 = vpop.f32.mrf.mxu0 }
 0x15e   :  { %v4635_v26 = vpop.f32.mrf.mxu0 }
 0x160   :  { %v4636_v27 = vpop.f32.mrf.mxu0  ;;  %v4741_v43 = vpop.f32.mrf.mxu1 }
 0x161   :  { %v6225_v28 = vadd.f32 %v4636_v27, %v4635_v26  ;;  %v5447_v27 = vld [vmem:[%s7781_s23 + $0x70] sm:$0xff]  }
 0x162   :  { %v6227_v29 = vpop.f32.mrf.mxu0  ;;  %5135 = vmatprep.mubr.msk.bf16.mxu0 %vm1825_vm1, %v5447_v27  ;;  %v4742_v48 = vpop.f32.mrf.mxu1 }
 0x163   :  { %5136 = vmatmul.mubr.msk.bf16.gmra.mxu0 %vm1825_vm1, %v5448_v30 }
 0x164   :  { %v6232_v31 = vpop.f32.mrf.mxu0 }
 0x166   :  { %v6242_v35 = vpop.f32.mrf.mxu0 }
 0x168   :  { %v6248_v37 = vpop.f32.mrf.mxu0 }
 0x16a   :  { %v6251_v38 = vpop.f32.mrf.mxu0 }
 0x16c   :  { %v6253_v39 = vpop.f32.mrf.mxu0 }
 0x16e   :  { %v4647_v40 = vpop.f32.mrf.mxu0 }
 0x170   :  { %v4648_v42 = vpop.f32.mrf.mxu0 }
 0x171   :  { %v6261_v44 = vadd.f32 %v4648_v42, %v4647_v40 }
 0x172   :  { %v6264_v45 = vpop.f32.mrf.mxu0 }
 0x174   :  { %v6267_v46 = vpop.f32.mrf.mxu0 }
 0x176   :  { %v4653_v47 = vpop.f32.mrf.mxu0 }
 0x178   :  { %v4654_v50 = vpop.f32.mrf.mxu0 }
 0x179   :  { %v6275_v51 = vadd.f32 %v4654_v50, %v4653_v47  ;;  %v6343_v50 = vadd.f32 %v4742_v48, %v4741_v43 }
 0x17a   :  { %v4656_v52 = vpop.f32.mrf.mxu0 }
 0x17b   :  { %7782 = vst [vmem:[#allocation25_spill] sm:$0xff] %v6343_v50 }
 0x17c   :  { %v4657_v53 = vpop.f32.mrf.mxu0 }
 0x17d   :  { %v6279_v54 = vadd.f32 %v4657_v53, %v4656_v52  ;;  %v6345_v53 = vpop.f32.mrf.mxu1 }
 0x17e   :  { %v4659_v55 = vpop.f32.mrf.mxu0  ;;  %7783 = vst [vmem:[#allocation26_spill] sm:$0xff] %v6345_v53 }
 0x17f   :  { %v6347_v56 = vpop.f32.mrf.mxu1 }
 0x180   :  { %v4660_v58 = vpop.f32.mrf.mxu0  ;;  %7784 = vst [vmem:[#allocation27_spill] sm:$0xff] %v6347_v56 }
 0x181   :  { %v6287_v59 = vadd.f32 %v4660_v58, %v4659_v55 }
 0x182   :  { %v4662_v60 = vpop.f32.mrf.mxu0 }
 0x184   :  { %v4663_v61 = vpop.f32.mrf.mxu0 }
 0x185   :  { %v6291_v62 = vadd.f32 %v4663_v61, %v4662_v60  ;;  %v4747_v60 = vpop.f32.mrf.mxu1 }
 0x186   :  { %v4665_v63 = vpop.f32.mrf.mxu0 }
 0x188   :  { %v4666_v2 = vpop.f32.mrf.mxu0 }
 0x189   :  { %v6299_v3 = vadd.f32 %v4666_v2, %v4665_v63  ;;  %v4748_v63 = vpop.f32.mrf.mxu1 }
 0x18a   :  { %v4668_v4 = vpop.f32.mrf.mxu0  ;;  %v6353_v1 = vadd.f32 %v4748_v63, %v4747_v60 }
 0x18c   :  { %v4669_v5 = vpop.f32.mrf.mxu0  ;;  %7785 = vst [vmem:[#allocation28_spill] sm:$0xff] %v6353_v1 }
 0x18d   :  { %v6303_v6 = vadd.f32 %v4669_v5, %v4668_v4  ;;  %v6355_v4 = vpop.f32.mrf.mxu1 }
 0x18e   :  { %v4671_v7 = vpop.f32.mrf.mxu0  ;;  %7786 = vst [vmem:[#allocation29_spill] sm:$0xff] %v6355_v4 }
 0x190   :  { %v4672_v10 = vpop.f32.mrf.mxu0 }
 0x191   :  { %v6311_v11 = vadd.f32 %v4672_v10, %v4671_v7  ;;  %v6357_v7 = vpop.f32.mrf.mxu1 }
 0x192   :  { %v4674_v12 = vpop.f32.mrf.mxu0  ;;  %7787 = vst [vmem:[#allocation30_spill] sm:$0xff] %v6357_v7 }
 0x193   :  { %v6361_v10 = vpop.f32.mrf.mxu1 }
 0x194   :  { %v4675_v13 = vpop.f32.mrf.mxu0  ;;  %7788 = vst [vmem:[#allocation31_spill] sm:$0xff] %v6361_v10 }
 0x195   :  { %v6315_v14 = vadd.f32 %v4675_v13, %v4674_v12  ;;  %v6363_v13 = vpop.f32.mrf.mxu1 }
 0x196   :  { %v4677_v15 = vpop.f32.mrf.mxu0  ;;  %7789 = vst [vmem:[#allocation32_spill] sm:$0xff] %v6363_v13 }
 0x197   :  { %v6367_v17 = vpop.f32.mrf.mxu1 }
 0x198   :  { %v4678_v18 = vpop.f32.mrf.mxu0  ;;  %7790 = vst [vmem:[#allocation33_spill] sm:$0xff] %v6367_v17 }
 0x199   :  { %v6323_v19 = vadd.f32 %v4678_v18, %v4677_v15 }
 0x19a   :  { %v4680_v20 = vpop.f32.mrf.mxu0 }
 0x19c   :  { %v4681_v21 = vpop.f32.mrf.mxu0 }
 0x19d   :  { %v6327_v22 = vadd.f32 %v4681_v21, %v4680_v20  ;;  %v6369_v20 = vpop.f32.mrf.mxu1 }
 0x19e   :  { %v4683_v26 = vpop.f32.mrf.mxu0  ;;  %7791 = vst [vmem:[#allocation34_spill] sm:$0xff] %v6369_v20 }
 0x19f   :  { %v4759_v27 = vpop.f32.mrf.mxu1 }
 0x1a0   :  { %v4684_v33 = vpop.f32.mrf.mxu0 }
 0x1a1   :  { %v6335_v34 = vadd.f32 %v4684_v33, %v4683_v26  ;;  %v4760_v33 = vpop.f32.mrf.mxu1 }
 0x1a2   :  { %v4686_v36 = vpop.f32.mrf.mxu0 }
 0x1a3   :  { %v4762_v43 = vpop.f32.mrf.mxu1 }
 0x1a4   :  { %v4687_v40 = vpop.f32.mrf.mxu0 }
 0x1a5   :  { %v6339_v41 = vadd.f32 %v4687_v40, %v4686_v36  ;;  %v6375_v40 = vadd.f32 %v4760_v33, %v4759_v27  ;;  %v4763_v48 = vpop.f32.mrf.mxu1  ;;  %v5929_v27 = vmov 1966171168   ;;  %v1087_v33 = vlaneseq }
 0x1a6   :  { %v4689_v42 = vpop.f32.mrf.mxu0 }
 0x1a7   :  { %7792 = vst [vmem:[#allocation35_spill] sm:$0xff] %v6375_v40  ;;  %v4765_v60 = vpop.f32.mrf.mxu1 }
 0x1a8   :  { %v4690_v47 = vpop.f32.mrf.mxu0 }
 0x1a9   :  { %v6341_v49 = vadd.f32 %v4690_v47, %v4689_v42  ;;  %v4766_v63 = vpop.f32.mrf.mxu1 }
 0x1aa   :  { %v4692_v52 = vpop.f32.mrf.mxu0 }
 0x1ac   :  { %v4693_v55 = vpop.f32.mrf.mxu0 }
 0x1ad   :  { %v6349_v57 = vadd.f32 %v4693_v55, %v4692_v52  ;;  %v6379_v55 = vadd.f32 %v4763_v48, %v4762_v43 }
 0x1ae   :  { %v4695_v58 = vpop.f32.mrf.mxu0 }
 0x1af   :  { %7793 = vst [vmem:[#allocation36_spill] sm:$0xff] %v6379_v55 }
 0x1b0   :  { %v4696_v61 = vpop.f32.mrf.mxu0 }
 0x1b1   :  { %v6351_v0 = vadd.f32 %v4696_v61, %v4695_v58 }
 0x1b2   :  { %v4698_v2 = vpop.f32.mrf.mxu0 }
 0x1b4   :  { %v4699_v5 = vpop.f32.mrf.mxu0 }
 0x1b5   :  { %v6359_v8 = vadd.f32 %v4699_v5, %v4698_v2  ;;  %v6383_v5 = vadd.f32 %v4766_v63, %v4765_v60  ;;  %v6391_v60 = vshrl.u32 %v1087_v33, 7 }
 0x1b6   :  { %v4701_v9 = vpop.f32.mrf.mxu0 }
 0x1b7   :  { %7794 = vst [vmem:[#allocation37_spill] sm:$0xff] %v6383_v5  ;;  %7796 = vst [vmem:[#allocation39_spill] sm:$0xff] %v6391_v60 }
 0x1b8   :  { %v4702_v12 = vpop.f32.mrf.mxu0 }
 0x1b9   :  { %v6365_v15 = vadd.f32 %v4702_v12, %v4701_v9  ;;  %v4768_v12 = vpop.f32.mrf.mxu1 }
 0x1ba   :  { %v4704_v16 = vpop.f32.mrf.mxu0 }
 0x1bc   :  { %v4705_v18 = vpop.f32.mrf.mxu0 }
 0x1bd   :  { %v6371_v21 = vadd.f32 %v4705_v18, %v4704_v16  ;;  %v4769_v18 = vpop.f32.mrf.mxu1 }
 0x1be   :  { %v4707_v26 = vpop.f32.mrf.mxu0 }
 0x1c0   :  { %v4708_v30 = vpop.f32.mrf.mxu0 }
 0x1c1   :  { %v6373_v36 = vadd.f32 %v4708_v30, %v4707_v26  ;;  %v1085_v30 = vunpack.c.l.s4 %v5929_v27 }
 0x1c2   :  { %v4710_v42 = vpop.f32.mrf.mxu0 }
 0x1c4   :  { %v4711_v47 = vpop.f32.mrf.mxu0 }
 0x1c5   :  { %v6377_v52 = vadd.f32 %v4711_v47, %v4710_v42  ;;  %v6387_v42 = vadd.f32 %v4769_v18, %v4768_v12  ;;  %v4771_v47 = vpop.f32.mrf.mxu1 }
 0x1c6   :  { %v4713_v58 = vpop.f32.mrf.mxu0 }
 0x1c7   :  { %7795 = vst [vmem:[#allocation38_spill] sm:$0xff] %v6387_v42  ;;  %v4772_v32 = vpop.f32.mrf.mxu1 }
 0x1c8   :  { %v4714_v61 = vpop.f32.mrf.mxu0 }
 0x1c9   :  { %v6381_v2 = vadd.f32 %v4714_v61, %v4713_v58  ;;  %v1086_v58 = vunpack.c.0.s8 %v1085_v30  ;;  %v6393_v61 = vadd.f32 %v4772_v32, %v4771_v47  ;;  %v4774_v40 = vpop.f32.mrf.mxu1 }
 0x1ca   :  { %v4716_v9 = vpop.f32.mrf.mxu0 }
 0x1cb   :  { %7797 = vst [vmem:[#allocation40_spill] sm:$0xff] %v6393_v61  ;;  %v6398_v12 = vsub.s32 %v1086_v58, %v6391_v60  ;;  %v4640_v58 = vadd.f32 %v6232_v31, %v6227_v29  ;;  %v6430_v29 = vadd.f32 %v6267_v46, %v6264_v45 }
 0x1cc   :  { %v4717_v16 = vpop.f32.mrf.mxu0 }
 0x1cd   :  { %v6385_v26 = vadd.f32 %v4717_v16, %v4716_v9  ;;  %v4775_v16 = vpop.f32.mrf.mxu1 }
 0x1ce   :  { %v4719_v43 = vpop.f32.mrf.mxu0  ;;  %v6400_v18 = vadd.f32 %v4775_v16, %v4774_v40  ;;  %v6413_v40 = vadd.f32 %v6248_v37, %v6242_v35 }
 0x1cf   :  { %v4777_v42 = vpop.f32.mrf.mxu1 }
 0x1d0   :  { %v4720_v48 = vpop.f32.mrf.mxu0  ;;  %7799 = vst [vmem:[#allocation42_spill] sm:$0xff] %v6400_v18 }
 0x1d1   :  { %v6389_v55 = vadd.f32 %v4720_v48, %v4719_v43  ;;  %v4778_v30 = vpop.f32.mrf.mxu1 }
 0x1d2   :  { %v4722_v63 = vpop.f32.mrf.mxu0  ;;  %v6403_v61 = vadd.f32 %v4778_v30, %v4777_v42 }
 0x1d4   :  { %v4723_v9 = vpop.f32.mrf.mxu0  ;;  %7800 = vst [vmem:[#allocation43_spill] sm:$0xff] %v6403_v61 }
 0x1d5   :  { %v6395_v5 = vadd.f32 %v4723_v9, %v4722_v63  ;;  %v6407_v63 = vadd.f32 %v6223_v25, %v6221_v24  ;;  %v6416_v9 = vsub.s32 0, %v6391_v60  ;;  %v6426_v25 = vadd.f32 %v6253_v39, %v6251_v38 }
 0x1d6   :  { %v5055_v27 = vpop.f32.mrf.mxu0 }
 0x1d7   :  { %7798 = vst [vmem:[#allocation41_spill] sm:$0xff] %v6395_v5  ;;  %v1077_v43 = vmul.f32 0.35355338, %v5055_v27  ;;  %7801 = vst [vmem:[#allocation44_spill] sm:$0xff] %v6416_v9  ;;  %v6418_v27 = vpop.f32.mrf.mxu1 }
 0x1d8   :  { %v1060_v48 = vpop.f32.mrf.mxu0 }
 0x1d9   :  { %v1181_v33 = vcombine.high %v1077_v43, %v1077_v43  ;;  %v1188_v32 = vrot.slane %v1077_v43, %v6398_v12  ;;  %v1075_v47 = vmul.f32 0.35355338, %v1060_v48  ;;  %v6433_v37 = vpop.f32.mrf.mxu1 }
 0x1da   :  { %v5056_v16 = vpop.f32.mrf.mxu0 }
 0x1db   :  { %v1195_v42 = vrot.slane %v1181_v33, %v6398_v12  ;;  %v1196_v43 = vcombine.high %v1188_v32, %v1188_v32  ;;  %v6422_v48 = vrot.slane %v1188_v32, %v6398_v12  ;;  %v1083_v24 = vcombine.high %v1075_v47, %v1075_v47  ;;  %v6447_v60 = vpop.f32.mrf.mxu1 }
 0x1dc   :  { %v1090_v31 = vrot.slane %v1075_v47, %v6398_v12  ;;  %v1078_v35 = vmul.f32 0.35355338, %v5056_v16  ;;  %v1063_v16 = vpop.f32.mrf.mxu0  ;;  %7802 = vst [vmem:[#allocation45_spill] sm:$0xff] %v6447_v60 }
 0x1dd   :  { %v1197_v30 = vcombine.high %v1195_v42, %v1195_v42  ;;  %v6436_v33 = vrot.slane %v1195_v42, %v6398_v12  ;;  %v6439_v32 = vrot.slane %v1196_v43, %v6398_v12  ;;  %v1097_v45 = vrot.slane %v1083_v24, %v6398_v12 }
 0x1de   :  { %v1098_v46 = vcombine.high %v1090_v31, %v1090_v31  ;;  %v1106_v47 = vrot.slane %v1090_v31, %v6398_v12  ;;  %v1230_v61 = vcombine.high %v1078_v35, %v1078_v35  ;;  %v6458_v31 = vpop.f32.mrf.mxu1  ;;  %v1076_v17 = vmul.f32 0.35355338, %v1063_v16 }
 0x1df   :  { %v6450_v42 = vrot.slane %v1197_v30, %v6398_v12  ;;  %v1099_v18 = vcombine.high %v1097_v45, %v1097_v45  ;;  %v1113_v39 = vrot.slane %v1097_v45, %v6398_v12  ;;  %7803 = vst [vmem:[#allocation46_spill] sm:$0xff] %v6458_v31  ;;  %v1237_v30 = vrot.slane %v1078_v35, %v6398_v12 }
 0x1e0   :  { %v1120_v24 = vrot.slane %v1098_v46, %v6398_v12  ;;  %v1128_v1 = vcombine.high %v1106_v47, %v1106_v47  ;;  %v1282_v50 = vrot.slane %v1106_v47, %v6416_v9  ;;  %v1244_v20 = vrot.slane %v1230_v61, %v6398_v12  ;;  %v6465_v7 = vpop.f32.mrf.mxu1 }
 0x1e1   :  { %v1127_v43 = vrot.slane %v1099_v18, %v6398_v12  ;;  %v1129_v13 = vcombine.high %v1113_v39, %v1113_v39  ;;  %7804 = vst [vmem:[#allocation47_spill] sm:$0xff] %v6465_v7  ;;  %v1245_v45 = vcombine.high %v1237_v30, %v1237_v30  ;;  %v6468_v4 = vrot.slane %v1237_v30, %v6398_v12 }
 0x1e2   :  { %v1130_v38 = vcombine.high %v1120_v24, %v1120_v24  ;;  %v1290_v10 = vrot.slane %v1128_v1, %v6416_v9  ;;  %v1246_v46 = vcombine.high %v1244_v20, %v1244_v20  ;;  %v6471_v47 = vrot.slane %v1244_v20, %v6398_v12  ;;  %v6476_v56 = vpop.f32.mrf.mxu1 }
 0x1e3   :  { %v1132_v16 = vcombine.high %v1076_v17, %v1076_v17  ;;  %v1139_v18 = vrot.slane %v1076_v17, %v6398_v12  ;;  %7805 = vst [vmem:[#allocation48_spill] sm:$0xff] %v6476_v56  ;;  %v6479_v1 = vrot.slane %v1245_v45, %v6398_v12  ;;  %v1286_v56 = vrot.slane %v1120_v24, %v6416_v9 }
 0x1e4   :  { %v1294_v35 = vrot.slane %v1130_v38, %v6416_v9  ;;  %v1441_v61 = vmul.f32 %v6225_v28, %v1290_v10  ;;  %v6482_v53 = vrot.slane %v1246_v46, %v6398_v12  ;;  %v6491_v5 = vpop.f32.mrf.mxu1  ;;  %v1439_v30 = vmul.f32 %v6219_v23, %v1282_v50 }
 0x1e5   :  { %v1146_v10 = vrot.slane %v1132_v16, %v6398_v12  ;;  %v1147_v17 = vcombine.high %v1139_v18, %v1139_v18  ;;  %7806 = vst [vmem:[#allocation49_spill] sm:$0xff] %v6491_v5  ;;  %v1155_v46 = vrot.slane %v1139_v18, %v6398_v12  ;;  %v1440_v31 = vmul.f32 %v6407_v63, %v1286_v56 }
 0x1e6   :  { %v1442_v38 = vmul.f32 %v4640_v58, %v1294_v35  ;;  %v6500_v28 = vpop.f32.mrf.mxu1  ;;  %v1298_v45 = vrot.slane %v1113_v39, %v6416_v9  ;;  %v1302_v23 = vrot.slane %v1127_v43, %v6416_v9 }
 0x1e7   :  { %v1148_v7 = vcombine.high %v1146_v10, %v1146_v10  ;;  %v1162_v58 = vrot.slane %v1146_v10, %v6398_v12  ;;  %v1169_v35 = vrot.slane %v1147_v17, %v6398_v12  ;;  %v1177_v16 = vcombine.high %v1155_v46, %v1155_v46 }
 0x1e8   :  { %v1472_v20 = vpack.c.bf16 %v1442_v38, %v1441_v61  ;;  %v1314_v5 = vrot.slane %v1155_v46, %v6416_v9  ;;  %v6507_v50 = vpop.f32.mrf.mxu1  ;;  %v1471_v10 = vpack.c.bf16 %v1440_v31, %v1439_v30  ;;  %v1443_v61 = vmul.f32 %v6413_v40, %v1298_v45 }
 0x1e9   :  { %v1176_v18 = vrot.slane %v1148_v7, %v6398_v12  ;;  %v1178_v24 = vcombine.high %v1162_v58, %v1162_v58  ;;  %v1179_v60 = vcombine.high %v1169_v35, %v1169_v35  ;;  %v1131_v38 = vcombine.high %v1127_v43, %v1127_v43 }
 0x1ea   :  { %v1306_v17 = vrot.slane %v1129_v13, %v6416_v9  ;;  %v1444_v46 = vmul.f32 %v6426_v25, %v1302_v23  ;;  %v1318_v56 = vrot.slane %v1169_v35, %v6416_v9  ;;  %v1447_v63 = vmul.f32 %v6275_v51, %v1314_v5  ;;  %v6515_v12 = vpop.f32.mrf.mxu1  ;;  %5073 = vmatprep.mubr.bf16.mxu1 %v1471_v10 }
 0x1eb   :  { %v1322_v7 = vrot.slane %v1177_v16, %v6416_v9  ;;  %v1310_v39 = vrot.slane %v1131_v38, %v6416_v9  ;;  %v1326_v40 = vrot.slane %v1179_v60, %v6416_v9  ;;  %v1330_v43 = vrot.slane %v1162_v58, %v6416_v9  ;;  %5074 = vmatmul.mubr.bf16.vlgmr.msra.gmra.mxu1 %v1472_v20 }
 0x1ec   :  { %v1445_v31 = vmul.f32 %v6261_v44, %v1306_v17  ;;  %v1473_v13 = vpack.c.bf16 %v1444_v46, %v1443_v61  ;;  %v1448_v25 = vmul.f32 %v6279_v54, %v1318_v56  ;;  %v1334_v51 = vrot.slane %v1176_v18, %v6416_v9  ;;  %v6526_v5 = vpop.f32.mrf.mxu1 }
 0x1ed   :  { %v6523_v30 = vmul.f32 %v6287_v59, %v1322_v7  ;;  %v1446_v45 = vmul.f32 %v6430_v29, %v1310_v39  ;;  %v6530_v35 = vmul.f32 %v6291_v62, %v1326_v40  ;;  %v6533_v44 = vmul.f32 %v6299_v3, %v1330_v43 }
 0x1ee   :  { %v1180_v60 = vcombine.high %v1176_v18, %v1176_v18  ;;  %5077 = vmatprep.mubr.bf16.mxu1 %v1473_v13  ;;  %v1475_v20 = vpack.c.bf16 %v1448_v25, %v1447_v63  ;;  %v6536_v54 = vmul.f32 %v6303_v6, %v1334_v51  ;;  %v1338_v59 = vrot.slane %v1178_v24, %v6416_v9  ;;  %v4796_v16 = vpop.f32.mrf.mxu1 }
 0x1ef   :  { %v1350_v58 = vrot.slane %v6439_v32, %v6416_v9  ;;  %v1474_v23 = vpack.c.bf16 %v1446_v45, %v1445_v31  ;;  %v1476_v62 = vpack.c.bf16 %v6530_v35, %v6523_v30  ;;  %v7807_v3 = vrot.slane %v6422_v48, %v6416_v9 }
 0x1f0   :  { %v1342_v29 = vrot.slane %v1180_v60, %v6416_v9  ;;  %v1477_v6 = vpack.c.bf16 %v6536_v54, %v6533_v44  ;;  %v6553_v24 = vmul.f32 %v6311_v11, %v1338_v59  ;;  %v7808_v61 = vcombine.high %v6422_v48, %v6422_v48  ;;  %v4798_v17 = vpop.f32.mrf.mxu1 }
 0x1f1   :  { %v6548_v18 = vmul.f32 %v6323_v19, %v7807_v3  ;;  %v6556_v10 = vmul.f32 %v6327_v22, %v1350_v58  ;;  %v7809_v19 = vcombine.high %v6439_v32, %v6439_v32  ;;  %v1362_v11 = vrot.slane %v6436_v33, %v6416_v9 }
 0x1f2   :  { %v1354_v38 = vrot.slane %v7808_v61, %v6416_v9  ;;  %v1454_v46 = vmul.f32 %v6315_v14, %v1342_v29  ;;  %v1366_v22 = vrot.slane %v6450_v42, %v6416_v9  ;;  %v1229_v14 = vcombine.high %v6450_v42, %v6450_v42  ;;  %v4799_v39 = vpop.f32.mrf.mxu1  ;;  %v7817_v61 = vld [vmem:[#allocation46_spill] sm:$0xff] }
 0x1f3   :  { %v1358_v56 = vrot.slane %v7809_v19, %v6416_v9  ;;  %v1479_v63 = vpack.c.bf16 %v6556_v10, %v6548_v18  ;;  %v7810_v32 = vcombine.high %v6436_v33, %v6436_v33  ;;  %v1459_v43 = vmul.f32 %v6341_v49, %v1362_v11  ;;  %5078 = vmatmul.mubr.bf16.gmra.mxu1 %v1474_v23  ;;  %v7816_v10 = vld [vmem:[#allocation45_spill] sm:$0xff]  ;;  %v7820_v19 = vld [vmem:[#allocation48_spill] sm:$0xff] }
 0x1f4   :  { %v6574_v48 = vmul.f32 %v6335_v34, %v1354_v38  ;;  %v1478_v31 = vpack.c.bf16 %v1454_v46, %v6553_v24  ;;  %v1460_v13 = vmul.f32 %v6349_v57, %v1366_v22  ;;  %v1374_v34 = vrot.slane %v1229_v14, %v6416_v9  ;;  %5081 = vmatprep.mubr.bf16.mxu1 %v1475_v20  ;;  %v7819_v46 = vld [vmem:[#allocation47_spill] sm:$0xff]  ;;  %v7824_v22 = vld [vmem:[#allocation41_spill] sm:$0xff] }
 0x1f5   :  { %v1370_v7 = vrot.slane %v7810_v32, %v6416_v9  ;;  %v1458_v40 = vmul.f32 %v6339_v41, %v1358_v56  ;;  %v1382_v42 = vrot.slane %v6479_v1, %v6416_v9  ;;  %v7811_v33 = vrot.slane %v6468_v4, %v6416_v9  ;;  %v4801_v41 = vpop.f32.mrf.mxu1 }
 0x1f6   :  { %v1481_v57 = vpack.c.bf16 %v1460_v13, %v1459_v43  ;;  %v7812_v51 = vcombine.high %v6468_v4, %v6468_v4  ;;  %v7813_v45 = vcombine.high %v6479_v1, %v6479_v1  ;;  %v1462_v44 = vmul.f32 %v6359_v8, %v1374_v34 }
 0x1f7   :  { %v6588_v25 = vmul.f32 %v6351_v0, %v1370_v7  ;;  %v6596_v30 = vmul.f32 %v6365_v15, %v7811_v33  ;;  %v1480_v49 = vpack.c.bf16 %v1458_v40, %v6574_v48  ;;  %v1464_v15 = vmul.f32 %v6371_v21, %v1382_v42  ;;  %v4802_v54 = vpop.f32.mrf.mxu1 }
 0x1f8   :  { %v1386_v0 = vrot.slane %v7812_v51, %v6416_v9  ;;  %v1390_v35 = vrot.slane %v7813_v45, %v6416_v9  ;;  %v1394_v60 = vrot.slane %v6471_v47, %v6416_v9  ;;  %v1398_v20 = vrot.slane %v6482_v53, %v6416_v9 }
 0x1f9   :  { %v1278_v58 = vcombine.high %v6482_v53, %v6482_v53  ;;  %v7814_v8 = vcombine.high %v6471_v47, %v6471_v47  ;;  %v1482_v21 = vpack.c.bf16 %v1462_v44, %v6588_v25  ;;  %v1483_v23 = vpack.c.bf16 %v1464_v15, %v6596_v30  ;;  %v4804_v18 = vpop.f32.mrf.mxu1  ;;  %v6675_v15 = vpop.f32.mrf.mxu0 }
 0x1fa   :  { %v1465_v59 = vmul.f32 %v6373_v36, %v1386_v0  ;;  %v1466_v4 = vmul.f32 %v6377_v52, %v1390_v35  ;;  %v1467_v29 = vmul.f32 %v6381_v2, %v1394_v60  ;;  %v1468_v3 = vmul.f32 %v6385_v26, %v1398_v20  ;;  %v7822_v26 = vld [vmem:[#allocation49_spill] sm:$0xff]  ;;  %7839 = vst [vmem:[#allocation62_spill] sm:$0xff] %v6675_v15 }
 0x1fb   :  { %v1402_v1 = vrot.slane %v7814_v8, %v6416_v9  ;;  %v1406_v52 = vrot.slane %v1278_v58, %v6416_v9  ;;  %v6629_v53 = vadd.f32 %v6433_v37, %v6418_v27  ;;  %v6633_v38 = vadd.f32 %v7817_v61, %v7816_v10  ;;  %v4805_v11 = vpop.f32.mrf.mxu1  ;;  %5082 = vmatmul.mubr.bf16.gmra.mxu1 %v1476_v62  ;;  %v6677_v60 = vpop.f32.mrf.mxu0 }
 0x1fc   :  { %v1484_v36 = vpack.c.bf16 %v1466_v4, %v1465_v59  ;;  %v1485_v47 = vpack.c.bf16 %v1468_v3, %v1467_v29  ;;  %v6637_v2 = vadd.f32 %v7820_v19, %v7819_v46  ;;  %v6641_v56 = vadd.f32 %v6500_v28, %v7822_v26  ;;  %5085 = vmatprep.mubr.bf16.mxu1 %v1477_v6 }
 0x1fd   :  { %v1469_v24 = vmul.f32 %v6389_v55, %v1402_v1  ;;  %7815 = vst [vmem:[#allocation50_spill] sm:$0xff] %v6629_v53  ;;  %7818 = vst [vmem:[#allocation45_spill] sm:$0xff] %v6633_v38  ;;  %v1470_v55 = vmul.f32 %v7824_v22, %v1406_v52  ;;  %v6646_v27 = vadd.f32 %v6515_v12, %v6507_v50  ;;  %v4807_v7 = vpop.f32.mrf.mxu1  ;;  %v6679_v20 = vpop.f32.mrf.mxu0  ;;  %vm2041_vm2 = vcmp.gt.f32.partialorder %v6675_v15, 0.0 }
 0x1fe   :  { %7821 = vst [vmem:[#allocation46_spill] sm:$0xff] %v6637_v2  ;;  %7823 = vst [vmem:[#allocation47_spill] sm:$0xff] %v6641_v56  ;;  %v6649_v37 = vadd.f32 %v4796_v16, %v6526_v5  ;;  %v6651_v48 = vadd.f32 %v4799_v39, %v4798_v17  ;;  %v6653_v14 = vadd.f32 %v4802_v54, %v4801_v41  ;;  %vm2039_vm3 = vcmp.gt.f32.partialorder %v6677_v60, 0.0 }
 0x1ff   :  { %7825 = vst [vmem:[#allocation48_spill] sm:$0xff] %v6646_v27  ;;  %v6655_v32 = vadd.f32 %v4805_v11, %v4804_v18  ;;  %v1486_v28 = vpack.c.bf16 %v1470_v55, %v1469_v24  ;;  %v4808_v40 = vpop.f32.mrf.mxu1  ;;  %7840 = vst [vmem:[#allocation63_spill] sm:$0xff] %v6677_v60  ;;  %v6681_v54 = vpop.f32.mrf.mxu0  ;;  %vm2042_vm4 = vcmp.gt.f32.partialorder %v6679_v20, 0.0  ;;  %v7849_v55 = vld [vmem:[#allocation26_spill] sm:$0xff] }
 0x200   :  { %7826 = vst [vmem:[#allocation49_spill] sm:$0xff] %v6649_v37  ;;  %7827 = vst [vmem:[#allocation41_spill] sm:$0xff] %v6651_v48  ;;  %v6657_v43 = vadd.f32 %v4808_v40, %v4807_v7  ;;  %vm2040_vm5 = vcmp.gt.f32.partialorder %v6681_v54, 0.0  ;;  %v7850_v7 = vld [vmem:[#allocation27_spill] sm:$0xff]  ;;  %v7852_v40 = vld [vmem:[#allocation29_spill] sm:$0xff] }
 0x201   :  { %7828 = vst [vmem:[#allocation51_spill] sm:$0xff] %v6653_v14  ;;  %7829 = vst [vmem:[#allocation52_spill] sm:$0xff] %v6655_v32  ;;  %v4810_v13 = vpop.f32.mrf.mxu1  ;;  %v6683_v59 = vpop.f32.mrf.mxu0 }
 0x202   :  { %7830 = vst [vmem:[#allocation53_spill] sm:$0xff] %v6657_v43  ;;  %7841 = vst [vmem:[#allocation64_spill] sm:$0xff] %v6679_v20  ;;  %vm2045_vm6 = vcmp.gt.f32.partialorder %v6683_v59, 0.0 }
 0x203   :  { %v4811_v34 = vpop.f32.mrf.mxu1  ;;  %5086 = vmatmul.mubr.bf16.gmra.mxu1 %v1478_v31  ;;  %7842 = vst [vmem:[#allocation65_spill] sm:$0xff] %v6681_v54  ;;  %7843 = vst [vmem:[#allocation66_spill] sm:$0xff] %v6683_v59  ;;  %v6685_v4 = vpop.f32.mrf.mxu0 }
 0x204   :  { %v6659_v50 = vadd.f32 %v4811_v34, %v4810_v13  ;;  %5089 = vmatprep.mubr.bf16.mxu1 %v1479_v63  ;;  %7844 = vst [vmem:[#allocation67_spill] sm:$0xff] %v6685_v4  ;;  %v7853_v13 = vld [vmem:[#allocation30_spill] sm:$0xff]  ;;  %vm2043_vm7 = vcmp.gt.f32.partialorder %v6685_v4, 0.0 }
 0x205   :  { %v4813_v12 = vpop.f32.mrf.mxu1  ;;  %v6687_v58 = vpop.f32.mrf.mxu0  ;;  %v6717_v34 = vadd.f32 %v7853_v13, %v7852_v40 }
 0x206   :  { %7831 = vst [vmem:[#allocation54_spill] sm:$0xff] %v6659_v50  ;;  %7845 = vst [vmem:[#allocation68_spill] sm:$0xff] %v6687_v58  ;;  %vm2046_vm8 = vcmp.gt.f32.partialorder %v6687_v58, 0.0 }
 0x207   :  { %v4814_v5 = vpop.f32.mrf.mxu1  ;;  %v6691_v1 = vpop.f32.mrf.mxu0  ;;  %7854 = vst [vmem:[#allocation27_spill] sm:$0xff] %v6717_v34 }
 0x208   :  { %v6661_v16 = vadd.f32 %v4814_v5, %v4813_v12  ;;  %7846 = vst [vmem:[#allocation69_spill] sm:$0xff] %v6691_v1  ;;  %v7855_v12 = vld [vmem:[#allocation31_spill] sm:$0xff]  ;;  %v7856_v5 = vld [vmem:[#allocation32_spill] sm:$0xff]  ;;  %vm2044_vm9 = vcmp.gt.f32.partialorder %v6691_v1, 0.0 }
 0x209   :  { %v4816_v62 = vpop.f32.mrf.mxu1  ;;  %v6696_v3 = vpop.f32.mrf.mxu0 }
 0x20a   :  { %7832 = vst [vmem:[#allocation55_spill] sm:$0xff] %v6661_v16  ;;  %7847 = vst [vmem:[#allocation70_spill] sm:$0xff] %v6696_v3  ;;  %vm2049_vm10 = vcmp.gt.f32.partialorder %v6696_v3, 0.0 }
 0x20b   :  { %v4817_v17 = vpop.f32.mrf.mxu1  ;;  %5090 = vmatmul.mubr.bf16.gmra.mxu1 %v1480_v49  ;;  %v6706_v46 = vpop.f32.mrf.mxu0 }
 0x20c   :  { %v6663_v39 = vadd.f32 %v4817_v17, %v4816_v62  ;;  %5093 = vmatprep.mubr.bf16.mxu1 %v1481_v57  ;;  %7848 = vst [vmem:[#allocation71_spill] sm:$0xff] %v6706_v46  ;;  %v6721_v62 = vadd.f32 %v7856_v5, %v7855_v12  ;;  %vm2047_vm11 = vcmp.gt.f32.partialorder %v6706_v46, 0.0 }
 0x20d   :  { %v4819_v6 = vpop.f32.mrf.mxu1 }
 0x20e   :  { %7833 = vst [vmem:[#allocation56_spill] sm:$0xff] %v6663_v39  ;;  %7857 = vst [vmem:[#allocation29_spill] sm:$0xff] %v6721_v62 }
 0x20f   :  { %v4820_v25 = vpop.f32.mrf.mxu1 }
 0x210   :  { %v6665_v42 = vadd.f32 %v4820_v25, %v4819_v6 }
 0x211   :  { %v4822_v33 = vpop.f32.mrf.mxu1 }
 0x212   :  { %7834 = vst [vmem:[#allocation57_spill] sm:$0xff] %v6665_v42 }
 0x213   :  { %v4823_v30 = vpop.f32.mrf.mxu1  ;;  %5094 = vmatmul.mubr.bf16.gmra.mxu1 %v1482_v21 }
 0x214   :  { %v6667_v41 = vadd.f32 %v4823_v30, %v4822_v33  ;;  %5097 = vmatprep.mubr.bf16.mxu1 %v1483_v23 }
 0x215   :  { %v4825_v31 = vpop.f32.mrf.mxu1 }
 0x216   :  { %7835 = vst [vmem:[#allocation58_spill] sm:$0xff] %v6667_v41 }
 0x217   :  { %v4826_v63 = vpop.f32.mrf.mxu1 }
 0x218   :  { %v6669_v51 = vadd.f32 %v4826_v63, %v4825_v31  ;;  %v7858_v63 = vld [vmem:[#allocation33_spill] sm:$0xff] }
 0x219   :  { %v4828_v0 = vpop.f32.mrf.mxu1 }
 0x21a   :  { %7836 = vst [vmem:[#allocation59_spill] sm:$0xff] %v6669_v51 }
 0x21b   :  { %v4829_v45 = vpop.f32.mrf.mxu1  ;;  %5098 = vmatmul.mubr.bf16.gmra.mxu1 %v1484_v36 }
 0x21c   :  { %v6671_v35 = vadd.f32 %v4829_v45, %v4828_v0  ;;  %5101 = vmatprep.mubr.bf16.mxu1 %v1485_v47  ;;  %v7859_v0 = vld [vmem:[#allocation34_spill] sm:$0xff] }
 0x21d   :  { %v4831_v49 = vpop.f32.mrf.mxu1  ;;  %v6729_v45 = vadd.f32 %v7859_v0, %v7858_v63 }
 0x21e   :  { %7837 = vst [vmem:[#allocation60_spill] sm:$0xff] %v6671_v35 }
 0x21f   :  { %v4832_v57 = vpop.f32.mrf.mxu1  ;;  %7860 = vst [vmem:[#allocation30_spill] sm:$0xff] %v6729_v45 }
 0x220   :  { %v6673_v44 = vadd.f32 %v4832_v57, %v4831_v49  ;;  %v6735_v57 = vpop.f32.mrf.mxu0 }
 0x221   :  { %v6689_v8 = vpop.f32.mrf.mxu1  ;;  %7861 = vst [vmem:[#allocation31_spill] sm:$0xff] %v6735_v57  ;;  %vm2050_vm12 = vcmp.gt.f32.partialorder %v6735_v57, 0.0 }
 0x222   :  { %7838 = vst [vmem:[#allocation61_spill] sm:$0xff] %v6673_v44  ;;  %v6749_v5 = vpop.f32.mrf.mxu0 }
 0x223   :  { %5102 = vmatmul.mubr.bf16.gmra.mxu1 %v1486_v28  ;;  %v6693_v21 = vpop.f32.mrf.mxu1  ;;  %v6713_v28 = vadd.f32 %v7850_v7, %v7849_v55  ;;  %7862 = vst [vmem:[#allocation32_spill] sm:$0xff] %v6749_v5  ;;  %vm2048_vm13 = vcmp.gt.f32.partialorder %v6749_v5, 0.0 }
 0x225   :  { %7851 = vst [vmem:[#allocation26_spill] sm:$0xff] %v6713_v28 }
 0x2ab   :  { %v5075_v23 = vpop.f32.mrf.mxu1 }
 0x2ac   :  { %v2073_v29 = vsel %vm2041_vm2, %v5075_v23, -3.4028235e+38 }
 0x2ad   :  { %v2115_v18 = vrot.slane %v2073_v29, 4  ;;  %v1585_v36 = vpop.f32.mrf.mxu1 }
 0x2ae   :  { %v6699_v52 = vsel %vm2039_vm3, %v1585_v36, -3.4028235e+38 }
 0x2af   :  { %v2116_v24 = vmax.f32 %v2073_v29, %v2115_v18  ;;  %v2103_v47 = vrot.slane %v6699_v52, 4  ;;  %v5076_v10 = vpop.f32.mrf.mxu1 }
 0x2b0   :  { %v6703_v61 = vsel %vm2042_vm4, %v5076_v10, -3.4028235e+38 }
 0x2b1   :  { %v2117_v19 = vrot.slane %v2116_v24, 2  ;;  %v2104_v26 = vmax.f32 %v6699_v52, %v2103_v47  ;;  %v2121_v11 = vrot.slane %v6703_v61, 4  ;;  %v1588_v22 = vpop.f32.mrf.mxu1 }
 0x2b2   :  { %v6723_v17 = vsel %vm2040_vm5, %v1588_v22, -3.4028235e+38 }
 0x2b3   :  { %v2118_v6 = vmax.f32 %v2116_v24, %v2117_v19  ;;  %v2105_v25 = vrot.slane %v2104_v26, 2  ;;  %v2122_v33 = vmax.f32 %v6703_v61, %v2121_v11  ;;  %v2109_v30 = vrot.slane %v6723_v17, 4  ;;  %v5079_v31 = vpop.f32.mrf.mxu1 }
 0x2b4   :  { %v6731_v49 = vsel %vm2045_vm6, %v5079_v31, -3.4028235e+38 }
 0x2b5   :  { %v2119_v23 = vrot.slane %v2118_v6, 1  ;;  %v2106_v18 = vmax.f32 %v2104_v26, %v2105_v25  ;;  %v2123_v36 = vrot.slane %v2122_v33, 2  ;;  %v2110_v24 = vmax.f32 %v6723_v17, %v2109_v30  ;;  %v1601_v47 = vpop.f32.mrf.mxu1 }
 0x2b6   :  { %v2139_v10 = vrot.slane %v6731_v49, 4  ;;  %v6739_v19 = vsel %vm2043_vm7, %v1601_v47, -3.4028235e+38 }
 0x2b7   :  { %v2120_v11 = vmax.f32 %v2118_v6, %v2119_v23  ;;  %v2107_v22 = vrot.slane %v2106_v18, 1  ;;  %v2124_v55 = vmax.f32 %v2122_v33, %v2123_v36  ;;  %v2111_v7 = vrot.slane %v2110_v24, 2  ;;  %v5080_v40 = vpop.f32.mrf.mxu1 }
 0x2b8   :  { %v2140_v13 = vmax.f32 %v6731_v49, %v2139_v10  ;;  %v2127_v26 = vrot.slane %v6739_v19, 4  ;;  %v6747_v12 = vsel %vm2046_vm8, %v5080_v40, -3.4028235e+38 }
 0x2b9   :  { %v2297_v25 = vsub.f32 %v2073_v29, %v2120_v11  ;;  %v2108_v30 = vmax.f32 %v2106_v18, %v2107_v22  ;;  %v2125_v31 = vrot.slane %v2124_v55, 1  ;;  %v2112_v6 = vmax.f32 %v2110_v24, %v2111_v7  ;;  %v1604_v63 = vpop.f32.mrf.mxu1 }
 0x2ba   :  { %v2141_v33 = vrot.slane %v2140_v13, 2  ;;  %v2128_v0 = vmax.f32 %v6739_v19, %v2127_v26  ;;  %v2145_v23 = vrot.slane %v6747_v12, 4  ;;  %v6756_v36 = vsel %vm2044_vm9, %v1604_v63, -3.4028235e+38  ;;  %v6762_v26 = vpop.f32.mrf.mxu0 }
 0x2bb   :  { %v2331_v47 = vmul.f32 1.442695, %v2297_v25  ;;  %v2295_v10 = vsub.f32 %v6699_v52, %v2108_v30  ;;  %v2126_v40 = vmax.f32 %v2124_v55, %v2125_v31  ;;  %v2113_v29 = vrot.slane %v2112_v6, 1  ;;  %v5083_v18 = vpop.f32.mrf.mxu1  ;;  %7863 = vst [vmem:[#allocation33_spill] sm:$0xff] %v6762_v26 }
 0x2bc   :  { %v2142_v11 = vmax.f32 %v2140_v13, %v2141_v33  ;;  %v2129_v24 = vrot.slane %v2128_v0, 2  ;;  %v2146_v22 = vmax.f32 %v6747_v12, %v2145_v23  ;;  %v2133_v7 = vrot.slane %v6756_v36, 4 }
 0x2bd   :  { %5539 = vpow2.f32 %v2331_v47  ;;  %v2327_v63 = vmul.f32 1.442695, %v2295_v10  ;;  %v2298_v9 = vsub.f32 %v6703_v61, %v2126_v40  ;;  %v2114_v25 = vmax.f32 %v2112_v6, %v2113_v29  ;;  %v1617_v44 = vpop.f32.mrf.mxu1  ;;  %v6773_v29 = vpop.f32.mrf.mxu0 }
 0x2be   :  { %vm2053_vm14 = vcmp.gt.f32.partialorder %v6762_v26, 0.0  ;;  %v2143_v52 = vrot.slane %v2142_v11, 1  ;;  %v2130_v55 = vmax.f32 %v2128_v0, %v2129_v24  ;;  %v2147_v13 = vrot.slane %v2146_v22, 2  ;;  %7864 = vst [vmem:[#allocation34_spill] sm:$0xff] %v6773_v29 }
 0x2bf   :  { %v2134_v30 = vmax.f32 %v6756_v36, %v2133_v7  ;;  %5541 = vpow2.f32 %v2327_v63  ;;  %v2333_v31 = vmul.f32 1.442695, %v2298_v9  ;;  %v2296_v33 = vsub.f32 %v6723_v17, %v2114_v25  ;;  %v5084_v47 = vpop.f32.mrf.mxu1  ;;  %v6789_v51 = vpop.f32.mrf.mxu0 }
 0x2c0   :  { %v6771_v23 = vsel %vm2049_vm10, %v5083_v18, -3.4028235e+38  ;;  %v2144_v10 = vmax.f32 %v2142_v11, %v2143_v52  ;;  %v2131_v61 = vrot.slane %v2130_v55, 1  ;;  %v2148_v6 = vmax.f32 %v2146_v22, %v2147_v13  ;;  %7865 = vst [vmem:[#allocation72_spill] sm:$0xff] %v6789_v51 }
 0x2c1   :  { %v2135_v40 = vrot.slane %v2134_v30, 2  ;;  %5543 = vpow2.f32 %v2333_v31  ;;  %v2329_v0 = vmul.f32 1.442695, %v2296_v33  ;;  %v2163_v24 = vrot.slane %v6771_v23, 4  ;;  %v1620_v17 = vpop.f32.mrf.mxu1 }
 0x2c2   :  { %v6778_v9 = vsel %vm2047_vm11, %v1617_v44, -3.4028235e+38  ;;  %vm2051_vm15 = vcmp.gt.f32.partialorder %v6773_v29, 0.0  ;;  %v2301_v18 = vsub.f32 %v6731_v49, %v2144_v10  ;;  %v2132_v7 = vmax.f32 %v2130_v55, %v2131_v61 }
 0x2c3   :  { %v2149_v11 = vrot.slane %v2148_v6, 1  ;;  %v2136_v63 = vmax.f32 %v2134_v30, %v2135_v40  ;;  %5545 = vpow2.f32 %v2329_v0  ;;  %v2164_v22 = vmax.f32 %v6771_v23, %v2163_v24  ;;  %v5087_v13 = vpop.f32.mrf.mxu1 }
 0x2c4   :  { %v2151_v25 = vrot.slane %v6778_v9, 4  ;;  %v6786_v52 = vsel %vm2050_vm12, %v5084_v47, -3.4028235e+38  ;;  %v2339_v44 = vmul.f32 1.442695, %v2301_v18  ;;  %v2299_v31 = vsub.f32 %v6739_v19, %v2132_v7 }
 0x2c5   :  { %v2150_v33 = vmax.f32 %v2148_v6, %v2149_v11  ;;  %v2137_v35 = vrot.slane %v2136_v63, 1  ;;  %v2165_v49 = vrot.slane %v2164_v22, 2  ;;  %v2169_v30 = vrot.slane %v6786_v52, 4  ;;  %v1633_v18 = vpop.f32.mrf.mxu1 }
 0x2c6   :  { %v2152_v55 = vmax.f32 %v6778_v9, %v2151_v25  ;;  %v6795_v10 = vsel %vm2048_vm13, %v1620_v17, -3.4028235e+38  ;;  %5547 = vpow2.f32 %v2339_v44  ;;  %v2335_v47 = vmul.f32 1.442695, %v2299_v31  ;;  %v6805_v25 = vpop.f32.mrf.mxu0 }
 0x2c7   :  { %v2302_v61 = vsub.f32 %v6747_v12, %v2150_v33  ;;  %v2138_v40 = vmax.f32 %v2136_v63, %v2137_v35  ;;  %v2166_v0 = vmax.f32 %v2164_v22, %v2165_v49  ;;  %v2170_v6 = vmax.f32 %v6786_v52, %v2169_v30  ;;  %7866 = vst [vmem:[#allocation73_spill] sm:$0xff] %v6805_v25 }
 0x2c8   :  { %v2153_v19 = vrot.slane %v2152_v55, 2  ;;  %v2157_v24 = vrot.slane %v6795_v10, 4  ;;  %5549 = vpow2.f32 %v2335_v47  ;;  %v6803_v17 = vsel %vm2053_vm14, %v5087_v13, -3.4028235e+38 }
 0x2c9   :  { %v2341_v7 = vmul.f32 1.442695, %v2302_v61  ;;  %v2300_v11 = vsub.f32 %v6756_v36, %v2138_v40  ;;  %v2167_v44 = vrot.slane %v2166_v0, 1  ;;  %v2171_v35 = vrot.slane %v2170_v6, 2 }
 0x2ca   :  { %v2154_v12 = vmax.f32 %v2152_v55, %v2153_v19  ;;  %v2158_v63 = vmax.f32 %v6795_v10, %v2157_v24  ;;  %v6808_v22 = vpop.eup %5539  ;;  %v2187_v33 = vrot.slane %v6803_v17, 4  ;;  %v6813_v36 = vsel %vm2051_vm15, %v1633_v18, -3.4028235e+38  ;;  %v6823_v24 = vpop.f32.mrf.mxu0 }
 0x2cb   :  { %5551 = vpow2.f32 %v2341_v7  ;;  %v2337_v31 = vmul.f32 1.442695, %v2300_v11  ;;  %v2403_v13 = vrot.slane %v6808_v22, 4  ;;  %v2168_v49 = vmax.f32 %v2166_v0, %v2167_v44 }
 0x2cc   :  { %v2155_v30 = vrot.slane %v2154_v12, 1  ;;  %v2172_v47 = vmax.f32 %v2170_v6, %v2171_v35  ;;  %v6816_v61 = vpop.eup %5541  ;;  %v6820_v55 = vadd.f32 %v6693_v21, %v6689_v8  ;;  %v2159_v40 = vrot.slane %v2158_v63, 2  ;;  %v6828_v6 = vpop.f32.mrf.mxu1 }
 0x2cd   :  { %5553 = vpow2.f32 %v2337_v31  ;;  %v2188_v19 = vmax.f32 %v6803_v17, %v2187_v33  ;;  %v2404_v18 = vadd.f32 %v6808_v22, %v2403_v13  ;;  %v2391_v7 = vrot.slane %v6816_v61, 4  ;;  %v5450_v33 = vld [vmem:[#allocation10 + $0x30] sm:$0xff]  }
 0x2ce   :  { %7867 = vst [vmem:[#allocation74_spill] sm:$0xff] %v6820_v55  ;;  %v2305_v0 = vsub.f32 %v6771_v23, %v2168_v49  ;;  %v2156_v11 = vmax.f32 %v2154_v12, %v2155_v30  ;;  %v6830_v44 = vpop.eup %5543  ;;  %v2173_v35 = vrot.slane %v2172_v47, 1  ;;  %v2160_v8 = vmax.f32 %v2158_v63, %v2159_v40  ;;  %v5449_v55 = vld [vmem:[#allocation10 + $0x38] sm:$0xff]   ;;  %v6840_v63 = vpop.f32.mrf.mxu0 }
 0x2cf   :  { %v2189_v21 = vrot.slane %v2188_v19, 2  ;;  %v2175_v31 = vrot.slane %v6813_v36, 4  ;;  %v2405_v41 = vrot.slane %v2404_v18, 2  ;;  %v2392_v42 = vadd.f32 %v6816_v61, %v2391_v7  ;;  %5139 = vmatprep.subr.bf16.mxu1 %v5449_v55  ;;  %v6844_v32 = vpop.f32.mrf.mxu1 }
 0x2d0   :  { %v2409_v13 = vrot.slane %v6830_v44, 4  ;;  %v2347_v16 = vmul.f32 1.442695, %v2305_v0  ;;  %v6835_v39 = vpop.eup %5545  ;;  %v2303_v23 = vsub.f32 %v6778_v9, %v2156_v11  ;;  %v2174_v12 = vmax.f32 %v2172_v47, %v2173_v35  ;;  %5140 = vmatpush3.bf16.msra.mxu1 %v5449_v55 }
 0x2d1   :  { %v2161_v49 = vrot.slane %v2160_v8, 1  ;;  %v6838_v30 = vmax.f32 %v2188_v19, %v2189_v21  ;;  %v2406_v40 = vadd.f32 %v2405_v41, %v2404_v18  ;;  %v2393_v50 = vrot.slane %v2392_v42, 2  ;;  %5141 = vmatprep.subr.bf16.mxu1 %v5450_v33  ;;  %v5451_v19 = vld [vmem:[#allocation10 + $0x28] sm:$0xff]  }
 0x2d2   :  { %v2410_v43 = vadd.f32 %v6830_v44, %v2409_v13  ;;  %v2397_v7 = vrot.slane %v6835_v39, 4  ;;  %5555 = vpow2.f32 %v2347_v16  ;;  %v2343_v0 = vmul.f32 1.442695, %v2303_v23  ;;  %v6853_v23 = vpop.f32.mrf.mxu0 }
 0x2d3   :  { %v2306_v9 = vsub.f32 %v6786_v52, %v2174_v12  ;;  %v2162_v47 = vmax.f32 %v2160_v8, %v2161_v49  ;;  %v6847_v11 = vpop.eup %5547  ;;  %v2407_v35 = vrot.slane %v2406_v40, 1  ;;  %v2394_v21 = vadd.f32 %v2393_v50, %v2392_v42  ;;  %7869 = vst [vmem:[#allocation76_spill] sm:$0xff] %v6853_v23  ;;  %v5091_v50 = vpop.f32.mrf.mxu1 }
 0x2d4   :  { %7868 = vst [vmem:[#allocation75_spill] sm:$0xff] %v6847_v11  ;;  %v2411_v41 = vrot.slane %v2410_v43, 2  ;;  %v2398_v18 = vadd.f32 %v6835_v39, %v2397_v7  ;;  %vm2054_vm2 = vcmp.gt.f32.partialorder %v6789_v51, 0.0  ;;  %v2427_v13 = vrot.slane %v6847_v11, 4  ;;  %5142 = vmatpush3.bf16.msra.mxu1 %v5450_v33 }
 0x2d5   :  { %5557 = vpow2.f32 %v2343_v0  ;;  %v2349_v55 = vmul.f32 1.442695, %v2306_v9  ;;  %v2304_v16 = vsub.f32 %v6795_v10, %v2162_v47  ;;  %v6855_v52 = vpop.eup %5549  ;;  %v2408_v8 = vadd.f32 %v2407_v35, %v2406_v40  ;;  %5143 = vmatprep.subr.bf16.mxu1 %v5451_v19  ;;  %v5452_v0 = vld [vmem:[#allocation10 + $0x20] sm:$0xff]  }
 0x2d6   :  { %v2395_v12 = vrot.slane %v2394_v21, 1  ;;  %v2412_v49 = vadd.f32 %v2411_v41, %v2410_v43  ;;  %v2399_v14 = vrot.slane %v2398_v18, 2  ;;  %v2428_v42 = vadd.f32 %v6847_v11, %v2427_v13  ;;  %v6864_v41 = vpop.f32.mrf.mxu0 }
 0x2d7   :  { %v2415_v7 = vrot.slane %v6855_v52, 4  ;;  %5559 = vpow2.f32 %v2349_v55  ;;  %v2345_v48 = vmul.f32 1.442695, %v2304_v16  ;;  %v2176_v40 = vmax.f32 %v6813_v36, %v2175_v31  ;;  %7871 = vst [vmem:[#allocation78_spill] sm:$0xff] %v6864_v41 }
 0x2d8   :  { %v6859_v9 = vpop.eup %5551  ;;  %v2396_v10 = vadd.f32 %v2395_v12, %v2394_v21  ;;  %v2413_v47 = vrot.slane %v2412_v49, 1  ;;  %v2400_v37 = vadd.f32 %v2399_v14, %v2398_v18  ;;  %v2429_v35 = vrot.slane %v2428_v42, 2  ;;  %v6870_v21 = vpop.f32.mrf.mxu1  ;;  %5144 = vmatpush3.bf16.msra.mxu1 %v5451_v19 }
 0x2d9   :  { %7870 = vst [vmem:[#allocation77_spill] sm:$0xff] %v6859_v9  ;;  %v2416_v43 = vadd.f32 %v6855_v52, %v2415_v7  ;;  %v2433_v33 = vrot.slane %v6859_v9, 4  ;;  %5561 = vpow2.f32 %v2345_v48  ;;  %v2191_v16 = vrot.slane %v6838_v30, 1  ;;  %5145 = vmatprep.subr.bf16.mxu1 %v5452_v0  ;;  %v5453_v48 = vld [vmem:[#allocation10 + $0x18] sm:$0xff]   ;;  %v6886_v38 = vpop.f32.mrf.mxu0 }
 0x2da   :  { %v6866_v13 = vpop.eup %5553  ;;  %5563 = vrcp.f32 %v2408_v8  ;;  %v2401_v55 = vrot.slane %v2400_v37, 1  ;;  %vm2052_vm3 = vcmp.gt.f32.partialorder %v6805_v25, 0.0  ;;  %vm2057_vm4 = vcmp.gt.f32.partialorder %v6823_v24, 0.0  ;;  %7873 = vst [vmem:[#allocation80_spill] sm:$0xff] %v6886_v38 }
 0x2db   :  { %7872 = vst [vmem:[#allocation79_spill] sm:$0xff] %v6866_v13  ;;  %5565 = vrcp.f32 %v2396_v10  ;;  %v2417_v14 = vrot.slane %v2416_v43, 2  ;;  %v2421_v31 = vrot.slane %v6866_v13, 4  ;;  %v2414_v18 = vadd.f32 %v2413_v47, %v2412_v49  ;;  %v6890_v47 = vpop.f32.mrf.mxu1 }
 0x2dc   :  { %v6874_v12 = vadd.f32 %v2429_v35, %v2428_v42  ;;  %v2192_v8 = vmax.f32 %v6838_v30, %v2191_v16  ;;  %v2177_v7 = vrot.slane %v2176_v40, 2  ;;  %v6878_v56 = vadd.f32 %v6859_v9, %v2433_v33  ;;  %5146 = vmatpush3.bf16.msra.mxu1 %v5452_v0 }
 0x2dd   :  { %v2418_v27 = vadd.f32 %v2417_v14, %v2416_v43  ;;  %v2422_v19 = vadd.f32 %v6866_v13, %v2421_v31  ;;  %v6884_v10 = vsel %vm2054_vm2, %v6828_v6, -3.4028235e+38  ;;  %v2402_v2 = vadd.f32 %v2401_v55, %v2400_v37  ;;  %5147 = vmatprep.subr.bf16.mxu1 %v5453_v48  ;;  %v6908_v31 = vpop.f32.mrf.mxu0 }
 0x2de   :  { %v2309_v49 = vsub.f32 %v6803_v17, %v2192_v8  ;;  %v2178_v42 = vmax.f32 %v2176_v40, %v2177_v7  ;;  %v2193_v30 = vrot.slane %v6884_v10, 4  ;;  %v6895_v33 = vsel %vm2052_vm3, %v6844_v32, -3.4028235e+38  ;;  %7874 = vst [vmem:[#allocation81_spill] sm:$0xff] %v6908_v31 }
 0x2df   :  { %v2419_v35 = vrot.slane %v2418_v27, 1  ;;  %v2423_v43 = vrot.slane %v2422_v19, 2  ;;  %v6899_v6 = vsel %vm2057_vm4, %v5091_v50, -3.4028235e+38  ;;  %v6901_v37 = vpop.eup %5555  ;;  %v2181_v0 = vrot.slane %v6895_v33, 4 }
 0x2e0   :  { %v2355_v17 = vmul.f32 1.442695, %v2309_v49  ;;  %v2179_v40 = vrot.slane %v2178_v42, 1  ;;  %v2194_v55 = vmax.f32 %v6884_v10, %v2193_v30  ;;  %5567 = vrcp.f32 %v2414_v18  ;;  %v6913_v30 = vpop.f32.mrf.mxu1  ;;  %5148 = vmatpush3.bf16.msra.mxu1 %v5453_v48  ;;  %v6925_v48 = vpop.f32.mrf.mxu0 }
 0x2e1   :  { %v2420_v16 = vadd.f32 %v2419_v35, %v2418_v27  ;;  %v2451_v14 = vrot.slane %v6901_v37, 4  ;;  %v2211_v32 = vrot.slane %v6899_v6, 4  ;;  %vm2055_vm5 = vcmp.gt.f32.partialorder %v6840_v63, 0.0  ;;  %7875 = vst [vmem:[#allocation82_spill] sm:$0xff] %v6925_v48 }
 0x2e2   :  { %v6910_v50 = vpop.eup %5557  ;;  %5569 = vpow2.f32 %v2355_v17  ;;  %v2180_v8 = vmax.f32 %v2178_v42, %v2179_v40  ;;  %v2195_v7 = vrot.slane %v2194_v55, 2  ;;  %v2182_v49 = vmax.f32 %v6895_v33, %v2181_v0 }
 0x2e3   :  { %5571 = vrcp.f32 %v2402_v2  ;;  %v6915_v27 = vadd.f32 %v2423_v43, %v2422_v19  ;;  %v2452_v18 = vadd.f32 %v6901_v37, %v2451_v14  ;;  %v2439_v35 = vrot.slane %v6910_v50, 4 }
 0x2e4   :  { %v6919_v53 = vpop.eup %5559  ;;  %v2307_v51 = vsub.f32 %v6813_v36, %v2180_v8  ;;  %v2196_v26 = vmax.f32 %v2194_v55, %v2195_v7  ;;  %v2183_v17 = vrot.slane %v2182_v49, 2  ;;  %v2212_v42 = vmax.f32 %v6899_v6, %v2211_v32  ;;  %v6930_v36 = vpop.f32.mrf.mxu1 }
 0x2e5   :  { %5573 = vrcp.f32 %v2420_v16  ;;  %v2453_v40 = vrot.slane %v2452_v18, 2  ;;  %v2440_v0 = vadd.f32 %v6910_v50, %v2439_v35  ;;  %v2457_v2 = vrot.slane %v6919_v53, 4 }
 0x2e6   :  { %v6927_v19 = vpop.eup %5561  ;;  %v2351_v43 = vmul.f32 1.442695, %v2307_v51  ;;  %v2197_v14 = vrot.slane %v2196_v26, 1  ;;  %v2184_v45 = vmax.f32 %v2182_v49, %v2183_v17  ;;  %v2213_v25 = vrot.slane %v2212_v42, 2 }
 0x2e7   :  { %vm2058_vm6 = vcmp.gt.f32.partialorder %v6853_v23, 0.0  ;;  %v6932_v55 = vpop.eup %5563  ;;  %v2454_v16 = vadd.f32 %v2453_v40, %v2452_v18  ;;  %v2441_v32 = vrot.slane %v2440_v0, 2  ;;  %v2458_v8 = vadd.f32 %v6919_v53, %v2457_v2  ;;  %v6941_v40 = vpop.f32.mrf.mxu0 }
 0x2e8   :  { %v2445_v7 = vrot.slane %v6927_v19, 4  ;;  %v6936_v35 = vpop.eup %5565  ;;  %5575 = vpow2.f32 %v2351_v43  ;;  %v2198_v58 = vmax.f32 %v2196_v26, %v2197_v14  ;;  %v2185_v51 = vrot.slane %v2184_v45, 1  ;;  %7876 = vst [vmem:[#allocation83_spill] sm:$0xff] %v6941_v40 }
 0x2e9   :  { %v2214_v59 = vmax.f32 %v2212_v42, %v2213_v25  ;;  %vm2056_vm7 = vcmp.gt.f32.partialorder %v6864_v41, 0.0  ;;  %vm2061_vm8 = vcmp.gt.f32.partialorder %v6886_v38, 0.0  ;;  %v2455_v49 = vrot.slane %v2454_v16, 1  ;;  %v1665_v25 = vpop.f32.mrf.mxu1  ;;  %v5455_v38 = vld [vmem:[#allocation10 + $0x8] sm:$0xff]  }
 0x2ea   :  { %v2442_v17 = vadd.f32 %v2441_v32, %v2440_v0  ;;  %v2459_v9 = vrot.slane %v2458_v8, 2  ;;  %v2446_v18 = vadd.f32 %v6927_v19, %v2445_v7  ;;  %v2310_v2 = vsub.f32 %v6884_v10, %v2198_v58 }
 0x2eb   :  { %v2186_v1 = vmax.f32 %v2184_v45, %v2185_v51  ;;  %v2215_v11 = vrot.slane %v2214_v59, 1  ;;  %v6947_v26 = vsel %vm2055_vm5, %v6870_v21, -3.4028235e+38  ;;  %vm2059_vm9 = vcmp.gt.f32.partialorder %v6908_v31, 0.0 }
 0x2ec   :  { %v2456_v42 = vadd.f32 %v2455_v49, %v2454_v16  ;;  %v2443_v43 = vrot.slane %v2442_v17, 1  ;;  %v2460_v0 = vadd.f32 %v2459_v9, %v2458_v8  ;;  %v2447_v14 = vrot.slane %v2446_v18, 2 }
 0x2ed   :  { %v2357_v32 = vmul.f32 1.442695, %v2310_v2  ;;  %v2308_v7 = vsub.f32 %v6895_v33, %v2186_v1  ;;  %v2216_v62 = vmax.f32 %v2214_v59, %v2215_v11  ;;  %v2199_v58 = vrot.slane %v6947_v26, 4  ;;  %v6955_v34 = vpop.eup %5567  ;;  %v5096_v59 = vpop.f32.mrf.mxu1  ;;  %v5454_v33 = vld [vmem:[#allocation10 + $0x10] sm:$0xff]  }
 0x2ee   :  { %vm2062_vm10 = vcmp.gt.f32.partialorder %v6925_v48, 0.0  ;;  %vm2060_vm11 = vcmp.gt.f32.partialorder %v6941_v40, 0.0  ;;  %v2425_v45 = vrot.slane %v6915_v27, 1  ;;  %v2444_v21 = vadd.f32 %v2443_v43, %v2442_v17  ;;  %v6967_v17 = vpop.f32.mrf.mxu0  ;;  %5149 = vmatprep.subr.bf16.mxu1 %v5454_v33 }
 0x2ef   :  { %v2461_v10 = vrot.slane %v2460_v0, 1  ;;  %v2448_v51 = vadd.f32 %v2447_v14, %v2446_v18  ;;  %5577 = vpow2.f32 %v2357_v32  ;;  %v2353_v9 = vmul.f32 1.442695, %v2308_v7  ;;  %v6959_v11 = vpop.eup %5569  ;;  %7878 = vst [vmem:[#allocation85_spill] sm:$0xff] %v6967_v17  ;;  %5150 = vmatpush3.bf16.msra.mxu1 %v5454_v33 }
 0x2f0   :  { %v2313_v16 = vsub.f32 %v6899_v6, %v2216_v62  ;;  %v2200_v1 = vmax.f32 %v6947_v26, %v2199_v58  ;;  %7877 = vst [vmem:[#allocation84_spill] sm:$0xff] %v6959_v11  ;;  %5579 = vrcp.f32 %v2456_v42  ;;  %v6965_v49 = vsel %vm2058_vm6, %v6890_v47, -3.4028235e+38  ;;  %v6969_v18 = vpop.eup %5571  ;;  %v1668_v58 = vpop.f32.mrf.mxu1  ;;  %5151 = vmatprep.subr.bf16.mxu1 %v5455_v38 }
 0x2f1   :  { %v2462_v8 = vadd.f32 %v2461_v10, %v2460_v0  ;;  %v2449_v2 = vrot.slane %v2448_v51, 1  ;;  %5581 = vpow2.f32 %v2353_v9  ;;  %v6972_v43 = vadd.f32 %v2425_v45, %v6915_v27 }
 0x2f2   :  { %v2363_v62 = vmul.f32 1.442695, %v2313_v16  ;;  %v2201_v6 = vrot.slane %v2200_v1, 2  ;;  %5583 = vrcp.f32 %v2444_v21  ;;  %v2217_v42 = vrot.slane %v6965_v49, 4  ;;  %v6980_v47 = vpop.eup %5573  ;;  %v6994_v21 = vpop.f32.mrf.mxu0 }
 0x2f3   :  { %v6978_v0 = vsel %vm2056_vm7, %v6913_v30, -3.4028235e+38  ;;  %v2475_v14 = vrot.slane %v6959_v11, 4  ;;  %v6988_v45 = vsel %vm2061_vm8, %v6930_v36, -3.4028235e+38  ;;  %7879 = vst [vmem:[#allocation86_spill] sm:$0xff] %v6994_v21  ;;  %v6996_v10 = vadd.f32 %v2449_v2, %v2448_v51  ;;  %5152 = vmatpush3.bf16.msra.mxu1 %v5455_v38 }
 0x2f4   :  { %5585 = vpow2.f32 %v2363_v62  ;;  %v2202_v32 = vmax.f32 %v2200_v1, %v2201_v6  ;;  %v2205_v7 = vrot.slane %v6978_v0, 4  ;;  %v2218_v27 = vmax.f32 %v6965_v49, %v2217_v42  ;;  %v7018_v13 = vpop.f32.mrf.mxu0 }
 0x2f5   :  { %5587 = vrcp.f32 %v2462_v8  ;;  %v6992_v30 = vsel %vm2059_vm9, %v1665_v25, -3.4028235e+38  ;;  %v2235_v1 = vrot.slane %v6988_v45, 4  ;;  %v7000_v8 = vpop.eup %5575  ;;  %v7005_v36 = vsel %vm2062_vm10, %v5096_v59, -3.4028235e+38  ;;  %7881 = vst [vmem:[#allocation88_spill] sm:$0xff] %v7018_v13 }
 0x2f6   :  { %v2203_v9 = vrot.slane %v2202_v32, 1  ;;  %v2206_v16 = vmax.f32 %v6978_v0, %v2205_v7  ;;  %7880 = vst [vmem:[#allocation87_spill] sm:$0xff] %v7000_v8  ;;  %v2219_v62 = vrot.slane %v2218_v27, 2  ;;  %v2223_v6 = vrot.slane %v6992_v30, 4  ;;  %v7030_v46 = vpop.f32.mrf.mxu0 }
 0x2f7   :  { %v7009_v25 = vsel %vm2060_vm11, %v1668_v58, -3.4028235e+38  ;;  %v7012_v51 = vadd.f32 %v6959_v11, %v2475_v14  ;;  %v2463_v2 = vrot.slane %v7000_v8, 4  ;;  %v2236_v23 = vmax.f32 %v6988_v45, %v2235_v1  ;;  %7883 = vst [vmem:[#allocation90_spill] sm:$0xff] %v7030_v46 }
 0x2f8   :  { %v2204_v42 = vmax.f32 %v2202_v32, %v2203_v9  ;;  %v2207_v7 = vrot.slane %v2206_v16, 2  ;;  %v2220_v31 = vmax.f32 %v2218_v27, %v2219_v62  ;;  %v2224_v48 = vmax.f32 %v6992_v30, %v2223_v6  ;;  %v7023_v32 = vpop.f32.mrf.mxu1 }
 0x2f9   :  { %v2241_v59 = vrot.slane %v7005_v36, 4  ;;  %v2464_v58 = vadd.f32 %v7000_v8, %v2463_v2  ;;  %v2229_v11 = vrot.slane %v7009_v25, 4  ;;  %v2237_v27 = vrot.slane %v2236_v23, 2 }
 0x2fa   :  { %v2311_v14 = vsub.f32 %v6947_v26, %v2204_v42  ;;  %v2208_v40 = vmax.f32 %v2206_v16, %v2207_v7  ;;  %v2221_v9 = vrot.slane %v2220_v31, 1  ;;  %v2225_v62 = vrot.slane %v2224_v48, 2  ;;  %v5456_v26 = vld [vmem:[#allocation10] sm:$0xff]   ;;  %v1681_v5 = vpop.f32.mrf.mxu1 }
 0x2fb   :  { %v2242_v1 = vmax.f32 %v7005_v36, %v2241_v59  ;;  %vm2065_vm12 = vcmp.gt.f32.partialorder %v6967_v17, 0.0  ;;  %v2477_v6 = vrot.slane %v7012_v51, 2  ;;  %v2465_v28 = vrot.slane %v2464_v58, 2  ;;  %5153 = vmatprep.subr.bf16.mxu1 %v5456_v26 }
 0x2fc   :  { %v2359_v2 = vmul.f32 1.442695, %v2311_v14  ;;  %v2209_v29 = vrot.slane %v2208_v40, 1  ;;  %v7028_v16 = vpop.eup %5577  ;;  %v2222_v42 = vmax.f32 %v2220_v31, %v2221_v9  ;;  %v2238_v7 = vmax.f32 %v2236_v23, %v2237_v27  ;;  %5154 = vmatpush3.bf16.msra.mxu1 %v5456_v26 }
 0x2fd   :  { %7882 = vst [vmem:[#allocation89_spill] sm:$0xff] %v7028_v16  ;;  %v2226_v57 = vmax.f32 %v2224_v48, %v2225_v62  ;;  %v2243_v3 = vrot.slane %v2242_v1, 2  ;;  %v7032_v4 = vpop.eup %5579  ;;  %v2466_v59 = vadd.f32 %v2465_v28, %v2464_v58  ;;  %v2230_v20 = vmax.f32 %v7009_v25, %v2229_v11 }
 0x2fe   :  { %5589 = vpow2.f32 %v2359_v2  ;;  %v2210_v33 = vmax.f32 %v2208_v40, %v2209_v29  ;;  %vm2063_vm13 = vcmp.gt.f32.partialorder %v6994_v21, 0.0  ;;  %v7036_v14 = vpop.eup %5581  ;;  %v2314_v15 = vsub.f32 %v6965_v49, %v2222_v42 }
 0x2ff   :  { %7884 = vst [vmem:[#allocation91_spill] sm:$0xff] %v7036_v14  ;;  %v2239_v31 = vrot.slane %v2238_v7, 1  ;;  %v2227_v23 = vrot.slane %v2226_v57, 1  ;;  %v2244_v48 = vmax.f32 %v2242_v1, %v2243_v3  ;;  %v7039_v9 = vpop.eup %5583  ;;  %v2467_v27 = vrot.slane %v2466_v59, 1  ;;  %v7047_v3 = vpop.f32.mrf.mxu0 }
 0x300   :  { %v2481_v28 = vrot.slane %v7028_v16, 4  ;;  %v2469_v29 = vrot.slane %v7036_v14, 4  ;;  %v2312_v40 = vsub.f32 %v6978_v0, %v2210_v33  ;;  %vm2066_vm14 = vcmp.gt.f32.partialorder %v7018_v13, 0.0  ;;  %7885 = vst [vmem:[#allocation92_spill] sm:$0xff] %v7047_v3  ;;  %v5100_v33 = vpop.f32.mrf.mxu1 }
 0x301   :  { %v7045_v11 = vpop.eup %5585  ;;  %v2365_v58 = vmul.f32 1.442695, %v2314_v15  ;;  %v2240_v49 = vmax.f32 %v2238_v7, %v2239_v31  ;;  %v2228_v62 = vmax.f32 %v2226_v57, %v2227_v23  ;;  %v2245_v2 = vrot.slane %v2244_v48, 1 }
 0x302   :  { %v7049_v38 = vpop.eup %5587  ;;  %5591 = vrcp.f32 %v6996_v10  ;;  %v7053_v1 = vadd.f32 %v2477_v6, %v7012_v51  ;;  %v2470_v0 = vadd.f32 %v7036_v14, %v2469_v29  ;;  %v2499_v42 = vrot.slane %v7045_v11, 4 }
 0x303   :  { %vm2064_vm15 = vcmp.gt.f32.partialorder %v7030_v46, 0.0  ;;  %vm2069_vm2 = vcmp.gt.f32.partialorder %v7047_v3, 0.0  ;;  %5593 = vpow2.f32 %v2365_v58  ;;  %v2361_v15 = vmul.f32 1.442695, %v2312_v40 }
 0x304   :  { %v2317_v57 = vsub.f32 %v6988_v45, %v2240_v49  ;;  %v2315_v7 = vsub.f32 %v6992_v30, %v2228_v62  ;;  %v7061_v10 = vadd.f32 %v2467_v27, %v2466_v59  ;;  %v7064_v51 = vadd.f32 %v7028_v16, %v2481_v28  ;;  %v1684_v30 = vpop.f32.mrf.mxu1 }
 0x305   :  { %v2500_v6 = vadd.f32 %v7045_v11, %v2499_v42  ;;  %v2246_v31 = vmax.f32 %v2244_v48, %v2245_v2  ;;  %5595 = vpow2.f32 %v2361_v15  ;;  %v2231_v14 = vrot.slane %v2230_v20, 2 }
 0x306   :  { %v2371_v23 = vmul.f32 1.442695, %v2317_v57  ;;  %v2367_v29 = vmul.f32 1.442695, %v2315_v7  ;;  %v2471_v41 = vrot.slane %v2470_v0, 2  ;;  %v5103_v42 = vpop.f32.mrf.mxu1  ;;  %vm3015_vm6 = vcmask 1041409  }
 0x307   :  { %v2501_v58 = vrot.slane %v2500_v6, 2  ;;  %v2318_v40 = vsub.f32 %v7005_v36, %v2246_v31  ;;  %v7071_v45 = vsel %vm2065_vm12, %v7023_v32, -3.4028235e+38  ;;  %v2232_v26 = vmax.f32 %v2230_v20, %v2231_v14 }
 0x308   :  { %5597 = vpow2.f32 %v2371_v23  ;;  %v2259_v59 = vrot.slane %v7071_v45, 4  ;;  %v7076_v48 = vsel %vm2063_vm13, %v1681_v5, -3.4028235e+38  ;;  %v7083_v2 = vsel %vm2066_vm14, %v5100_v33, -3.4028235e+38 }
 0x309   :  { %v2502_v28 = vadd.f32 %v2501_v58, %v2500_v6  ;;  %5599 = vpow2.f32 %v2367_v29  ;;  %v2373_v49 = vmul.f32 1.442695, %v2318_v40  ;;  %v2233_v36 = vrot.slane %v2232_v26, 1 }
 0x30a   :  { %v2260_v62 = vmax.f32 %v7071_v45, %v2259_v59  ;;  %v2247_v32 = vrot.slane %v7076_v48, 4  ;;  %v7085_v20 = vadd.f32 %v2471_v41, %v2470_v0  ;;  %v2265_v5 = vrot.slane %v7083_v2, 4 }
 0x30b   :  { %v2503_v14 = vrot.slane %v2502_v28, 1  ;;  %5601 = vpow2.f32 %v2373_v49  ;;  %v7088_v15 = vpop.eup %5589  ;;  %v2234_v57 = vmax.f32 %v2232_v26, %v2233_v36  ;;  %v7093_v31 = vsel %vm2064_vm15, %v1684_v30, -3.4028235e+38 }
 0x30c   :  { %v2261_v7 = vrot.slane %v2260_v62, 2  ;;  %v2248_v6 = vmax.f32 %v7076_v48, %v2247_v32  ;;  %v2487_v33 = vrot.slane %v7088_v15, 4  ;;  %v2266_v41 = vmax.f32 %v7083_v2, %v2265_v5  ;;  %v7107_v5 = vpop.f32.mrf.mxu0 }
 0x30d   :  { %v2504_v23 = vadd.f32 %v2503_v14, %v2502_v28  ;;  %v2253_v0 = vrot.slane %v7093_v31, 4  ;;  %v2316_v29 = vsub.f32 %v7009_v25, %v2234_v57  ;;  %v7101_v26 = vsel %vm2069_vm2, %v5103_v42, -3.4028235e+38  ;;  %7886 = vst [vmem:[#allocation93_spill] sm:$0xff] %v7107_v5 }
 0x30e   :  { %v2262_v58 = vmax.f32 %v2260_v62, %v2261_v7  ;;  %v2249_v40 = vrot.slane %v2248_v6, 2  ;;  %v2488_v59 = vadd.f32 %v7088_v15, %v2487_v33  ;;  %v2267_v30 = vrot.slane %v2266_v41, 2 }
 0x30f   :  { %5603 = vrcp.f32 %v2504_v23  ;;  %v2254_v28 = vmax.f32 %v7093_v31, %v2253_v0  ;;  %v7105_v49 = vpop.eup %5591  ;;  %v2369_v36 = vmul.f32 1.442695, %v2316_v29  ;;  %v2283_v25 = vrot.slane %v7101_v26, 4 }
 0x310   :  { %v2263_v32 = vrot.slane %v2262_v58, 1  ;;  %v2250_v14 = vmax.f32 %v2248_v6, %v2249_v40  ;;  %v7110_v62 = vpop.eup %5593  ;;  %v2489_v57 = vrot.slane %v2488_v59, 2  ;;  %v2268_v7 = vmax.f32 %v2266_v41, %v2267_v30  ;;  %v7120_v30 = vpop.f32.mrf.mxu0 }
 0x311   :  { %v2255_v23 = vrot.slane %v2254_v28, 2  ;;  %v2505_v33 = vrot.slane %v7110_v62, 4  ;;  %5605 = vpow2.f32 %v2369_v36  ;;  %v2284_v13 = vmax.f32 %v7101_v26, %v2283_v25 }
 0x312   :  { %v2264_v0 = vmax.f32 %v2262_v58, %v2263_v32  ;;  %v2251_v27 = vrot.slane %v2250_v14, 1  ;;  %v7114_v3 = vpop.eup %5595  ;;  %v2490_v29 = vadd.f32 %v2489_v57, %v2488_v59  ;;  %v2269_v6 = vrot.slane %v2268_v7, 1  ;;  %v7135_v60 = vpop.f32.mrf.mxu0 }
 0x313   :  { %v2256_v40 = vmax.f32 %v2254_v28, %v2255_v23  ;;  %v2506_v21 = vadd.f32 %v7110_v62, %v2505_v33  ;;  %v2493_v16 = vrot.slane %v7114_v3, 4  ;;  %vm2067_vm3 = vcmp.gt.f32.partialorder %v7107_v5, 0.0  ;;  %7889 = vst [vmem:[#allocation96_spill] sm:$0xff] %v7135_v60 }
 0x314   :  { %v2321_v42 = vsub.f32 %v7071_v45, %v2264_v0  ;;  %v2252_v41 = vmax.f32 %v2250_v14, %v2251_v27  ;;  %v2491_v36 = vrot.slane %v2490_v29, 1  ;;  %v2270_v32 = vmax.f32 %v2268_v7, %v2269_v6 }
 0x315   :  { %v7123_v58 = vpop.eup %5597  ;;  %v2257_v59 = vrot.slane %v2256_v40, 1  ;;  %v2285_v57 = vrot.slane %v2284_v13, 2  ;;  %v2507_v25 = vrot.slane %v2506_v21, 2  ;;  %v2494_v23 = vadd.f32 %v7114_v3, %v2493_v16 }
 0x316   :  { %7887 = vst [vmem:[#allocation94_spill] sm:$0xff] %v7123_v58  ;;  %v7125_v28 = vpop.eup %5599  ;;  %v2523_v33 = vrot.slane %v7123_v58, 4  ;;  %v2379_v46 = vmul.f32 1.442695, %v2321_v42  ;;  %v2492_v45 = vadd.f32 %v2491_v36, %v2490_v29  ;;  %v2319_v14 = vsub.f32 %v7076_v48, %v2252_v41  ;;  %v1697_v36 = vpop.f32.mrf.mxu1 }
 0x317   :  { %7888 = vst [vmem:[#allocation95_spill] sm:$0xff] %v7125_v28  ;;  %v2511_v27 = vrot.slane %v7125_v28, 4  ;;  %v2322_v0 = vsub.f32 %v7083_v2, %v2270_v32  ;;  %v2508_v7 = vadd.f32 %v2507_v25, %v2506_v21  ;;  %v2495_v6 = vrot.slane %v2494_v23, 2 }
 0x318   :  { %v7132_v17 = vpop.eup %5601  ;;  %v2524_v54 = vadd.f32 %v7123_v58, %v2523_v33  ;;  %5607 = vpow2.f32 %v2379_v46  ;;  %v2375_v29 = vmul.f32 1.442695, %v2319_v14  ;;  %vm2070_vm4 = vcmp.gt.f32.partialorder %v7120_v30, 0.0 }
 0x319   :  { %5609 = vrcp.f32 %v2492_v45  ;;  %v2512_v16 = vadd.f32 %v7125_v28, %v2511_v27  ;;  %v2529_v42 = vrot.slane %v7132_v17, 4  ;;  %v2509_v48 = vrot.slane %v2508_v7, 1 }
 0x31a   :  { %v2496_v2 = vadd.f32 %v2495_v6, %v2494_v23  ;;  %v2525_v41 = vrot.slane %v2524_v54, 2  ;;  %v2381_v32 = vmul.f32 1.442695, %v2322_v0  ;;  %5611 = vpow2.f32 %v2375_v29  ;;  %v5104_v0 = vpop.f32.mrf.mxu1 }
 0x31b   :  { %v2513_v21 = vrot.slane %v2512_v16, 2  ;;  %v2530_v25 = vadd.f32 %v7132_v17, %v2529_v42  ;;  %v2258_v46 = vmax.f32 %v2256_v40, %v2257_v59  ;;  %vm2068_vm5 = vcmp.gt.f32.partialorder %v7135_v60, 0.0 }
 0x31c   :  { %v5604_v33 = vpop.eup %5603  ;;  %v2510_v45 = vadd.f32 %v2509_v48, %v2508_v7  ;;  %v2497_v27 = vrot.slane %v2496_v2, 1  ;;  %v2526_v58 = vadd.f32 %v2525_v41, %v2524_v54  ;;  %5613 = vpow2.f32 %v2381_v32 }
 0x31d   :  { %v2514_v14 = vadd.f32 %v2513_v21, %v2512_v16  ;;  %v2531_v28 = vrot.slane %v2530_v25, 2  ;;  %v2320_v8 = vsub.f32 %v7093_v31, %v2258_v46  ;;  %v7145_v23 = vsel %vm2067_vm3, %v1697_v36, -3.4028235e+38 }
 0x31e   :  { %v2633_v6 = vmul.f32 %v5604_v33, %v7045_v11  ;;  %5615 = vrcp.f32 %v2510_v45  ;;  %v2527_v40 = vrot.slane %v2526_v58, 1  ;;  %v2286_v59 = vmax.f32 %v2284_v13, %v2285_v57  ;;  %v7148_v42 = vpop.eup %5605  ;;  %v1700_v57 = vpop.f32.mrf.mxu1  ;;  %v3166_v45 = vld [vmem:[#allocation13 + $0x78] sm:$0xff] }
 0x31f   :  { %v2498_v7 = vadd.f32 %v2497_v27, %v2496_v2  ;;  %v2515_v29 = vrot.slane %v2514_v14, 1  ;;  %v2532_v54 = vadd.f32 %v2531_v28, %v2530_v25  ;;  %v2377_v48 = vmul.f32 1.442695, %v2320_v8  ;;  %v3165_v27 = vld [vmem:[#allocation13 + $0x70] sm:$0xff]  ;;  %5159 = vmatprep.subr.mxu0 %v3166_v45  ;;  %5197 = vmatprep.subr.mxu1 %v3166_v45 }
 0x320   :  { %5617 = vrcp.f32 %v7061_v10  ;;  %v2528_v16 = vadd.f32 %v2527_v40, %v2526_v58  ;;  %v2517_v31 = vrot.slane %v7148_v42, 4  ;;  %v2287_v41 = vrot.slane %v2286_v59, 1  ;;  %5160 = vmatpush3.msra.mxu0 %v3166_v45 }
 0x321   :  { %v7890_v36 = vrot.slane %v7085_v20, 1  ;;  %v2533_v11 = vrot.slane %v2532_v54, 1  ;;  %5619 = vpow2.f32 %v2377_v48  ;;  %v2271_v13 = vrot.slane %v7145_v23, 4  ;;  %v3164_v48 = vld [vmem:[#allocation13 + $0x68] sm:$0xff]  ;;  %5161 = vmatprep.subr.mxu0 %v3165_v27 }
 0x322   :  { %v2516_v2 = vadd.f32 %v2515_v29, %v2514_v14  ;;  %v2518_v28 = vadd.f32 %v7148_v42, %v2517_v31  ;;  %v2288_v8 = vmax.f32 %v2286_v59, %v2287_v41  ;;  %v7161_v10 = vsel %vm2070_vm4, %v5104_v0, -3.4028235e+38  ;;  %5162 = vmatpush3.msra.mxu0 %v3165_v27  ;;  %v3162_v27 = vld [vmem:[#allocation13 + $0x58] sm:$0xff] }
 0x323   :  { %v7155_v32 = vadd.f32 %v7890_v36, %v7085_v20  ;;  %v7164_v58 = vmul.f32 %v6823_v24, %v2633_v6  ;;  %5621 = vrcp.f32 %v2498_v7  ;;  %v2272_v20 = vmax.f32 %v7145_v23, %v2271_v13  ;;  %5163 = vmatprep.subr.mxu0 %v3164_v48 }
 0x324   :  { %v2289_v21 = vrot.slane %v7161_v10, 4  ;;  %5623 = vrcp.f32 %v2528_v16  ;;  %v2519_v25 = vrot.slane %v2518_v28, 2  ;;  %v2325_v46 = vsub.f32 %v7101_v26, %v2288_v8  ;;  %5164 = vmatpush3.msra.mxu0 %v3164_v48 }
 0x325   :  { %v7171_v33 = vsel %vm2068_vm5, %v1700_v57, -3.4028235e+38  ;;  %v7173_v14 = vpop.eup %5607  ;;  %v2534_v0 = vadd.f32 %v2533_v11, %v2532_v54  ;;  %v2273_v24 = vrot.slane %v2272_v20, 2  ;;  %5625 = vrcp.f32 %v2516_v2  ;;  %v3163_v2 = vld [vmem:[#allocation13 + $0x60] sm:$0xff] }
 0x326   :  { %v2290_v6 = vmax.f32 %v7161_v10, %v2289_v21  ;;  %v2277_v40 = vrot.slane %v7171_v33, 4  ;;  %v5610_v59 = vpop.eup %5609  ;;  %v2520_v7 = vadd.f32 %v2519_v25, %v2518_v28  ;;  %v2547_v26 = vrot.slane %v7173_v14, 4  ;;  %5165 = vmatprep.subr.mxu0 %v3163_v2 }
 0x327   :  { %v2387_v29 = vmul.f32 1.442695, %v2325_v46  ;;  %v2274_v16 = vmax.f32 %v2272_v20, %v2273_v24  ;;  %v2431_v54 = vrot.slane %v6874_v12, 1  ;;  %v7180_v36 = vpop.eup %5611  ;;  %v2631_v11 = vmul.f32 %v5610_v59, %v7088_v15  ;;  %5166 = vmatpush3.msra.mxu0 %v3163_v2 }
 0x328   :  { %v2291_v31 = vrot.slane %v2290_v6, 2  ;;  %v2278_v41 = vmax.f32 %v7171_v33, %v2277_v40  ;;  %v2521_v13 = vrot.slane %v2520_v7, 1  ;;  %v2548_v57 = vadd.f32 %v7173_v14, %v2547_v26  ;;  %5167 = vmatprep.subr.mxu0 %v3162_v27 }
 0x329   :  { %5627 = vpow2.f32 %v2387_v29  ;;  %v7184_v28 = vpop.eup %5613  ;;  %v2535_v8 = vrot.slane %v7180_v36, 4  ;;  %v2275_v20 = vrot.slane %v2274_v16, 1  ;;  %v7891_v15 = vrot.slane %v6878_v56, 2  ;;  %5168 = vmatpush3.msra.mxu0 %v3162_v27 }
 0x32a   :  { %5629 = vrcp.f32 %v2534_v0  ;;  %v2292_v21 = vmax.f32 %v2290_v6, %v2291_v31  ;;  %v2549_v25 = vrot.slane %v2548_v57, 2  ;;  %v2553_v46 = vrot.slane %v7184_v28, 4 }
 0x32b   :  { %v2279_v45 = vrot.slane %v2278_v41, 2  ;;  %v7191_v24 = vadd.f32 %v7891_v15, %v6878_v56  ;;  %v5616_v40 = vpop.eup %5615  ;;  %v2536_v59 = vadd.f32 %v7180_v36, %v2535_v8  ;;  %v2276_v0 = vmax.f32 %v2274_v16, %v2275_v20  ;;  %v3161_v56 = vld [vmem:[#allocation13 + $0x50] sm:$0xff] }
 0x32c   :  { %v2293_v26 = vrot.slane %v2292_v21, 1  ;;  %v7195_v29 = vadd.f32 %v2431_v54, %v6874_v12  ;;  %v7198_v6 = vmul.f32 %v2631_v11, %v6840_v63  ;;  %v2522_v31 = vadd.f32 %v2521_v13, %v2520_v7  ;;  %v3160_v13 = vld [vmem:[#allocation13 + $0x48] sm:$0xff]  ;;  %5169 = vmatprep.subr.mxu0 %v3161_v56 }
 0x32d   :  { %v2550_v60 = vadd.f32 %v2549_v25, %v2548_v57  ;;  %v2554_v5 = vadd.f32 %v7184_v28, %v2553_v46  ;;  %v7201_v48 = vpop.eup %5617  ;;  %v2537_v15 = vrot.slane %v2536_v59, 2  ;;  %v2323_v8 = vsub.f32 %v7145_v23, %v2276_v0  ;;  %5170 = vmatpush3.msra.mxu0 %v3161_v56 }
 0x32e   :  { %v2294_v16 = vmax.f32 %v2292_v21, %v2293_v26  ;;  %v2280_v20 = vmax.f32 %v2278_v41, %v2279_v45  ;;  %v7204_v12 = vpop.eup %5619  ;;  %v7207_v54 = vmul.f32 %v5616_v40, %v7110_v62  ;;  %v2437_v11 = vrot.slane %v7191_v24, 1  ;;  %v7212_v62 = vld [vmem:[#allocation13 + $0x40] sm:$0xff]  ;;  %5171 = vmatprep.subr.mxu0 %v3160_v13 }
 0x32f   :  { %v2551_v63 = vrot.slane %v2550_v60, 1  ;;  %v2555_v7 = vrot.slane %v2554_v5, 2  ;;  %v2538_v57 = vadd.f32 %v2537_v15, %v2536_v59  ;;  %v2541_v2 = vrot.slane %v7204_v12, 4  ;;  %5172 = vmatpush3.msra.mxu0 %v3160_v13  ;;  %v7230_v13 = vld [vmem:[#allocation13 + $0x30] sm:$0xff] }
 0x330   :  { %v2383_v25 = vmul.f32 1.442695, %v2323_v8  ;;  %v2326_v23 = vsub.f32 %v7161_v10, %v2294_v16  ;;  %v5622_v41 = vpop.eup %5621  ;;  %5631 = vrcp.f32 %v2522_v31  ;;  %v2281_v45 = vrot.slane %v2280_v20, 1  ;;  %5173 = vmatprep.subr.mxu0 %v7212_v62 }
 0x331   :  { %v2552_v21 = vadd.f32 %v2551_v63, %v2550_v60  ;;  %v2556_v46 = vadd.f32 %v2555_v7, %v2554_v5  ;;  %v7214_v40 = vpop.eup %5623  ;;  %v2539_v0 = vrot.slane %v2538_v57, 1  ;;  %v2542_v27 = vadd.f32 %v7204_v12, %v2541_v2  ;;  %v7218_v60 = vld [vmem:[#allocation13 + $0x38] sm:$0xff]  ;;  %5174 = vmatpush3.msra.mxu0 %v7212_v62 }
 0x332   :  { %5633 = vpow2.f32 %v2383_v25  ;;  %v2389_v59 = vmul.f32 1.442695, %v2326_v23  ;;  %v2282_v10 = vmax.f32 %v2280_v20, %v2281_v45  ;;  %v2479_v15 = vrot.slane %v7053_v1, 1  ;;  %v7220_v5 = vpop.eup %5625  ;;  %5175 = vmatprep.subr.mxu0 %v7218_v60 }
 0x333   :  { %5635 = vrcp.f32 %v2552_v21  ;;  %v2557_v26 = vrot.slane %v2556_v46, 1  ;;  %v2540_v31 = vadd.f32 %v2539_v0, %v2538_v57  ;;  %v2543_v56 = vrot.slane %v2542_v27, 2  ;;  %5176 = vmatpush3.msra.mxu0 %v7218_v60  ;;  %v7253_v0 = vld [vmem:[#allocation13 + $0x20] sm:$0xff] }
 0x334   :  { %5637 = vpow2.f32 %v2389_v59  ;;  %v7892_v8 = vrot.slane %v7064_v51, 2  ;;  %v2632_v63 = vmul.f32 %v5622_v41, %v7114_v3  ;;  %v2324_v20 = vsub.f32 %v7171_v33, %v2282_v10  ;;  %v7241_v41 = vld [vmem:[#allocation13 + $0x28] sm:$0xff]  ;;  %5177 = vmatprep.subr.mxu0 %v7230_v13  ;;  %7894 = vst [vmem:[#allocation98_spill] sm:$0xff] %v7253_v0 }
 0x335   :  { %v2558_v7 = vadd.f32 %v2557_v26, %v2556_v46  ;;  %5639 = vrcp.f32 %v6972_v43  ;;  %v2544_v2 = vadd.f32 %v2543_v56, %v2542_v27  ;;  %v2438_v25 = vadd.f32 %v2437_v11, %v7191_v24  ;;  %7893 = vst [vmem:[#allocation97_spill] sm:$0xff] %v7241_v41  ;;  %5178 = vmatpush3.msra.mxu0 %v7230_v13  ;;  %v7278_v27 = vld [vmem:[#allocation13 + $0x10] sm:$0xff] }
 0x336   :  { %v2484_v16 = vadd.f32 %v7892_v8, %v7064_v51  ;;  %v7232_v57 = vpop.eup %5627  ;;  %5641 = vrcp.f32 %v2540_v31  ;;  %v2385_v33 = vmul.f32 1.442695, %v2324_v20  ;;  %v2480_v43 = vadd.f32 %v2479_v15, %v7053_v1  ;;  %5179 = vmatprep.subr.mxu0 %v7241_v41  ;;  %v7903_v31 = vld [vmem:[#allocation64_spill] sm:$0xff]  ;;  %v7904_v8 = vld [vmem:[#allocation67_spill] sm:$0xff] }
 0x337   :  { %v7236_v23 = vpop.eup %5629  ;;  %5643 = vrcp.f32 %v2558_v7  ;;  %v2571_v3 = vrot.slane %v7232_v57, 4  ;;  %v2545_v21 = vrot.slane %v2544_v2, 1  ;;  %v2615_v24 = vmul.f32 %v6936_v35, %v6816_v61  ;;  %5180 = vmatpush3.msra.mxu0 %v7241_v41  ;;  %v7905_v7 = vld [vmem:[#allocation71_spill] sm:$0xff] }
 0x338   :  { %v2485_v51 = vrot.slane %v2484_v16, 1  ;;  %5645 = vrcp.f32 %v7195_v29  ;;  %v2616_v11 = vmul.f32 %v6969_v18, %v6835_v39  ;;  %v2617_v1 = vmul.f32 %v6932_v55, %v6808_v22  ;;  %v7266_v18 = vld [vmem:[#allocation13 + $0x18] sm:$0xff]  ;;  %5181 = vmatprep.subr.mxu0 %v7253_v0 }
 0x339   :  { %v2572_v46 = vadd.f32 %v7232_v57, %v2571_v3  ;;  %5647 = vpow2.f32 %v2385_v33  ;;  %v2546_v29 = vadd.f32 %v2545_v21, %v2544_v2  ;;  %v2618_v61 = vmul.f32 %v6955_v34, %v6830_v44  ;;  %7895 = vst [vmem:[#allocation99_spill] sm:$0xff] %v7266_v18  ;;  %5182 = vmatpush3.msra.mxu0 %v7253_v0  ;;  %v7907_v3 = vld [vmem:[#allocation31_spill] sm:$0xff] }
 0x33a   :  { %v2486_v45 = vadd.f32 %v2485_v51, %v2484_v16  ;;  %5649 = vrcp.f32 %v2438_v25  ;;  %v2624_v39 = vmul.f32 %v7105_v49, %v6927_v19  ;;  %v2619_v22 = vmul.f32 %v6980_v47, %v6855_v52  ;;  %v7896_v19 = vld [vmem:[#allocation87_spill] sm:$0xff]  ;;  %5183 = vmatprep.subr.mxu0 %v7266_v18  ;;  %v7906_v25 = vld [vmem:[#allocation70_spill] sm:$0xff] }
 0x33b   :  { %v2573_v35 = vrot.slane %v2572_v46, 2  ;;  %5651 = vrcp.f32 %v7155_v32  ;;  %v2623_v55 = vmul.f32 %v7039_v9, %v6910_v50  ;;  %v2625_v34 = vmul.f32 %v7032_v4, %v6901_v37  ;;  %v7897_v47 = vld [vmem:[#allocation63_spill] sm:$0xff]  ;;  %v7898_v9 = vld [vmem:[#allocation65_spill] sm:$0xff]  ;;  %7899 = vst [vmem:[#allocation87_spill] sm:$0xff] %v7278_v27  ;;  %v7900_v4 = vld [vmem:[#allocation78_spill] sm:$0xff]  ;;  %5184 = vmatpush3.msra.mxu0 %v7266_v18 }
 0x33c   :  { %5653 = vrcp.f32 %v2546_v29  ;;  %v2626_v44 = vmul.f32 %v7049_v38, %v6919_v53  ;;  %v2627_v49 = vmul.f32 %v7201_v48, %v7896_v19  ;;  %v2647_v50 = vmul.f32 %v2615_v24, %v7897_v47  ;;  %v7901_v53 = vld [vmem:[#allocation62_spill] sm:$0xff]  ;;  %v7902_v48 = vld [vmem:[#allocation32_spill] sm:$0xff]  ;;  %5185 = vmatprep.subr.mxu0 %v7278_v27  ;;  %v7914_v47 = vld [vmem:[#allocation27_spill] sm:$0xff] }
 0x33d   :  { %v2574_v52 = vadd.f32 %v2573_v35, %v2572_v46  ;;  %5655 = vrcp.f32 %v2480_v43  ;;  %v2648_v32 = vmul.f32 %v2616_v11, %v7898_v9  ;;  %v7280_v59 = vpop.eup %5631  ;;  %v7283_v37 = vmul.f32 %v2632_v63, %v7900_v4  ;;  %v7908_v43 = vld [vmem:[#allocation34_spill] sm:$0xff]  ;;  %5186 = vmatpush3.msra.mxu0 %v7278_v27  ;;  %v7915_v9 = vld [vmem:[#allocation29_spill] sm:$0xff] }
 0x33e   :  { %5657 = vrcp.f32 %v2486_v45  ;;  %v2649_v38 = vmul.f32 %v7901_v53, %v2617_v1  ;;  %v2656_v26 = vmul.f32 %v2624_v39, %v7902_v48  ;;  %v2650_v56 = vmul.f32 %v7903_v31, %v2618_v61  ;;  %v7909_v45 = vld [vmem:[#allocation25_spill] sm:$0xff]  ;;  %v7910_v29 = vld [vmem:[#allocation26_spill] sm:$0xff] }
 0x33f   :  { %v7288_v10 = vpop.eup %5633  ;;  %v2575_v15 = vrot.slane %v2574_v52, 1  ;;  %v2651_v16 = vmul.f32 %v2619_v22, %v7904_v8  ;;  %v2655_v20 = vmul.f32 %v2623_v55, %v7905_v7  ;;  %v2657_v51 = vmul.f32 %v7906_v25, %v2625_v34  ;;  %v7911_v55 = vld [vmem:[#allocation28_spill] sm:$0xff]  ;;  %v7916_v4 = vld [vmem:[#allocation37_spill] sm:$0xff] }
 0x340   :  { %v5636_v63 = vpop.eup %5635  ;;  %v2559_v2 = vrot.slane %v7288_v10, 4  ;;  %v2658_v33 = vmul.f32 %v7907_v3, %v2626_v44  ;;  %v2659_v21 = vmul.f32 %v2627_v49, %v7908_v43  ;;  %v2679_v1 = vmul.f32 %v7909_v45, %v2647_v50  ;;  %v7912_v44 = vld [vmem:[#allocation38_spill] sm:$0xff] }
 0x341   :  { %v7299_v24 = vpop.eup %5637  ;;  %v2641_v11 = vmul.f32 %v5636_v63, %v7173_v14  ;;  %v2576_v46 = vadd.f32 %v2575_v15, %v2574_v52  ;;  %v2680_v61 = vmul.f32 %v7910_v29, %v2648_v32  ;;  %v7308_v34 = vmul.f32 %v7911_v55, %v2649_v38  ;;  %v7913_v14 = vld [vmem:[#allocation79_spill] sm:$0xff]  ;;  %v7917_v15 = vld [vmem:[#allocation85_spill] sm:$0xff] }
 0x342   :  { %v5640_v39 = vpop.eup %5639  ;;  %v2560_v35 = vadd.f32 %v7288_v10, %v2559_v2  ;;  %v2577_v22 = vrot.slane %v7299_v24, 4  ;;  %v7311_v19 = vmul.f32 %v7912_v44, %v2656_v26  ;;  %v7315_v50 = vmul.f32 %v7914_v47, %v2650_v56  ;;  %v7918_v56 = vld [vmem:[#allocation40_spill] sm:$0xff] }
 0x343   :  { %v5642_v49 = vpop.eup %5641  ;;  %v2620_v52 = vmul.f32 %v5640_v39, %v7913_v14  ;;  %v7318_v32 = vmul.f32 %v7915_v9, %v2651_v16  ;;  %v7321_v53 = vmul.f32 %v7916_v4, %v2655_v20  ;;  %v7324_v31 = vmul.f32 %v7917_v15, %v2641_v11  ;;  %v7919_v16 = vld [vmem:[#allocation42_spill] sm:$0xff]  ;;  %v7921_v39 = vld [vmem:[#allocation69_spill] sm:$0xff] }
 0x344   :  { %v5644_v48 = vpop.eup %5643  ;;  %5659 = vrcp.f32 %v2576_v46  ;;  %v2561_v38 = vrot.slane %v2560_v35, 2  ;;  %v2578_v26 = vadd.f32 %v7299_v24, %v2577_v22  ;;  %v7328_v7 = vmul.f32 %v5642_v49, %v7180_v36  ;;  %v7920_v46 = vld [vmem:[#allocation75_spill] sm:$0xff]  ;;  %v7922_v14 = vld [vmem:[#allocation77_spill] sm:$0xff]  ;;  %v7923_v9 = vld [vmem:[#allocation66_spill] sm:$0xff] }
 0x345   :  { %v5646_v8 = vpop.eup %5645  ;;  %v7331_v63 = vmul.f32 %v7918_v56, %v2657_v51  ;;  %v7334_v2 = vmul.f32 %v7919_v16, %v2658_v33  ;;  %v2711_v20 = vrot.slane %v2679_v1, 4  ;;  %v7339_v3 = vmul.f32 %v5644_v48, %v7184_v28  ;;  %v7924_v48 = vld [vmem:[#allocation91_spill] sm:$0xff] }
 0x346   :  { %v7336_v25 = vpop.eup %5647  ;;  %v2562_v43 = vadd.f32 %v2561_v38, %v2560_v35  ;;  %v2579_v11 = vrot.slane %v2578_v26, 2  ;;  %v2621_v45 = vmul.f32 %v5646_v8, %v7920_v46  ;;  %v2652_v22 = vmul.f32 %v2620_v52, %v7921_v39 }
 0x347   :  { %v5650_v29 = vpop.eup %5649  ;;  %v2565_v36 = vrot.slane %v7336_v25, 4  ;;  %v2712_v51 = vadd.f32 %v2711_v20, %v2679_v1  ;;  %v2717_v55 = vrot.slane %v2680_v61, 4  ;;  %v7925_v20 = vld [vmem:[#allocation68_spill] sm:$0xff]  ;;  %vm3017_vm7 = vcmask 1042434  }
 0x348   :  { %v5652_v44 = vpop.eup %5651  ;;  %v2563_v33 = vrot.slane %v2562_v43, 1  ;;  %v2580_v49 = vadd.f32 %v2579_v11, %v2578_v26  ;;  %v2622_v47 = vmul.f32 %v5650_v29, %v7922_v14  ;;  %v2653_v4 = vmul.f32 %v7923_v9, %v2621_v45  ;;  %v7926_v11 = vld [vmem:[#allocation84_spill] sm:$0xff]  ;;  %v7927_v14 = vld [vmem:[#allocation73_spill] sm:$0xff]  ;;  %v7928_v9 = vld [vmem:[#allocation43_spill] sm:$0xff] }
 0x349   :  { %v5654_v28 = vpop.eup %5653  ;;  %v2566_v35 = vadd.f32 %v7336_v25, %v2565_v36  ;;  %v2628_v15 = vmul.f32 %v5652_v44, %v7924_v48  ;;  %v2713_v38 = vrot.slane %v2712_v51, 2  ;;  %v2718_v8 = vadd.f32 %v2717_v55, %v2680_v61  ;;  %v7929_v36 = vld [vmem:[#allocation90_spill] sm:$0xff]  ;;  %v7930_v61 = vld [vmem:[#allocation89_spill] sm:$0xff] }
 0x34a   :  { %v5656_v56 = vpop.eup %5655  ;;  %v2640_v16 = vmul.f32 %v5654_v28, %v7204_v12  ;;  %v2564_v52 = vadd.f32 %v2563_v33, %v2562_v43  ;;  %v2581_v1 = vrot.slane %v2580_v49, 1  ;;  %v2654_v46 = vmul.f32 %v7925_v20, %v2622_v47  ;;  %v7931_v48 = vld [vmem:[#allocation30_spill] sm:$0xff]  ;;  %v7932_v43 = vld [vmem:[#allocation35_spill] sm:$0xff]  ;;  %v7933_v20 = vld [vmem:[#allocation33_spill] sm:$0xff] }
 0x34b   :  { %v5658_v39 = vpop.eup %5657  ;;  %v2567_v26 = vrot.slane %v2566_v35, 2  ;;  %v2629_v29 = vmul.f32 %v5656_v56, %v7926_v11  ;;  %v2660_v45 = vmul.f32 %v2628_v15, %v7927_v14  ;;  %v7353_v27 = vmul.f32 %v7928_v9, %v2659_v21  ;;  %v7934_v56 = vld [vmem:[#allocation72_spill] sm:$0xff] }
 0x34c   :  { %v7356_v44 = vmul.f32 %v2640_v16, %v7929_v36  ;;  %v2630_v55 = vmul.f32 %v5658_v39, %v7930_v61  ;;  %v2684_v12 = vmul.f32 %v7931_v48, %v2652_v22  ;;  %v2685_v33 = vmul.f32 %v7932_v43, %v2653_v4  ;;  %v7935_v15 = vld [vmem:[#allocation36_spill] sm:$0xff]  ;;  %v7936_v16 = vld [vmem:[#allocation50_spill] sm:$0xff] }
 0x34d   :  { %5661 = vrcp.f32 %v2564_v52  ;;  %v2582_v47 = vadd.f32 %v2581_v1, %v2580_v49  ;;  %v2568_v28 = vadd.f32 %v2567_v26, %v2566_v35  ;;  %v2661_v18 = vmul.f32 %v7933_v20, %v2629_v29  ;;  %v7937_v4 = vld [vmem:[#allocation46_spill] sm:$0xff] }
 0x34e   :  { %v2662_v11 = vmul.f32 %v7934_v56, %v2630_v55  ;;  %v2686_v14 = vmul.f32 %v7935_v15, %v2654_v46  ;;  %v2714_v21 = vadd.f32 %v2713_v38, %v2712_v51  ;;  %v2719_v9 = vrot.slane %v2718_v8, 2 }
 0x34f   :  { %v2569_v0 = vrot.slane %v2568_v28, 1  ;;  %v7365_v36 = vmul.f32 %v7936_v16, %v2660_v45  ;;  %v2723_v39 = vrot.slane %v7308_v34, 4  ;;  %v2729_v22 = vrot.slane %v7315_v50, 4  ;;  %v7938_v45 = vld [vmem:[#allocation45_spill] sm:$0xff] }
 0x350   :  { %v7370_v52 = vmul.f32 %v7937_v4, %v2662_v11  ;;  %v2715_v49 = vrot.slane %v2714_v21, 1  ;;  %v2720_v35 = vadd.f32 %v2719_v9, %v2718_v8  ;;  %v2735_v1 = vrot.slane %v7318_v32, 4 }
 0x351   :  { %v7373_v26 = vpop.eup %5659  ;;  %5663 = vrcp.f32 %v2582_v47  ;;  %v2724_v51 = vadd.f32 %v2723_v39, %v7308_v34  ;;  %v2730_v38 = vadd.f32 %v2729_v22, %v7315_v50  ;;  %v2741_v46 = vrot.slane %v2684_v12, 4 }
 0x352   :  { %v2570_v29 = vadd.f32 %v2569_v0, %v2568_v28  ;;  %v2693_v61 = vmul.f32 %v7938_v45, %v2661_v18  ;;  %v2736_v55 = vadd.f32 %v2735_v1, %v7318_v32  ;;  %v2747_v48 = vrot.slane %v2685_v33, 4 }
 0x353   :  { %v7379_v43 = vadd.f32 %v2715_v49, %v2714_v21  ;;  %v2725_v20 = vrot.slane %v2724_v51, 2  ;;  %v2731_v8 = vrot.slane %v2730_v38, 2  ;;  %v2742_v56 = vadd.f32 %v2741_v46, %v2684_v12 }
 0x354   :  { %v2721_v11 = vrot.slane %v2720_v35, 1  ;;  %v2737_v15 = vrot.slane %v2736_v55, 2  ;;  %v2748_v9 = vadd.f32 %v2747_v48, %v2685_v33  ;;  %v2753_v47 = vrot.slane %v2686_v14, 4 }
 0x355   :  { %v2726_v16 = vadd.f32 %v2725_v20, %v2724_v51  ;;  %v2732_v34 = vadd.f32 %v2731_v8, %v2730_v38  ;;  %v2743_v39 = vrot.slane %v2742_v56, 2  ;;  %v2759_v50 = vrot.slane %v7321_v53, 4 }
 0x356   :  { %v2738_v0 = vadd.f32 %v2737_v15, %v2736_v55  ;;  %v2749_v28 = vrot.slane %v2748_v9, 2  ;;  %v2754_v18 = vadd.f32 %v2753_v47, %v2686_v14  ;;  %v2765_v32 = vrot.slane %v7311_v19, 4 }
 0x357   :  { %v2727_v22 = vrot.slane %v2726_v16, 1  ;;  %v2733_v21 = vrot.slane %v2732_v34, 1  ;;  %v2744_v4 = vadd.f32 %v2743_v39, %v2742_v56  ;;  %v2760_v49 = vadd.f32 %v2759_v50, %v7321_v53 }
 0x358   :  { %v2739_v12 = vrot.slane %v2738_v0, 1  ;;  %v2750_v1 = vadd.f32 %v2749_v28, %v2748_v9  ;;  %v2755_v46 = vrot.slane %v2754_v18, 2  ;;  %v2766_v33 = vadd.f32 %v2765_v32, %v7311_v19 }
 0x359   :  { %5665 = vrcp.f32 %v2570_v29  ;;  %v7385_v51 = vadd.f32 %v2721_v11, %v2720_v35  ;;  %v7387_v38 = vadd.f32 %v2727_v22, %v2726_v16  ;;  %v2761_v45 = vrot.slane %v2760_v49, 2 }
 0x35a   :  { %v7389_v55 = vpop.eup %5661  ;;  %v7391_v14 = vadd.f32 %v2733_v21, %v2732_v34  ;;  %v2745_v48 = vrot.slane %v2744_v4, 1  ;;  %v2756_v20 = vadd.f32 %v2755_v46, %v2754_v18  ;;  %v2767_v8 = vrot.slane %v2766_v33, 2 }
 0x35b   :  { %v2751_v56 = vrot.slane %v2750_v1, 1  ;;  %v2762_v53 = vadd.f32 %v2761_v45, %v2760_v49  ;;  %v2771_v15 = vrot.slane %v7331_v63, 4  ;;  %v2777_v9 = vrot.slane %v7334_v2, 4 }
 0x35c   :  { %v7395_v19 = vadd.f32 %v2739_v12, %v2738_v0  ;;  %v2757_v35 = vrot.slane %v2756_v20, 1  ;;  %v2768_v29 = vadd.f32 %v2767_v8, %v2766_v33  ;;  %v2783_v11 = vrot.slane %v7353_v27, 4 }
 0x35d   :  { %v2763_v47 = vrot.slane %v2762_v53, 1  ;;  %v2772_v16 = vadd.f32 %v2771_v15, %v7331_v63  ;;  %v2778_v34 = vadd.f32 %v2777_v9, %v7334_v2  ;;  %v2789_v39 = vrot.slane %v7365_v36, 4 }
 0x35e   :  { %v7401_v50 = vpop.eup %5663  ;;  %v2746_v28 = vadd.f32 %v2745_v48, %v2744_v4  ;;  %v2769_v18 = vrot.slane %v2768_v29, 1  ;;  %v2784_v32 = vadd.f32 %v2783_v11, %v7353_v27  ;;  %v2795_v22 = vrot.slane %v2693_v61, 4 }
 0x35f   :  { %v2752_v0 = vadd.f32 %v2751_v56, %v2750_v1  ;;  %v2773_v21 = vrot.slane %v2772_v16, 2  ;;  %v2779_v49 = vrot.slane %v2778_v34, 2  ;;  %v2790_v12 = vadd.f32 %v2789_v39, %v7365_v36 }
 0x360   :  { %v2758_v46 = vadd.f32 %v2757_v35, %v2756_v20  ;;  %v2785_v33 = vrot.slane %v2784_v32, 2  ;;  %v2796_v45 = vadd.f32 %v2795_v22, %v2693_v61  ;;  %v2801_v63 = vrot.slane %v7370_v52, 4 }
 0x361   :  { %v2764_v2 = vadd.f32 %v2763_v47, %v2762_v53  ;;  %v2774_v8 = vadd.f32 %v2773_v21, %v2772_v16  ;;  %v2780_v15 = vadd.f32 %v2779_v49, %v2778_v34  ;;  %v2791_v9 = vrot.slane %v2790_v12, 2 }
 0x362   :  { %v2770_v41 = vadd.f32 %v2769_v18, %v2768_v29  ;;  %v2786_v4 = vadd.f32 %v2785_v33, %v2784_v32  ;;  %v2797_v48 = vrot.slane %v2796_v45, 2  ;;  %v2802_v27 = vadd.f32 %v2801_v63, %v7370_v52 }
 0x363   :  { %v2775_v11 = vrot.slane %v2774_v8, 1  ;;  %v2781_v1 = vrot.slane %v2780_v15, 1  ;;  %v2792_v56 = vadd.f32 %v2791_v9, %v2790_v12  ;;  %v2903_v36 = vpack.c.bf16 %v7379_v43, %v7379_v43 }
 0x364   :  { %v2787_v20 = vrot.slane %v2786_v4, 1  ;;  %v2798_v35 = vadd.f32 %v2797_v48, %v2796_v45  ;;  %v2803_v61 = vrot.slane %v2802_v27, 2  ;;  %v2904_v53 = vpack.c.bf16 %v7385_v51, %v7385_v51 }
 0x365   :  { %v2776_v47 = vadd.f32 %v2775_v11, %v2774_v8  ;;  %v2782_v16 = vadd.f32 %v2781_v1, %v2780_v15  ;;  %v2793_v34 = vrot.slane %v2792_v56, 1  ;;  %v2905_v29 = vpack.c.bf16 %v7387_v38, %v7387_v38 }
 0x366   :  { %v7413_v39 = vpop.eup %5665  ;;  %v2788_v52 = vadd.f32 %v2787_v20, %v2786_v4  ;;  %v2799_v18 = vrot.slane %v2798_v35, 1  ;;  %v2804_v32 = vadd.f32 %v2803_v61, %v2802_v27  ;;  %v2906_v43 = vpack.c.bf16 %v7391_v14, %v7391_v14 }
 0x367   :  { %v2794_v22 = vadd.f32 %v2793_v34, %v2792_v56  ;;  %v2907_v21 = vpack.c.bf16 %v7395_v19, %v7395_v19  ;;  %v2908_v49 = vpack.c.bf16 %v2746_v28, %v2746_v28  ;;  %v2909_v51 = vpack.c.bf16 %v2752_v0, %v2752_v0 }
 0x368   :  { %v2800_v12 = vadd.f32 %v2799_v18, %v2798_v35  ;;  %v2805_v33 = vrot.slane %v2804_v32, 1  ;;  %v2910_v45 = vpack.c.bf16 %v2758_v46, %v2758_v46  ;;  %v2912_v63 = vpack.c.bf16 %v2770_v41, %v2770_v41  ;;  %v7939_v18 = vld [vmem:[#allocation95_spill] sm:$0xff] }
 0x369   :  { %v2911_v8 = vpack.c.bf16 %v2764_v2, %v2764_v2  ;;  %v2913_v38 = vpack.c.bf16 %v2776_v47, %v2776_v47  ;;  %v2914_v15 = vpack.c.bf16 %v2782_v16, %v2782_v16  ;;  %v2915_v9 = vpack.c.bf16 %v2788_v52, %v2788_v52 }
 0x36a   :  { %v2806_v4 = vadd.f32 %v2805_v33, %v2804_v32  ;;  %v2916_v48 = vpack.c.bf16 %v2794_v22, %v2794_v22  ;;  %v2917_v27 = vpack.c.bf16 %v2800_v12, %v2800_v12  ;;  %v2983_v11 = vunpack.c.l.b16 %v2903_v36 }
 0x36b   :  { %v2984_v1 = vunpack.c.l.b16 %v2904_v53  ;;  %v2985_v14 = vunpack.c.l.b16 %v2905_v29  ;;  %v2986_v56 = vunpack.c.l.b16 %v2906_v43  ;;  %v2987_v20 = vunpack.c.l.b16 %v2907_v21 }
 0x36c   :  { %v2918_v61 = vpack.c.bf16 %v2806_v4, %v2806_v4  ;;  %v2988_v19 = vunpack.c.l.b16 %v2908_v49  ;;  %v2989_v28 = vunpack.c.l.b16 %v2909_v51  ;;  %v2992_v0 = vunpack.c.l.b16 %v2912_v63  ;;  %v7940_v49 = vld [vmem:[#allocation94_spill] sm:$0xff] }
 0x36d   :  { %v2990_v35 = vunpack.c.l.b16 %v2910_v45  ;;  %v2991_v34 = vunpack.c.l.b16 %v2911_v8  ;;  %v2993_v46 = vunpack.c.l.b16 %v2913_v38  ;;  %v2994_v41 = vunpack.c.l.b16 %v2914_v15 }
 0x36e   :  { %v2995_v2 = vunpack.c.l.b16 %v2915_v9  ;;  %v2996_v47 = vunpack.c.l.b16 %v2916_v48  ;;  %v3016_v16 = vsel %vm3015_vm6, %v2984_v1, %v2983_v11  ;;  %vm3019_vm8 = vcmask 1043459   ;;  %v7942_v9 = vld [vmem:[#allocation81_spill] sm:$0xff]  ;;  %v7944_v1 = vld [vmem:[#allocation80_spill] sm:$0xff] }
 0x36f   :  { %vm3021_vm9 = vcmask 1044484   ;;  %vm3023_vm10 = vcmask 1045509   ;;  %v3018_v36 = vsel %vm3017_vm7, %v2985_v14, %v3016_v16  ;;  %vm3025_vm11 = vcmask 1046534   ;;  %v7954_v16 = vld [vmem:[#allocation93_spill] sm:$0xff] }
 0x370   :  { %vm3027_vm12 = vcmask 1047559   ;;  %v3029_v53 = vsel %vm3015_vm6, %v2992_v0, %v2991_v34  ;;  %v3020_v29 = vsel %vm3019_vm8, %v2986_v56, %v3018_v36  ;;  %v2635_v32 = vmul.f32 %v7220_v5, %v7939_v18  ;;  %v7945_v56 = vld [vmem:[#allocation82_spill] sm:$0xff]  ;;  %v7948_v0 = vld [vmem:[#allocation47_spill] sm:$0xff]  ;;  %v7949_v34 = vld [vmem:[#allocation48_spill] sm:$0xff] }
 0x371   :  { %v3030_v52 = vsel %vm3017_vm7, %v2993_v46, %v3029_v53  ;;  %v2636_v43 = vmul.f32 %v7280_v59, %v7148_v42  ;;  %v3022_v22 = vsel %vm3021_vm9, %v2987_v20, %v3020_v29  ;;  %v2637_v51 = vmul.f32 %v7214_v40, %v7940_v49  ;;  %v7955_v36 = vld [vmem:[#allocation53_spill] sm:$0xff]  ;;  %v7956_v53 = vld [vmem:[#allocation54_spill] sm:$0xff] }
 0x372   :  { %v3031_v21 = vsel %vm3019_vm8, %v2994_v41, %v3030_v52  ;;  %v2638_v12 = vmul.f32 %v7236_v23, %v7132_v17  ;;  %v2997_v33 = vunpack.c.l.b16 %v2917_v27  ;;  %v2998_v45 = vunpack.c.l.b16 %v2918_v61  ;;  %v7941_v23 = vld [vmem:[#allocation76_spill] sm:$0xff]  ;;  %v7943_v27 = vld [vmem:[#allocation83_spill] sm:$0xff] }
 0x373   :  { %v3024_v63 = vsel %vm3023_vm10, %v2988_v19, %v3022_v22  ;;  %v3032_v8 = vsel %vm3021_vm9, %v2995_v2, %v3031_v21  ;;  %v2643_v59 = vmul.f32 %v7389_v55, %v7288_v10  ;;  %v2646_v38 = vmul.f32 %v7401_v50, %v7299_v24  ;;  %v7946_v55 = vld [vmem:[#allocation86_spill] sm:$0xff]  ;;  %v7947_v61 = vld [vmem:[#allocation88_spill] sm:$0xff]  ;;  %v7951_v2 = vld [vmem:[#allocation41_spill] sm:$0xff] }
 0x374   :  { %v3026_v5 = vsel %vm3025_vm11, %v2989_v28, %v3024_v63  ;;  %v3033_v42 = vsel %vm3023_vm10, %v2996_v47, %v3032_v8  ;;  %v2666_v15 = vmul.f32 %v7941_v23, %v7207_v54  ;;  %v2667_v4 = vmul.f32 %v2635_v32, %v7942_v9  ;;  %v7959_v32 = vld [vmem:[#allocation92_spill] sm:$0xff]  ;;  %v7961_v21 = vld [vmem:[#allocation57_spill] sm:$0xff] }
 0x375   :  { %v3028_v40 = vsel %vm3027_vm12, %v2990_v35, %v3026_v5  ;;  %v3034_v17 = vsel %vm3025_vm11, %v2997_v33, %v3033_v42  ;;  %v2668_v11 = vmul.f32 %v2636_v43, %v7943_v27  ;;  %v2669_v14 = vmul.f32 %v7944_v1, %v2637_v51  ;;  %v7962_v51 = vld [vmem:[#allocation58_spill] sm:$0xff] }
 0x376   :  { %v3035_v48 = vsel %vm3027_vm12, %v2998_v45, %v3034_v17  ;;  %v2670_v10 = vmul.f32 %v7945_v56, %v2638_v12  ;;  %v2671_v24 = vmul.f32 %v7328_v7, %v7946_v55  ;;  %v2644_v20 = vmul.f32 %v7413_v39, %v7336_v25  ;;  %v7950_v7 = vld [vmem:[#allocation49_spill] sm:$0xff]  ;;  %v7952_v39 = vld [vmem:[#allocation51_spill] sm:$0xff]  ;;  %v7963_v33 = vld [vmem:[#allocation74_spill] sm:$0xff] }
 0x377   :  { %v3050_v50 = vpack.c.b16 %v3035_v48, %v3028_v40  ;;  %v2645_v54 = vmul.f32 %v7373_v26, %v7232_v57  ;;  %v2674_v19 = vmul.f32 %v7947_v61, %v7339_v3  ;;  %v2678_v28 = vmul.f32 %v7120_v30, %v2646_v38  ;;  %v7953_v57 = vld [vmem:[#allocation52_spill] sm:$0xff] }
 0x378   :  { %v2695_v35 = vmul.f32 %v7948_v0, %v7198_v6  ;;  %v2696_v46 = vmul.f32 %v7949_v34, %v7283_v37  ;;  %v2697_v41 = vmul.f32 %v7950_v7, %v7164_v58  ;;  %v2698_v25 = vmul.f32 %v7951_v2, %v2666_v15  ;;  %v7957_v6 = vld [vmem:[#allocation56_spill] sm:$0xff]  ;;  %v7960_v58 = vld [vmem:[#allocation55_spill] sm:$0xff] }
 0x379   :  { %5155 = vmatprep.mubr.bf16.mxu1 %v3050_v50  ;;  %v2699_v47 = vmul.f32 %v7952_v39, %v2667_v4  ;;  %v2700_v26 = vmul.f32 %v7953_v57, %v2668_v11  ;;  %v2675_v3 = vmul.f32 %v2643_v59, %v7954_v16  ;;  %v2701_v30 = vmul.f32 %v7955_v36, %v2669_v14  ;;  %v7958_v37 = vld [vmem:[#allocation96_spill] sm:$0xff] }
 0x37a   :  { %v2702_v29 = vmul.f32 %v7956_v53, %v2670_v10  ;;  %v2704_v52 = vmul.f32 %v7957_v6, %v7356_v44  ;;  %v2676_v18 = vmul.f32 %v2644_v20, %v7958_v37  ;;  %v2677_v43 = vmul.f32 %v7959_v32, %v2645_v54 }
 0x37b   :  { %v2703_v22 = vmul.f32 %v7960_v58, %v2671_v24  ;;  %v2705_v49 = vmul.f32 %v7961_v21, %v7324_v31  ;;  %v2706_v12 = vmul.f32 %v7962_v51, %v2674_v19  ;;  %v7481_v45 = vmul.f32 %v7963_v33, %v2678_v28 }
 0x37c   :  { %v2807_v63 = vrot.slane %v2695_v35, 4  ;;  %v2813_v8 = vrot.slane %v2696_v46, 4  ;;  %v2819_v5 = vrot.slane %v2697_v41, 4  ;;  %v2825_v42 = vrot.slane %v2698_v25, 4 }
 0x37d   :  { %v2831_v59 = vrot.slane %v2699_v47, 4  ;;  %v2837_v44 = vrot.slane %v2700_v26, 4  ;;  %v2843_v17 = vrot.slane %v2701_v30, 4  ;;  %v2849_v23 = vrot.slane %v2702_v29, 4 }
 0x37e   :  { %v2808_v38 = vadd.f32 %v2807_v63, %v2695_v35  ;;  %v2814_v40 = vadd.f32 %v2813_v8, %v2696_v46  ;;  %v2820_v15 = vadd.f32 %v2819_v5, %v2697_v41  ;;  %v2826_v9 = vadd.f32 %v2825_v42, %v2698_v25  ;;  %v7964_v41 = vld [vmem:[#allocation59_spill] sm:$0xff]  ;;  %v7965_v25 = vld [vmem:[#allocation60_spill] sm:$0xff] }
 0x37f   :  { %v2832_v4 = vadd.f32 %v2831_v59, %v2699_v47  ;;  %v2838_v48 = vadd.f32 %v2837_v44, %v2700_v26  ;;  %v2844_v11 = vadd.f32 %v2843_v17, %v2701_v30  ;;  %v2850_v1 = vadd.f32 %v2849_v23, %v2702_v29  ;;  %v7966_v26 = vld [vmem:[#allocation61_spill] sm:$0xff] }
 0x380   :  { %v2809_v31 = vrot.slane %v2808_v38, 2  ;;  %v2815_v27 = vrot.slane %v2814_v40, 2  ;;  %v2821_v14 = vrot.slane %v2820_v15, 2  ;;  %v2827_v56 = vrot.slane %v2826_v9, 2 }
 0x381   :  { %v2833_v10 = vrot.slane %v2832_v4, 2  ;;  %v2839_v55 = vrot.slane %v2838_v48, 2  ;;  %v2845_v20 = vrot.slane %v2844_v11, 2  ;;  %v2851_v54 = vrot.slane %v2850_v1, 2 }
 0x382   :  { %v2810_v24 = vadd.f32 %v2809_v31, %v2808_v38  ;;  %v2816_v50 = vadd.f32 %v2815_v27, %v2814_v40  ;;  %v2822_v61 = vadd.f32 %v2821_v14, %v2820_v15  ;;  %v2828_v19 = vadd.f32 %v2827_v56, %v2826_v9 }
 0x383   :  { %v2834_v28 = vadd.f32 %v2833_v10, %v2832_v4  ;;  %v2840_v0 = vadd.f32 %v2839_v55, %v2838_v48  ;;  %v2846_v46 = vadd.f32 %v2845_v20, %v2844_v11  ;;  %v7483_v7 = vadd.f32 %v2851_v54, %v2850_v1 }
 0x384   :  { %v2811_v35 = vrot.slane %v2810_v24, 1  ;;  %v2817_v34 = vrot.slane %v2816_v50, 1  ;;  %v2707_v2 = vmul.f32 %v7964_v41, %v2675_v3  ;;  %v2708_v39 = vmul.f32 %v7965_v25, %v2676_v18 }
 0x385   :  { %v2823_v47 = vrot.slane %v2822_v61, 1  ;;  %v2829_v57 = vrot.slane %v2828_v19, 1  ;;  %v2709_v16 = vmul.f32 %v7966_v26, %v2677_v43  ;;  %v2835_v36 = vrot.slane %v2834_v28, 1 }
 0x386   :  { %v2841_v30 = vrot.slane %v2840_v0, 1  ;;  %v7488_v53 = vadd.f32 %v2811_v35, %v2810_v24  ;;  %v7490_v29 = vadd.f32 %v2817_v34, %v2816_v50  ;;  %v2847_v6 = vrot.slane %v2846_v46, 1 }
 0x387   :  { %v2853_v37 = vrot.slane %v7483_v7, 1  ;;  %v7493_v32 = vadd.f32 %v2823_v47, %v2822_v61  ;;  %v7495_v58 = vadd.f32 %v2829_v57, %v2828_v19  ;;  %v2855_v3 = vrot.slane %v2703_v22, 4 }
 0x388   :  { %v2861_v21 = vrot.slane %v2704_v52, 4  ;;  %v2867_v18 = vrot.slane %v2705_v49, 4  ;;  %v2873_v51 = vrot.slane %v2706_v12, 4  ;;  %v2879_v33 = vrot.slane %v2707_v2, 4 }
 0x389   :  { %v2885_v63 = vrot.slane %v2708_v39, 4  ;;  %v2856_v43 = vadd.f32 %v2855_v3, %v2703_v22  ;;  %v2891_v5 = vrot.slane %v2709_v16, 4  ;;  %v2897_v42 = vrot.slane %v7481_v45, 4 }
 0x38a   :  { %v2862_v8 = vadd.f32 %v2861_v21, %v2704_v52  ;;  %v2868_v59 = vadd.f32 %v2867_v18, %v2705_v49  ;;  %v2874_v44 = vadd.f32 %v2873_v51, %v2706_v12  ;;  %v2880_v38 = vadd.f32 %v2879_v33, %v2707_v2 }
 0x38b   :  { %v2886_v40 = vadd.f32 %v2885_v63, %v2708_v39  ;;  %v2857_v17 = vrot.slane %v2856_v43, 2  ;;  %v2892_v15 = vadd.f32 %v2891_v5, %v2709_v16  ;;  %v2898_v9 = vadd.f32 %v2897_v42, %v7481_v45 }
 0x38c   :  { %v2863_v23 = vrot.slane %v2862_v8, 2  ;;  %v2869_v4 = vrot.slane %v2868_v59, 2  ;;  %v2875_v48 = vrot.slane %v2874_v44, 2  ;;  %v2881_v31 = vrot.slane %v2880_v38, 2 }
 0x38d   :  { %v2887_v27 = vrot.slane %v2886_v40, 2  ;;  %v2858_v11 = vadd.f32 %v2857_v17, %v2856_v43  ;;  %v2893_v22 = vrot.slane %v2892_v15, 2  ;;  %v2899_v52 = vrot.slane %v2898_v9, 2 }
 0x38e   :  { %v2864_v1 = vadd.f32 %v2863_v23, %v2862_v8  ;;  %v2870_v14 = vadd.f32 %v2869_v4, %v2868_v59  ;;  %v2876_v56 = vadd.f32 %v2875_v48, %v2874_v44  ;;  %v2882_v10 = vadd.f32 %v2881_v31, %v2880_v38 }
 0x38f   :  { %v2888_v49 = vadd.f32 %v2887_v27, %v2886_v40  ;;  %v2859_v12 = vrot.slane %v2858_v11, 1  ;;  %v2894_v24 = vadd.f32 %v2893_v22, %v2892_v15  ;;  %v2900_v50 = vadd.f32 %v2899_v52, %v2898_v9 }
 0x390   :  { %v2865_v55 = vrot.slane %v2864_v1, 1  ;;  %v2871_v20 = vrot.slane %v2870_v14, 1  ;;  %v2877_v54 = vrot.slane %v2876_v56, 1  ;;  %v2883_v61 = vrot.slane %v2882_v10, 1 }
 0x391   :  { %v2889_v45 = vrot.slane %v2888_v49, 1  ;;  %v2860_v19 = vadd.f32 %v2859_v12, %v2858_v11  ;;  %v2895_v34 = vrot.slane %v2894_v24, 1  ;;  %v2901_v41 = vrot.slane %v2900_v50, 1 }
 0x392   :  { %v2866_v35 = vadd.f32 %v2865_v55, %v2864_v1  ;;  %v2836_v2 = vadd.f32 %v2835_v36, %v2834_v28  ;;  %v2842_v25 = vadd.f32 %v2841_v30, %v2840_v0  ;;  %v2872_v39 = vadd.f32 %v2871_v20, %v2870_v14 }
 0x393   :  { %v2884_v47 = vadd.f32 %v2883_v61, %v2882_v10  ;;  %v2848_v57 = vadd.f32 %v2847_v6, %v2846_v46  ;;  %v2878_v26 = vadd.f32 %v2877_v54, %v2876_v56  ;;  %v2890_v16 = vadd.f32 %v2889_v45, %v2888_v49 }
 0x394   :  { %v2920_v3 = vpack.c.bf16 %v7490_v29, %v7490_v29  ;;  %v2854_v21 = vadd.f32 %v2853_v37, %v7483_v7  ;;  %v2896_v18 = vadd.f32 %v2895_v34, %v2894_v24  ;;  %v2902_v51 = vadd.f32 %v2901_v41, %v2900_v50  ;;  %v7529_v34 = vld [vmem:[#allocation13 + $0x68] sm:$0xff]  ;;  %v7533_v41 = vld [vmem:[#allocation13 + $0x60] sm:$0xff] }
 0x395   :  { %v2919_v33 = vpack.c.bf16 %v7488_v53, %v7488_v53  ;;  %v2921_v63 = vpack.c.bf16 %v7493_v32, %v7493_v32  ;;  %v2922_v28 = vpack.c.bf16 %v7495_v58, %v7495_v58  ;;  %v2927_v0 = vpack.c.bf16 %v2860_v19, %v2860_v19  ;;  %v7522_v19 = vld [vmem:[#allocation13 + $0x78] sm:$0xff] }
 0x396   :  { %v2928_v46 = vpack.c.bf16 %v2866_v35, %v2866_v35  ;;  %v2923_v36 = vpack.c.bf16 %v2836_v2, %v2836_v2  ;;  %v2924_v30 = vpack.c.bf16 %v2842_v25, %v2842_v25  ;;  %v2929_v6 = vpack.c.bf16 %v2872_v39, %v2872_v39  ;;  %v7525_v35 = vld [vmem:[#allocation13 + $0x70] sm:$0xff]  ;;  %v7537_v2 = vld [vmem:[#allocation13 + $0x58] sm:$0xff]  ;;  %v7545_v39 = vld [vmem:[#allocation13 + $0x48] sm:$0xff] }
 0x397   :  { %v2931_v43 = vpack.c.bf16 %v2884_v47, %v2884_v47  ;;  %v2925_v29 = vpack.c.bf16 %v2848_v57, %v2848_v57  ;;  %v2930_v8 = vpack.c.bf16 %v2878_v26, %v2878_v26  ;;  %v2932_v7 = vpack.c.bf16 %v2890_v16, %v2890_v16  ;;  %v7541_v25 = vld [vmem:[#allocation13 + $0x50] sm:$0xff]  ;;  %v7967_v47 = vld [vmem:[#allocation97_spill] sm:$0xff]  ;;  %v7969_v26 = vld [vmem:[#allocation99_spill] sm:$0xff] }
 0x398   :  { %v3000_v37 = vunpack.c.l.b16 %v2920_v3  ;;  %v2926_v5 = vpack.c.bf16 %v2854_v21, %v2854_v21  ;;  %v2933_v42 = vpack.c.bf16 %v2896_v18, %v2896_v18  ;;  %v2934_v59 = vpack.c.bf16 %v2902_v51, %v2902_v51  ;;  %v7968_v57 = vld [vmem:[#allocation98_spill] sm:$0xff]  ;;  %v5462_v3 = vld [vmem:[#allocation14 + $0xec] ss:$16 sps:$4 sm:$0xff]   ;;  %v5690_v51 = vld [vmem:[#allocation2] sm:$0xff] }
 0x399   :  { %v2999_v53 = vunpack.c.l.b16 %v2919_v33  ;;  %v3001_v44 = vunpack.c.l.b16 %v2921_v63  ;;  %v3002_v38 = vunpack.c.l.b16 %v2922_v28  ;;  %v3007_v32 = vunpack.c.l.b16 %v2927_v0  ;;  %v5459_v16 = vld [vmem:[#allocation14 + $0xe4] ss:$16 sps:$4 sm:$0xff]  }
 0x39a   :  { %v3008_v40 = vunpack.c.l.b16 %v2928_v46  ;;  %v3003_v17 = vunpack.c.l.b16 %v2923_v36  ;;  %v3004_v58 = vunpack.c.l.b16 %v2924_v30  ;;  %v3009_v23 = vunpack.c.l.b16 %v2929_v6  ;;  %v5691_v0 = vld [vmem:[#allocation2 + $0x10] sm:$0xff]  ;;  %v5692_v6 = vld [vmem:[#allocation2 + $0x8] sm:$0xff] }
 0x39b   :  { %v3011_v15 = vunpack.c.l.b16 %v2931_v43  ;;  %v3010_v9 = vunpack.c.l.b16 %v2930_v8  ;;  %v3012_v4 = vunpack.c.l.b16 %v2932_v7  ;;  %v3036_v48 = vsel %vm3015_vm6, %v3000_v37, %v2999_v53  ;;  %v5457_v30 = vld [vmem:[#allocation14 + $0xe0] ss:$16 sps:$4 sm:$0xff]   ;;  %v5693_v8 = vld [vmem:[#allocation2 + $0x18] sm:$0xff]  ;;  %v5465_v53 = vld [vmem:[#allocation14 + $0xc4] ss:$16 sps:$4 sm:$0xff]  }
 0x39c   :  { %v3043_v31 = vsel %vm3015_vm6, %v3008_v40, %v3007_v32  ;;  %v3037_v27 = vsel %vm3017_vm7, %v3001_v44, %v3036_v48  ;;  %v3005_v52 = vunpack.c.l.b16 %v2925_v29  ;;  %v3013_v14 = vunpack.c.l.b16 %v2933_v42  ;;  %v5460_v29 = vld [vmem:[#allocation14 + $0xe8] ss:$16 sps:$4 sm:$0xff]   ;;  %v5471_v32 = vld [vmem:[#allocation14 + $0xa4] ss:$16 sps:$4 sm:$0xff]   ;;  %v5469_v40 = vld [vmem:[#allocation14 + $0xa0] ss:$16 sps:$4 sm:$0xff]  }
 0x39d   :  { %v3044_v11 = vsel %vm3017_vm7, %v3009_v23, %v3043_v31  ;;  %v3038_v1 = vsel %vm3019_vm8, %v3002_v38, %v3037_v27  ;;  %v3006_v49 = vunpack.c.l.b16 %v2926_v5  ;;  %v3014_v12 = vunpack.c.l.b16 %v2934_v59  ;;  %v5463_v59 = vld [vmem:[#allocation14 + $0xc0] ss:$16 sps:$4 sm:$0xff]   ;;  %v5466_v44 = vld [vmem:[#allocation14 + $0xc8] ss:$16 sps:$4 sm:$0xff]   ;;  %v5468_v38 = vld [vmem:[#allocation14 + $0xcc] ss:$16 sps:$4 sm:$0xff]  }
 0x39e   :  { %v3045_v22 = vsel %vm3019_vm8, %v3010_v9, %v3044_v11  ;;  %v3039_v56 = vsel %vm3021_vm9, %v3003_v17, %v3038_v1  ;;  %v5474_v17 = vld [vmem:[#allocation14 + $0xac] ss:$16 sps:$4 sm:$0xff]   ;;  %v5477_v23 = vld [vmem:[#allocation14 + $0x84] ss:$16 sps:$4 sm:$0xff]   ;;  %v5475_v9 = vld [vmem:[#allocation14 + $0x80] ss:$16 sps:$4 sm:$0xff]  }
 0x39f   :  { %v3046_v10 = vsel %vm3021_vm9, %v3011_v15, %v3045_v22  ;;  %v3040_v55 = vsel %vm3023_vm10, %v3004_v58, %v3039_v56  ;;  %v5472_v58 = vld [vmem:[#allocation14 + $0xa8] ss:$16 sps:$4 sm:$0xff]   ;;  %v5480_v15 = vld [vmem:[#allocation14 + $0x8c] ss:$16 sps:$4 sm:$0xff]   ;;  %v5483_v48 = vld [vmem:[#allocation14 + $0x64] ss:$16 sps:$4 sm:$0xff]  }
 0x3a0   :  { %v3047_v24 = vsel %vm3023_vm10, %v3012_v4, %v3046_v10  ;;  %v3041_v50 = vsel %vm3025_vm11, %v3005_v52, %v3040_v55  ;;  %v5478_v4 = vld [vmem:[#allocation14 + $0x88] ss:$16 sps:$4 sm:$0xff]   ;;  %v5486_v31 = vld [vmem:[#allocation14 + $0x6c] ss:$16 sps:$4 sm:$0xff]   ;;  %v5481_v27 = vld [vmem:[#allocation14 + $0x60] ss:$16 sps:$4 sm:$0xff]  }
 0x3a1   :  { %v3048_v20 = vsel %vm3025_vm11, %v3013_v14, %v3047_v24  ;;  %v3042_v54 = vsel %vm3027_vm12, %v3006_v49, %v3041_v50  ;;  %v5930_v11 = vmov 0   ;;  %v5484_v1 = vld [vmem:[#allocation14 + $0x68] ss:$16 sps:$4 sm:$0xff]   ;;  %v5489_v22 = vld [vmem:[#allocation14 + $0x44] ss:$16 sps:$4 sm:$0xff]  }
 0x3a2   :  { %v3049_v61 = vsel %vm3027_vm12, %v3014_v12, %v3048_v20  ;;  %v5492_v52 = vld [vmem:[#allocation14 + $0x4c] ss:$16 sps:$4 sm:$0xff]   ;;  %v5487_v14 = vld [vmem:[#allocation14 + $0x40] ss:$16 sps:$4 sm:$0xff]   ;;  %v5490_v56 = vld [vmem:[#allocation14 + $0x48] ss:$16 sps:$4 sm:$0xff]  }
 0x3a3   :  { %v3051_v45 = vpack.c.b16 %v3049_v61, %v3042_v54  ;;  %v5495_v10 = vld [vmem:[#allocation14 + $0x24] ss:$16 sps:$4 sm:$0xff]   ;;  %v5498_v49 = vld [vmem:[#allocation14 + $0x2c] ss:$16 sps:$4 sm:$0xff]   ;;  %v5493_v12 = vld [vmem:[#allocation14 + $0x20] ss:$16 sps:$4 sm:$0xff]  }
 0x3a4   :  { %v5496_v55 = vld [vmem:[#allocation14 + $0x28] ss:$16 sps:$4 sm:$0xff]   ;;  %v5501_v24 = vld [vmem:[#allocation14 + $0x4] ss:$16 sps:$4 sm:$0xff]   ;;  %v5504_v50 = vld [vmem:[#allocation14 + $0xc] ss:$16 sps:$4 sm:$0xff]  }
 0x3a5   :  { %5156 = vmatmul.mubr.bf16.vlgmr.msra.gmra.mxu1 %v3051_v45  ;;  %v5499_v20 = vld [vmem:[#allocation14] ss:$16 sps:$4 sm:$0xff]   ;;  %v5502_v54 = vld [vmem:[#allocation14 + $0x8] ss:$16 sps:$4 sm:$0xff]  }
 0x3a6   :  { %5198 = vmatpush3.msra.mxu1 %v7522_v19  ;;  %v5505_v61 = vld [vmem:[#allocation16 + $0x78] sm:$0xff]  }
 0x3a7   :  { %5199 = vmatprep.subr.mxu1 %v7525_v35  ;;  %v5506_v45 = vld [vmem:[#allocation16 + $0xf8] sm:$0xff]  }
 0x3a8   :  { %5200 = vmatpush3.msra.mxu1 %v7525_v35 }
 0x3a9   :  { %5201 = vmatprep.subr.mxu1 %v7529_v34 }
 0x3aa   :  { %5202 = vmatpush3.msra.mxu1 %v7529_v34 }
 0x3ab   :  { %5203 = vmatprep.subr.mxu1 %v7533_v41 }
 0x3ac   :  { %5204 = vmatpush3.msra.mxu1 %v7533_v41 }
 0x3ad   :  { %5205 = vmatprep.subr.mxu1 %v7537_v2 }
 0x3ae   :  { %5206 = vmatpush3.msra.mxu1 %v7537_v2 }
 0x3af   :  { %5207 = vmatprep.subr.mxu1 %v7541_v25 }
 0x3b0   :  { %5208 = vmatpush3.msra.mxu1 %v7541_v25 }
 0x3b1   :  { %5209 = vmatprep.subr.mxu1 %v7545_v39 }
 0x3b2   :  { %5210 = vmatpush3.msra.mxu1 %v7545_v39 }
 0x3b3   :  { %5211 = vmatprep.subr.mxu1 %v7212_v62 }
 0x3b4   :  { %5212 = vmatpush3.msra.mxu1 %v7212_v62  ;;  %v7970_v62 = vld [vmem:[#allocation87_spill] sm:$0xff] }
 0x3b5   :  { %5213 = vmatprep.subr.mxu1 %v7218_v60 }
 0x3b6   :  { %5214 = vmatpush3.msra.mxu1 %v7218_v60  ;;  %v7563_v60 = vld [vmem:[#allocation13 + $0x8] sm:$0xff] }
 0x3b7   :  { %5215 = vmatprep.subr.mxu1 %v7230_v13  ;;  %5187 = vmatprep.subr.mxu0 %v7563_v60 }
 0x3b8   :  { %5216 = vmatpush3.msra.mxu1 %v7230_v13  ;;  %5188 = vmatpush3.msra.mxu0 %v7563_v60  ;;  %v7569_v13 = vld [vmem:[#allocation13] sm:$0xff] }
 0x3b9   :  { %5217 = vmatprep.subr.mxu1 %v7967_v47  ;;  %5189 = vmatprep.subr.mxu0 %v7569_v13 }
 0x3ba   :  { %5218 = vmatpush3.msra.mxu1 %v7967_v47  ;;  %5190 = vmatpush3.msra.mxu0 %v7569_v13 }
 0x3bb   :  { %5219 = vmatprep.subr.mxu1 %v7968_v57  ;;  %3607 = vmatprep.subr.bf16.mxu0 %v5459_v16 }
 0x3bc   :  { %5220 = vmatpush3.msra.mxu1 %v7968_v57 }
 0x3bd   :  { %5221 = vmatprep.subr.mxu1 %v7969_v26 }
 0x3be   :  { %5222 = vmatpush3.msra.mxu1 %v7969_v26 }
 0x3bf   :  { %5223 = vmatprep.subr.mxu1 %v7970_v62 }
 0x3c0   :  { %5224 = vmatpush3.msra.mxu1 %v7970_v62 }
 0x3c1   :  { %5225 = vmatprep.subr.mxu1 %v7563_v60 }
 0x3c2   :  { %5226 = vmatpush3.msra.mxu1 %v7563_v60 }
 0x3c3   :  { %5227 = vmatprep.subr.mxu1 %v7569_v13 }
 0x3c4   :  { %5228 = vmatpush3.msra.mxu1 %v7569_v13 }
 0x3c5   :  { %3660 = vmatprep.subr.bf16.mxu1 %v5462_v3 }
 0x465   :  { %v5157_v21 = vpop.f32.mrf.mxu1 }
 0x466   :  { %v7580_v46 = vadd.f32 %v5691_v0, %v5157_v21 }
 0x467   :  { %v3136_v18 = vpop.f32.mrf.mxu1 }
 0x468   :  { %v7575_v33 = vadd.f32 %v5690_v51, %v3136_v18  ;;  %v3260_v5 = vmul.f32 %v7580_v46, %v7580_v46 }
 0x469   :  { %v5158_v63 = vpop.f32.mrf.mxu1 }
 0x46a   :  { %5191 = vmatprep.mubr.f32.mxu0 %v7575_v33  ;;  %v3258_v28 = vmul.f32 %v7575_v33, %v7575_v33  ;;  %v7584_v7 = vadd.f32 %v5693_v8, %v5158_v63 }
 0x46b   :  { %v3139_v36 = vpop.f32.mrf.mxu1 }
 0x46c   :  { %v7582_v43 = vadd.f32 %v5692_v6, %v3139_v36  ;;  %5229 = vmatprep.mubr.f32.mxu1 %v3258_v28  ;;  %v3261_v42 = vmul.f32 %v7584_v7, %v7584_v7 }
 0x46e   :  { %v3259_v37 = vmul.f32 %v7582_v43, %v7582_v43  ;;  %5192 = vmatmul.mubr.f32.vlgmr.msra.gmra.mxu0 %v7582_v43 }
 0x46f   :  { %5194 = vmatprep.mubr.f32.mxu0 %v7580_v46  ;;  %3608 = vmatpush1.bf16.msra.mxu0 %v5457_v30 }
 0x470   :  { %5230 = vmatmul.mubr.f32.vlgmr.msra.gmra.mxu1 %v3259_v37  ;;  %3609 = vmatprep.subr.bf16.mxu0 %v5465_v53 }
 0x471   :  { %5232 = vmatprep.mubr.f32.mxu1 %v3260_v5  ;;  %3661 = vmatpush1.bf16.msra.mxu1 %v5460_v29 }
 0x472   :  { %5195 = vmatmul.mubr.f32.gmra.mxu0 %v7584_v7  ;;  %3662 = vmatprep.subr.bf16.mxu1 %v5468_v38 }
 0x473   :  { %3610 = vmatpush1.bf16.msra.mxu0 %v5463_v59  ;;  %3639 = vmatprep.mubr.bf16.mxu0 %v5930_v11 }
 0x474   :  { %5233 = vmatmul.mubr.f32.gmra.mxu1 %v3261_v42  ;;  %3611 = vmatprep.subr.bf16.mxu0 %v5471_v32 }
 0x475   :  { %3663 = vmatpush1.bf16.msra.mxu1 %v5466_v44  ;;  %3692 = vmatprep.mubr.bf16.mxu1 %v5930_v11  ;;  %v4540_v44 = vld [vmem:[%s7713_s11] ss:$0 sm:$0xff] }
 0x476   :  { %3664 = vmatprep.subr.bf16.mxu1 %v5474_v17 }
 0x477   :  { %3612 = vmatpush1.bf16.msra.mxu0 %v5469_v40 }
 0x478   :  { %3613 = vmatprep.subr.bf16.mxu0 %v5477_v23  ;;  %v4541_v23 = vld [vmem:[%s7714_s12] ss:$0 sm:$0xff] }
 0x479   :  { %3665 = vmatpush1.bf16.msra.mxu1 %v5472_v58 }
 0x47a   :  { %3666 = vmatprep.subr.bf16.mxu1 %v5480_v15 }
 0x47b   :  { %3614 = vmatpush1.bf16.msra.mxu0 %v5475_v9 }
 0x47c   :  { %3615 = vmatprep.subr.bf16.mxu0 %v5483_v48 }
 0x47d   :  { %3667 = vmatpush1.bf16.msra.mxu1 %v5478_v4 }
 0x47e   :  { %3668 = vmatprep.subr.bf16.mxu1 %v5486_v31 }
 0x47f   :  { %3616 = vmatpush1.bf16.msra.mxu0 %v5481_v27 }
 0x480   :  { %3617 = vmatprep.subr.bf16.mxu0 %v5489_v22 }
 0x481   :  { %3669 = vmatpush1.bf16.msra.mxu1 %v5484_v1 }
 0x482   :  { %3670 = vmatprep.subr.bf16.mxu1 %v5492_v52 }
 0x483   :  { %3618 = vmatpush1.bf16.msra.mxu0 %v5487_v14  ;;  %v5507_v14 = vld [vmem:[#allocation16 + $0x38] sm:$0xff]  }
 0x484   :  { %3619 = vmatprep.subr.bf16.mxu0 %v5495_v10  ;;  %v5509_v10 = vld [vmem:[#allocation16 + $0x70] sm:$0xff]  }
 0x485   :  { %3671 = vmatpush1.bf16.msra.mxu1 %v5490_v56  ;;  %v5508_v56 = vld [vmem:[#allocation16 + $0xb8] sm:$0xff]  }
 0x486   :  { %3672 = vmatprep.subr.bf16.mxu1 %v5498_v49  ;;  %v5510_v49 = vld [vmem:[#allocation16 + $0xf0] sm:$0xff]  }
 0x487   :  { %3620 = vmatpush1.bf16.msra.mxu0 %v5493_v12  ;;  %v5511_v12 = vld [vmem:[#allocation16 + $0x30] sm:$0xff]  }
 0x488   :  { %3621 = vmatprep.subr.bf16.mxu0 %v5501_v24  ;;  %v5513_v24 = vld [vmem:[#allocation16 + $0x68] sm:$0xff]  }
 0x489   :  { %3673 = vmatpush1.bf16.msra.mxu1 %v5496_v55  ;;  %v5512_v55 = vld [vmem:[#allocation16 + $0xb0] sm:$0xff]  }
 0x48a   :  { %3674 = vmatprep.subr.bf16.mxu1 %v5504_v50  ;;  %v5514_v50 = vld [vmem:[#allocation16 + $0xe8] sm:$0xff]  }
 0x48b   :  { %3622 = vmatpush1.bf16.msra.mxu0 %v5499_v20 }
 0x48c   :  { %4938 = vmatprep.subr.bf16.mxu0 %v5505_v61  ;;  %v5515_v61 = vld [vmem:[#allocation16 + $0x28] sm:$0xff]  }
 0x48d   :  { %3675 = vmatpush1.bf16.msra.mxu1 %v5502_v54 }
 0x48e   :  { %4966 = vmatprep.subr.bf16.mxu1 %v5506_v45  ;;  %v5516_v45 = vld [vmem:[#allocation16 + $0xa8] sm:$0xff]  }
 0x52e   :  { %v5193_v47 = vpop.f32.mrf.mxu0 }
 0x52f   :  { %v3348_v57 = vmul.f32 %v5193_v47, %v5193_v47  ;;  %v3356_v59 = vsub.f32 %v7582_v43, %v5193_v47  ;;  %v5518_v47 = vld [vmem:[#allocation16 + $0xe0] sm:$0xff]  }
 0x530   :  { %v3239_v26 = vpop.f32.mrf.mxu0  ;;  %v5231_v62 = vpop.f32.mrf.mxu1 }
 0x531   :  { %v3347_v16 = vmul.f32 %v3239_v26, %v3239_v26  ;;  %v3352_v3 = vsub.f32 %v5231_v62, %v3348_v57  ;;  %v3355_v38 = vsub.f32 %v7575_v33, %v3239_v26  ;;  %v5519_v57 = vld [vmem:[#allocation16 + $0x20] sm:$0xff]   ;;  %v5521_v62 = vld [vmem:[#allocation16 + $0x58] sm:$0xff]  }
 0x532   :  { %v5196_v21 = vpop.f32.mrf.mxu0  ;;  %v3328_v18 = vpop.f32.mrf.mxu1  ;;  %v5520_v26 = vld [vmem:[#allocation16 + $0xa0] sm:$0xff]  }
 0x533   :  { %v3360_v51 = vadd.f32 1e-06, %v3352_v3  ;;  %v3350_v63 = vmul.f32 %v5196_v21, %v5196_v21  ;;  %v3351_v28 = vsub.f32 %v3328_v18, %v3347_v16  ;;  %v3358_v9 = vsub.f32 %v7584_v7, %v5196_v21  ;;  %v5522_v16 = vld [vmem:[#allocation16 + $0xd8] sm:$0xff]   ;;  %v5525_v18 = vld [vmem:[#allocation16 + $0x50] sm:$0xff]  }
 0x534   :  { %v3249_v0 = vpop.f32.mrf.mxu0  ;;  %v5234_v36 = vpop.f32.mrf.mxu1  ;;  %v5523_v3 = vld [vmem:[#allocation16 + $0x18] sm:$0xff]  }
 0x535   :  { %5667 = vrsqrt.f32 %v3360_v51  ;;  %v3359_v30 = vadd.f32 1e-06, %v3351_v28  ;;  %v3349_v6 = vmul.f32 %v3249_v0, %v3249_v0  ;;  %v3354_v29 = vsub.f32 %v5234_v36, %v3350_v63  ;;  %v5524_v21 = vld [vmem:[#allocation16 + $0x98] sm:$0xff]   ;;  %v5526_v51 = vld [vmem:[#allocation16 + $0xd0] sm:$0xff]   ;;  %v5530_v36 = vld [vmem:[#allocation16 + $0xc8] sm:$0xff]  }
 0x536   :  { %v3338_v8 = vpop.f32.mrf.mxu1  ;;  %v3357_v43 = vsub.f32 %v7580_v46, %v3249_v0  ;;  %v5527_v63 = vld [vmem:[#allocation16 + $0x10] sm:$0xff]   ;;  %v5529_v0 = vld [vmem:[#allocation16 + $0x48] sm:$0xff]  }
 0x537   :  { %5669 = vrsqrt.f32 %v3359_v30  ;;  %v3353_v37 = vsub.f32 %v3338_v8, %v3349_v6  ;;  %v3362_v5 = vadd.f32 1e-06, %v3354_v29  ;;  %v5528_v28 = vld [vmem:[#allocation16 + $0x90] sm:$0xff]   ;;  %v5531_v30 = vld [vmem:[#allocation16 + $0x8] sm:$0xff]   ;;  %v5533_v29 = vld [vmem:[#allocation16 + $0x40] sm:$0xff]  }
 0x538   :  { %v5532_v6 = vld [vmem:[#allocation16 + $0x88] sm:$0xff]   ;;  %v5534_v8 = vld [vmem:[#allocation16 + $0xc0] sm:$0xff]  }
 0x539   :  { %v3361_v42 = vadd.f32 1e-06, %v3353_v37  ;;  %5671 = vrsqrt.f32 %v3362_v5  ;;  %v5535_v37 = vld [vmem:[#allocation16] sm:$0xff]  }
 0x53a   :  { %v5536_v5 = vld [vmem:[#allocation16 + $0x80] sm:$0xff]  }
 0x53b   :  { %5673 = vrsqrt.f32 %v3361_v42  ;;  %v7971_v42 = vld [vmem:[#allocation39_spill] sm:$0xff] }
 0x542   :  { %v5668_v53 = vpop.eup %5667 }
 0x543   :  { %v3368_v32 = vmul.f32 %v5668_v53, %v3356_v59  ;;  %v3433_v59 = vsub.s32 1, %v7971_v42  ;;  %v3441_v53 = vsub.s32 3, %v7971_v42 }
 0x544   :  { %v5670_v40 = vpop.eup %5669 }
 0x545   :  { %v3367_v17 = vmul.f32 %v5670_v40, %v3355_v38  ;;  %v3378_v58 = vmul.f32 %v4540_v44, %v3368_v32  ;;  %v3425_v38 = vld [vmem:[%s7716_s14] sm:$0xf] }
 0x546   :  { %v5672_v15 = vpop.eup %5671 }
 0x547   :  { %v3377_v4 = vmul.f32 %v4540_v44, %v3367_v17  ;;  %v7609_v27 = vadd.f32 %v4541_v23, %v3378_v58  ;;  %v3370_v1 = vmul.f32 %v5672_v15, %v3358_v9  ;;  %v3434_v17 = vrot.slane %v3425_v38, %v3433_v59 }
 0x548   :  { %v5674_v48 = vpop.eup %5673  ;;  %v3442_v58 = vrot.slane %v3425_v38, %v3441_v53 }
 0x549   :  { %v7607_v31 = vadd.f32 %v4541_v23, %v3377_v4  ;;  %v3369_v33 = vmul.f32 %v5674_v48, %v3357_v43  ;;  %v3380_v7 = vmul.f32 %v4540_v44, %v3370_v1 }
 0x54b   :  { %v3391_v22 = vpack.c.bf16 %v7609_v27, %v7607_v31  ;;  %v3379_v52 = vmul.f32 %v4540_v44, %v3369_v33  ;;  %v7617_v20 = vadd.f32 %v4541_v23, %v3380_v7  ;;  %v3437_v44 = vsub.s32 2, %v7971_v42 }
 0x54d   :  { %3640 = vmatmul.mubr.bf16.vlgmr.msra.gmra.mxu0 %v3391_v22  ;;  %3693 = vmatmul.mubr.bf16.vlgmr.msra.gmra.mxu1 %v3391_v22  ;;  %v7615_v46 = vadd.f32 %v4541_v23, %v3379_v52  ;;  %v7972_v23 = vld [vmem:[#allocation44_spill] sm:$0xff]  ;;  %v3438_v9 = vrot.slane %v3425_v38, %v3437_v44 }
 0x54e   :  { %3649 = vmatprep.mubr.bf16.mxu0 %v5930_v11  ;;  %3702 = vmatprep.mubr.bf16.mxu1 %v5930_v11  ;;  %v5517_v11 = vld [vmem:[#allocation16 + $0x60] sm:$0xff]   ;;  %v3430_v15 = vrot.slane %v3425_v38, %v7972_v23 }
 0x54f   :  { %4939 = vmatpush3.bf16.msra.mxu0 %v5507_v14  ;;  %4967 = vmatpush3.bf16.msra.mxu1 %v5508_v56  ;;  %v3392_v54 = vpack.c.bf16 %v7617_v20, %v7615_v46 }
 0x550   :  { %4940 = vmatprep.subr.bf16.mxu0 %v5509_v10  ;;  %4968 = vmatprep.subr.bf16.mxu1 %v5510_v49 }
 0x553   :  { %4941 = vmatpush3.bf16.msra.mxu0 %v5511_v12  ;;  %4969 = vmatpush3.bf16.msra.mxu1 %v5512_v55 }
 0x554   :  { %4942 = vmatprep.subr.bf16.mxu0 %v5513_v24  ;;  %4970 = vmatprep.subr.bf16.mxu1 %v5514_v50 }
 0x555   :  { %3650 = vmatmul.mubr.bf16.gmra.mxu0 %v3392_v54  ;;  %3703 = vmatmul.mubr.bf16.gmra.mxu1 %v3392_v54 }
 0x557   :  { %4943 = vmatpush3.bf16.msra.mxu0 %v5515_v61  ;;  %4971 = vmatpush3.bf16.msra.mxu1 %v5516_v45 }
 0x558   :  { %4944 = vmatprep.subr.bf16.mxu0 %v5517_v11  ;;  %4972 = vmatprep.subr.bf16.mxu1 %v5518_v47 }
 0x55b   :  { %4945 = vmatpush3.bf16.msra.mxu0 %v5519_v57  ;;  %4973 = vmatpush3.bf16.msra.mxu1 %v5520_v26 }
 0x55c   :  { %4946 = vmatprep.subr.bf16.mxu0 %v5521_v62  ;;  %4974 = vmatprep.subr.bf16.mxu1 %v5522_v16 }
 0x55f   :  { %4947 = vmatpush3.bf16.msra.mxu0 %v5523_v3  ;;  %4975 = vmatpush3.bf16.msra.mxu1 %v5524_v21 }
 0x560   :  { %4948 = vmatprep.subr.bf16.mxu0 %v5525_v18  ;;  %4976 = vmatprep.subr.bf16.mxu1 %v5526_v51 }
 0x563   :  { %4949 = vmatpush3.bf16.msra.mxu0 %v5527_v63  ;;  %4977 = vmatpush3.bf16.msra.mxu1 %v5528_v28 }
 0x564   :  { %4950 = vmatprep.subr.bf16.mxu0 %v5529_v0  ;;  %4978 = vmatprep.subr.bf16.mxu1 %v5530_v36 }
 0x567   :  { %4951 = vmatpush3.bf16.msra.mxu0 %v5531_v30  ;;  %4979 = vmatpush3.bf16.msra.mxu1 %v5532_v6 }
 0x568   :  { %4952 = vmatprep.subr.bf16.mxu0 %v5533_v29  ;;  %4980 = vmatprep.subr.bf16.mxu1 %v5534_v8 }
 0x56b   :  { %4953 = vmatpush3.bf16.msra.mxu0 %v5535_v37  ;;  %4981 = vmatpush3.bf16.msra.mxu1 %v5536_v5 }
 0x56c   :  { %5235 = vmatprep.subr.mxu0 %v7522_v19  ;;  %5273 = vmatprep.subr.mxu1 %v7522_v19 }
 0x60d   :  { %v3641_v32 = vpop.f32.mrf.mxu0  ;;  %v3694_v40 = vpop.f32.mrf.mxu1 }
 0x60e   :  { %v3642_v56 = vadd.f32 %v3641_v32, %v3430_v15  ;;  %v3695_v10 = vadd.f32 %v3694_v40, %v3438_v9 }
 0x60f   :  { %v3643_v43 = vpop.f32.mrf.mxu0  ;;  %v3696_v4 = vpop.f32.mrf.mxu1 }
 0x610   :  { %v3644_v1 = vadd.f32 %v3643_v43, %v3434_v17  ;;  %v3697_v22 = vadd.f32 %v3696_v4, %v3442_v58  ;;  %v3713_v26 = vmax.f32 %v3642_v56, 0.0  ;;  %v3715_v62 = vmax.f32 %v3695_v10, 0.0 }
 0x611   :  { %v3645_v48 = vpop.f32.mrf.mxu0  ;;  %v3698_v33 = vpop.f32.mrf.mxu1 }
 0x612   :  { %v3646_v52 = vadd.f32 %v3645_v48, %v3430_v15  ;;  %v3699_v14 = vadd.f32 %v3698_v33, %v3438_v9  ;;  %v3714_v45 = vmax.f32 %v3644_v1, 0.0  ;;  %v3716_v11 = vmax.f32 %v3697_v22, 0.0  ;;  %v5700_v48 = vld [vmem:[#allocation13 + $0x10] sm:$0xff]  ;;  %v5701_v33 = vld [vmem:[%s7712_s10] sm:$0x3] }
 0x613   :  { %v3647_v49 = vpop.f32.mrf.mxu0  ;;  %v3700_v7 = vpop.f32.mrf.mxu1 }
 0x614   :  { %v3648_v12 = vadd.f32 %v3647_v49, %v3434_v17  ;;  %v3701_v55 = vadd.f32 %v3700_v7, %v3442_v58  ;;  %v3717_v24 = vmax.f32 %v3646_v52, 0.0  ;;  %v3719_v50 = vmax.f32 %v3699_v14, 0.0 }
 0x615   :  { %v3651_v54 = vpop.f32.mrf.mxu0  ;;  %v3704_v61 = vpop.f32.mrf.mxu1 }
 0x616   :  { %v3718_v47 = vmax.f32 %v3648_v12, 0.0  ;;  %v3720_v57 = vmax.f32 %v3701_v55, 0.0  ;;  %v3729_v51 = vpack.c.bf16 %v3717_v24, %v3713_v26  ;;  %v3731_v63 = vpack.c.bf16 %v3719_v50, %v3715_v62 }
 0x617   :  { %v3653_v16 = vpop.f32.mrf.mxu0  ;;  %v3706_v3 = vpop.f32.mrf.mxu1  ;;  %v3652_v8 = vadd.f32 %v3651_v54, %v3430_v15  ;;  %v3705_v37 = vadd.f32 %v3704_v61, %v3438_v9 }
 0x618   :  { %v3730_v21 = vpack.c.bf16 %v3718_v47, %v3714_v45  ;;  %v3732_v18 = vpack.c.bf16 %v3720_v57, %v3716_v11  ;;  %v3654_v28 = vadd.f32 %v3653_v16, %v3434_v17  ;;  %v3707_v30 = vadd.f32 %v3706_v3, %v3442_v58 }
 0x619   :  { %v3655_v0 = vpop.f32.mrf.mxu0  ;;  %v3708_v36 = vpop.f32.mrf.mxu1 }
 0x61a   :  { %v3656_v6 = vadd.f32 %v3655_v0, %v3430_v15  ;;  %v3709_v29 = vadd.f32 %v3708_v36, %v3438_v9  ;;  %4032 = vmatprep.mubr.bf16.mxu0 %v3730_v21  ;;  %4081 = vmatprep.mubr.bf16.mxu1 %v3732_v18  ;;  %v3722_v32 = vmax.f32 %v3654_v28, 0.0  ;;  %v3724_v40 = vmax.f32 %v3707_v30, 0.0 }
 0x61b   :  { %v3657_v5 = vpop.f32.mrf.mxu0  ;;  %v3710_v42 = vpop.f32.mrf.mxu1  ;;  %4033 = vmatmul.mubr.bf16.vlgmr.msra.gmra.mxu0 %v3729_v51  ;;  %4082 = vmatmul.mubr.bf16.vlgmr.msra.gmra.mxu1 %v3731_v63 }
 0x61c   :  { %v3658_v59 = vadd.f32 %v3657_v5, %v3434_v17  ;;  %v3711_v53 = vadd.f32 %v3710_v42, %v3442_v58  ;;  %5236 = vmatpush3.msra.mxu0 %v7522_v19  ;;  %5274 = vmatpush3.msra.mxu1 %v7522_v19  ;;  %v3725_v44 = vmax.f32 %v3656_v6, 0.0  ;;  %v3727_v38 = vmax.f32 %v3709_v29, 0.0  ;;  %v7973_v29 = vld [vmem:[#allocation24_spill] sm:$0xff] }
 0x61d   :  { %5237 = vmatprep.subr.mxu0 %v7525_v35  ;;  %5275 = vmatprep.subr.mxu1 %v7525_v35  ;;  %v3721_v17 = vmax.f32 %v3652_v8, 0.0  ;;  %v3723_v58 = vmax.f32 %v3705_v37, 0.0 }
 0x61e   :  { %v3726_v23 = vmax.f32 %v3658_v59, 0.0  ;;  %v3728_v15 = vmax.f32 %v3711_v53, 0.0  ;;  %5238 = vmatpush3.msra.mxu0 %v7525_v35  ;;  %5276 = vmatpush3.msra.mxu1 %v7525_v35  ;;  %v5694_v35 = vld [vmem:[#allocation13 + $0x40] sm:$0xff] }
 0x61f   :  { %5239 = vmatprep.subr.mxu0 %v7529_v34  ;;  %5277 = vmatprep.subr.mxu1 %v7529_v34  ;;  %v3733_v43 = vpack.c.bf16 %v3725_v44, %v3721_v17  ;;  %v3735_v4 = vpack.c.bf16 %v3727_v38, %v3723_v58  ;;  %v5538_v38 = vld [vmem:[%s7974_s5 + $0x8] sm:$0xff]  }
 0x620   :  { %v3734_v19 = vpack.c.bf16 %v3726_v23, %v3722_v32  ;;  %v3736_v9 = vpack.c.bf16 %v3728_v15, %v3724_v40  ;;  %5240 = vmatpush3.msra.mxu0 %v7529_v34  ;;  %5278 = vmatpush3.msra.mxu1 %v7529_v34  ;;  %v5695_v34 = vld [vmem:[#allocation13 + $0x38] sm:$0xff] }
 0x621   :  { %5241 = vmatprep.subr.mxu0 %v7533_v41  ;;  %5279 = vmatprep.subr.mxu1 %v7533_v41 }
 0x622   :  { %4040 = vmatprep.mubr.bf16.mxu0 %v3734_v19  ;;  %4089 = vmatprep.mubr.bf16.mxu1 %v3736_v9 }
 0x623   :  { %4041 = vmatmul.mubr.bf16.gmra.mxu0 %v3733_v43  ;;  %4090 = vmatmul.mubr.bf16.gmra.mxu1 %v3735_v4 }
 0x624   :  { %5242 = vmatpush3.msra.mxu0 %v7533_v41  ;;  %5280 = vmatpush3.msra.mxu1 %v7533_v41  ;;  %v5696_v41 = vld [vmem:[#allocation13 + $0x30] sm:$0xff] }
 0x625   :  { %5243 = vmatprep.subr.mxu0 %v7537_v2  ;;  %5281 = vmatprep.subr.mxu1 %v7537_v2 }
 0x626   :  { %5244 = vmatpush3.msra.mxu0 %v7537_v2  ;;  %5282 = vmatpush3.msra.mxu1 %v7537_v2  ;;  %v5697_v2 = vld [vmem:[#allocation13 + $0x28] sm:$0xff] }
 0x627   :  { %5245 = vmatprep.subr.mxu0 %v7541_v25  ;;  %5283 = vmatprep.subr.mxu1 %v7541_v25 }
 0x628   :  { %5246 = vmatpush3.msra.mxu0 %v7541_v25  ;;  %5284 = vmatpush3.msra.mxu1 %v7541_v25  ;;  %v5698_v25 = vld [vmem:[#allocation13 + $0x20] sm:$0xff] }
 0x629   :  { %5247 = vmatprep.subr.mxu0 %v7545_v39  ;;  %5285 = vmatprep.subr.mxu1 %v7545_v39 }
 0x62a   :  { %5248 = vmatpush3.msra.mxu0 %v7545_v39  ;;  %5286 = vmatpush3.msra.mxu1 %v7545_v39  ;;  %v5699_v39 = vld [vmem:[#allocation13 + $0x18] sm:$0xff] }
 0x62b   :  { %5249 = vmatprep.subr.mxu0 %v5694_v35  ;;  %5287 = vmatprep.subr.mxu1 %v5694_v35 }
 0x62c   :  { %5250 = vmatpush3.msra.mxu0 %v5694_v35  ;;  %5288 = vmatpush3.msra.mxu1 %v5694_v35 }
 0x62d   :  { %5251 = vmatprep.subr.mxu0 %v5695_v34  ;;  %5289 = vmatprep.subr.mxu1 %v5695_v34 }
 0x62e   :  { %5252 = vmatpush3.msra.mxu0 %v5695_v34  ;;  %5290 = vmatpush3.msra.mxu1 %v5695_v34 }
 0x62f   :  { %5253 = vmatprep.subr.mxu0 %v5696_v41  ;;  %5291 = vmatprep.subr.mxu1 %v5696_v41 }
 0x630   :  { %5254 = vmatpush3.msra.mxu0 %v5696_v41  ;;  %5292 = vmatpush3.msra.mxu1 %v5696_v41 }
 0x631   :  { %5255 = vmatprep.subr.mxu0 %v5697_v2  ;;  %5293 = vmatprep.subr.mxu1 %v5697_v2 }
 0x632   :  { %5256 = vmatpush3.msra.mxu0 %v5697_v2  ;;  %5294 = vmatpush3.msra.mxu1 %v5697_v2 }
 0x633   :  { %5257 = vmatprep.subr.mxu0 %v5698_v25  ;;  %5295 = vmatprep.subr.mxu1 %v5698_v25 }
 0x634   :  { %5258 = vmatpush3.msra.mxu0 %v5698_v25  ;;  %5296 = vmatpush3.msra.mxu1 %v5698_v25 }
 0x635   :  { %5259 = vmatprep.subr.mxu0 %v5699_v39  ;;  %5297 = vmatprep.subr.mxu1 %v5699_v39 }
 0x636   :  { %5260 = vmatpush3.msra.mxu0 %v5699_v39  ;;  %5298 = vmatpush3.msra.mxu1 %v5699_v39 }
 0x637   :  { %5261 = vmatprep.subr.mxu0 %v5700_v48  ;;  %5299 = vmatprep.subr.mxu1 %v5700_v48 }
 0x638   :  { %5262 = vmatpush3.msra.mxu0 %v5700_v48  ;;  %5300 = vmatpush3.msra.mxu1 %v5700_v48 }
 0x639   :  { %5263 = vmatprep.subr.mxu0 %v7563_v60  ;;  %5301 = vmatprep.subr.mxu1 %v7563_v60 }
 0x63a   :  { %5264 = vmatpush3.msra.mxu0 %v7563_v60  ;;  %5302 = vmatpush3.msra.mxu1 %v7563_v60  ;;  %v4574_v60 = vld [vmem:[%s7718_s16] ss:$0 sm:$0xff] }
 0x63b   :  { %5265 = vmatprep.subr.mxu0 %v7569_v13  ;;  %5303 = vmatprep.subr.mxu1 %v7569_v13 }
 0x63c   :  { %5266 = vmatpush3.msra.mxu0 %v7569_v13  ;;  %5304 = vmatpush3.msra.mxu1 %v7569_v13 }
 0x63d   :  { %5318 = vmatprep.subr.msk.bf16.mxu0 %vm1874_vm0, %v5701_v33 }
 0x6db   :  { %v4954_v1 = vpop.f32.mrf.mxu0  ;;  %v4982_v22 = vpop.f32.mrf.mxu1 }
 0x6dd   :  { %v4955_v52 = vpop.f32.mrf.mxu0  ;;  %v4983_v14 = vpop.f32.mrf.mxu1 }
 0x6de   :  { %v4956_v56 = vadd.f32 %v4955_v52, %v4954_v1  ;;  %v4984_v12 = vadd.f32 %v4983_v14, %v4982_v22  ;;  %v4607_v14 = vld [vmem:[%s7719_s17] ss:$0 sm:$0xff]  ;;  %s5931_s17 = smov [#allocation17]  }
 0x6df   :  { %v4957_v10 = vpop.f32.mrf.mxu0  ;;  %v4985_v49 = vpop.f32.mrf.mxu1 }
 0x6e0   :  { %v4035_v7 = vadd.f32 %v4956_v56, %v4574_v60 }
 0x6e1   :  { %v4958_v13 = vpop.f32.mrf.mxu0  ;;  %v4986_v55 = vpop.f32.mrf.mxu1 }
 0x6e2   :  { %v4084_v24 = vadd.f32 %v4984_v12, %v4035_v7  ;;  %v4959_v50 = vadd.f32 %v4958_v13, %v4957_v10  ;;  %v4987_v11 = vadd.f32 %v4986_v55, %v4985_v49  ;;  %v4608_v12 = vld [vmem:[%s7720_s18] ss:$0 sm:$0xff]  ;;  %s4404_s18 = sshll.u32 %s5931_s17, 4  ;;  %s4405_s18 = int_to_ptr.vmem [resolvable:$true] %s4404_s18 }
 0x6e3   :  { %v4960_v54 = vpop.f32.mrf.mxu0  ;;  %v4988_v61 = vpop.f32.mrf.mxu1  ;;  %s5882_s24 = scalar_lea.vmem %s4405_s18, 512  ;;  %p5887_p4 = scmp.lt.s32.totalorder %s4405_s18, %s4405_s18 }
 0x6e4   :  { %v4038_v45 = vadd.f32 %v4959_v50, %v4574_v60  ;;  %v7672_v47 = vadd.f32 %v4084_v24, %v7607_v31  ;;  %p5883_p3 = scmp.ne.s32.totalorder %s4405_s18, %s5882_s24  ;;  %p5888_p5 = scmp.lt.s32.totalorder %s5882_s24, %s5882_s24 }
 0x6e5   :  { %v4961_v57 = vpop.f32.mrf.mxu0  ;;  %v4989_v26 = vpop.f32.mrf.mxu1 }
 0x6e6   :  { %v4087_v62 = vadd.f32 %v4987_v11, %v4038_v45  ;;  %v4962_v16 = vadd.f32 %v4961_v57, %v4960_v54  ;;  %5267 = vmatprep.mubr.f32.mxu0 %v7672_v47  ;;  %v4189_v3 = vmul.f32 %v7672_v47, %v7672_v47  ;;  %v4990_v28 = vadd.f32 %v4989_v26, %v4988_v61  ;;  %p5889_p6 = por %p5888_p5, %p5887_p4 }
 0x6e7   :  { %v4963_v21 = vpop.f32.mrf.mxu0  ;;  %v4991_v18 = vpop.f32.mrf.mxu1 }
 0x6e8   :  { %v4099_v51 = vadd.f32 %v4087_v62, %v7609_v27  ;;  %v4043_v63 = vadd.f32 %v4962_v16, %v4574_v60  ;;  %5305 = vmatprep.mubr.f32.mxu1 %v4189_v3  ;;  %v5537_v27 = vld [vmem:[%s7974_s5] sm:$0xff]   ;;  %p5890_p7 = pnand %p5889_p6, %p5883_p3 }
 0x6e9   :  { %v4964_v0 = vpop.f32.mrf.mxu0  ;;  %v4992_v36 = vpop.f32.mrf.mxu1 }
 0x6ea   :  { %v4190_v31 = vmul.f32 %v4099_v51, %v4099_v51  ;;  %v4092_v30 = vadd.f32 %v4990_v28, %v4043_v63  ;;  %v4965_v6 = vadd.f32 %v4964_v0, %v4963_v21  ;;  %5268 = vmatmul.mubr.f32.vlgmr.msra.gmra.mxu0 %v4099_v51  ;;  %v4993_v37 = vadd.f32 %v4992_v36, %v4991_v18 }
 0x6eb   :  { %5312 = vmatpush3.bf16.msra.mxu0 %v7973_v29 }
 0x6ec   :  { %v4046_v8 = vadd.f32 %v4965_v6, %v4574_v60  ;;  %5306 = vmatmul.mubr.f32.vlgmr.msra.gmra.mxu1 %v4190_v31  ;;  %v4100_v5 = vadd.f32 %v4092_v30, %v7615_v46 }
 0x6ee   :  { %v4095_v42 = vadd.f32 %v4993_v37, %v4046_v8  ;;  %5270 = vmatprep.mubr.f32.mxu0 %v4100_v5  ;;  %v4191_v59 = vmul.f32 %v4100_v5, %v4100_v5 }
 0x6f0   :  { %v4101_v53 = vadd.f32 %v4095_v42, %v7617_v20  ;;  %5308 = vmatprep.mubr.f32.mxu1 %v4191_v59 }
 0x6f2   :  { %5271 = vmatmul.mubr.f32.gmra.mxu0 %v4101_v53  ;;  %v4192_v44 = vmul.f32 %v4101_v53, %v4101_v53 }
 0x6f3   :  { %5313 = vmatprep.mubr.msk.bf16.mxu0 %vm1825_vm1, %v5537_v27 }
 0x6f4   :  { %5309 = vmatmul.mubr.f32.gmra.mxu1 %v4192_v44 }
 0x6f6   :  { %5314 = vmatmul.mubr.msk.bf16.vlgmr.msra.gmra.mxu0 %vm1825_vm1, %v5538_v38 }
 0x7aa   :  { %v5269_v46 = vpop.f32.mrf.mxu0 }
 0x7ab   :  { %v4279_v32 = vmul.f32 %v5269_v46, %v5269_v46  ;;  %v4287_v60 = vsub.f32 %v4099_v51, %v5269_v46 }
 0x7ac   :  { %v4170_v40 = vpop.f32.mrf.mxu0  ;;  %v5307_v23 = vpop.f32.mrf.mxu1 }
 0x7ad   :  { %v4278_v15 = vmul.f32 %v4170_v40, %v4170_v40  ;;  %v4283_v17 = vsub.f32 %v5307_v23, %v4279_v32  ;;  %v4286_v10 = vsub.f32 %v7672_v47, %v4170_v40 }
 0x7ae   :  { %v4259_v58 = vpop.f32.mrf.mxu1 }
 0x7af   :  { %v4291_v20 = vadd.f32 1e-06, %v4283_v17  ;;  %v4282_v19 = vsub.f32 %v4259_v58, %v4278_v15 }
 0x7b1   :  { %5675 = vrsqrt.f32 %v4291_v20  ;;  %v4290_v9 = vadd.f32 1e-06, %v4282_v19 }
 0x7b2   :  { %v5272_v43 = vpop.f32.mrf.mxu0 }
 0x7b3   :  { %5677 = vrsqrt.f32 %v4290_v9  ;;  %v4281_v4 = vmul.f32 %v5272_v43, %v5272_v43  ;;  %v4289_v61 = vsub.f32 %v4101_v53, %v5272_v43 }
 0x7b4   :  { %v4180_v35 = vpop.f32.mrf.mxu0  ;;  %v5310_v34 = vpop.f32.mrf.mxu1 }
 0x7b5   :  { %v4280_v41 = vmul.f32 %v4180_v35, %v4180_v35  ;;  %v4285_v2 = vsub.f32 %v5310_v34, %v4281_v4  ;;  %v4288_v26 = vsub.f32 %v4100_v5, %v4180_v35 }
 0x7b6   :  { %v4269_v25 = vpop.f32.mrf.mxu1  ;;  %v5315_v39 = vpop.f32.mrf.mxu0 }
 0x7b7   :  { %v4293_v48 = vadd.f32 1e-06, %v4285_v2  ;;  %v4284_v33 = vsub.f32 %v4269_v25, %v4280_v41 }
 0x7b8   :  { %v4376_v22 = vpop.f32.mrf.mxu0 }
 0x7b9   :  { %5679 = vrsqrt.f32 %v4293_v48  ;;  %v4292_v1 = vadd.f32 1e-06, %v4284_v33 }
 0x7ba   :  { %v5316_v56 = vpop.f32.mrf.mxu0 }
 0x7bb   :  { %5681 = vrsqrt.f32 %v4292_v1 }
 0x7bc   :  { %v4379_v24 = vpop.f32.mrf.mxu0 }
 0x7be   :  { %v5676_v52 = vpop.eup %5675 }
 0x7bf   :  { %v4299_v49 = vmul.f32 %v5676_v52, %v4287_v60 }
 0x7c0   :  { %v5678_v7 = vpop.eup %5677 }
 0x7c1   :  { %v4298_v13 = vmul.f32 %v5678_v7, %v4286_v10  ;;  %v4309_v55 = vmul.f32 %v4607_v14, %v4299_v49 }
 0x7c3   :  { %v4308_v50 = vmul.f32 %v4607_v14, %v4298_v13  ;;  %v4319_v54 = vadd.f32 %v4608_v12, %v4309_v55 }
 0x7c5   :  { %v4318_v45 = vadd.f32 %v4608_v12, %v4308_v50  ;;  %v4392_v11 = vmul.f32 %v4379_v24, %v4319_v54 }
 0x7c6   :  { %v5680_v57 = vpop.eup %5679 }
 0x7c7   :  { %v4391_v62 = vmul.f32 %v4376_v22, %v4318_v45  ;;  %v4301_v16 = vmul.f32 %v5680_v57, %v4289_v61  ;;  %4396 = vst [vmem:[#allocation17 + $0x8] sm:$0xff] %v4392_v11 }
 0x7c8   :  { %v5682_v47 = vpop.eup %5681 }
 0x7c9   :  { %v4300_v3 = vmul.f32 %v5682_v47, %v4288_v26  ;;  %4395 = vst [vmem:[#allocation17] sm:$0xff] %v4391_v62  ;;  %v4311_v21 = vmul.f32 %v4607_v14, %v4301_v16 }
 0x7cb   :  { %v4310_v18 = vmul.f32 %v4607_v14, %v4300_v3  ;;  %v4321_v51 = vadd.f32 %v4608_v12, %v4311_v21 }
 0x7cd   :  { %v4320_v63 = vadd.f32 %v4608_v12, %v4310_v18  ;;  %v4394_v28 = vmul.f32 %v5316_v56, %v4321_v51 }
 0x7cf   :  { %v4393_v0 = vmul.f32 %v5315_v39, %v4320_v63  ;;  %4398 = vst [vmem:[#allocation17 + $0x18] sm:$0xff] %v4394_v28 }
 0x7d1   :  { %4397 = vst [vmem:[#allocation17 + $0x10] sm:$0xff] %v4393_v0 }
 0x7d2   :  { %5893 = shalt.err (!%p5890_p7)
}
 0x7d3   :  { %4410 = dma.vmem_to_hbm [thread:$0]  %s4405_s18, 512, %s7721_s19, [#allocation4], %s5915_s21, %s5915_s21, %s5916_s1  }
 0x7d4   :  { %5912 = dma.done.wait [#allocation4], 512  }
 0x7d5   :  { %5913 = vsyncadd [#allocation4], 4294966784 }
 0x7d6   :  { %4414 = vsyncpa [#allocation3], 1 }
 0x7d7   :  { %4415 = vsyncpa [#allocation6], 1 }
 0x7d8   :  { %4416 = vsyncpa [#allocation9], 1 }
 0x7d9   :  { %4417 = vsyncpa [#allocation12], 1 }
 0x7da   :  { %4418 = vsyncpa [#allocation15], 1 }
 0x7db   :  { %4419 = vsyncpa [#allocation4], 1 }

</bundles_post_ra>
